<compile_context>
chip_gen: v7x
topology: tpu7x:2x2x1
jax: 0.10.0
libtpu: 0.0.40
codegen_flags: <defaults>
</compile_context>

<pallas_src>
import jax
import jax.numpy as jnp
import numpy as np
from jax import lax
from jax.experimental import pallas as pl
from jax.experimental.pallas import tpu as pltpu  # noqa: F401  (TPU backend)

# ---- ddsp-style config (small, synthetic) ----
CONV_HIDDEN = 32          # ddsp.conv_hidden_size
CONV_KERNEL = 5           # ddsp.conv_kernel_size (odd -> symmetric padding K//2)
STRIDES = (2, 2, 2)       # ddsp.strides
CONV_OUT = 16             # ddsp.conv_out_size
NL = len(STRIDES)         # number of conv layers
PAD = CONV_KERNEL // 2
CH = CONV_HIDDEN          # uniform packed channel width (last layer has 2*Cout == CH)
assert 2 * CONV_OUT == CONV_HIDDEN, "packed weight slab assumes 2*conv_out == hidden"

B = 2                     # batch
L_IN = 64                 # input waveform length


def _conv_out_len(l_in, stride):
    # PyTorch Conv1d: floor((L + 2*pad - K) / stride) + 1
    return (l_in + 2 * PAD - CONV_KERNEL) // stride + 1


_LENS = [L_IN]
for _s in STRIDES:
    _LENS.append(_conv_out_len(_LENS[-1], _s))
L_OUT = _LENS[-1]                      # final time length (8)
C_IN_L = [1] + [CH] * (NL - 1)         # per-layer input channels


# ------------------------------- Pallas kernel ----------------------------------

def encoder_kernel(x_ref, w_ref, b_ref, *rest):
    """Single invocation, whole batch.

    x_ref : [B*L_IN, CH]       waveform in channel 0, zeros elsewhere
    w_ref : [NL, K*CH, CH]     im2col-flattened weights: w[l, k*CH+ci, co]
    b_ref : [NL, 1, CH]
    g_refs: per-layer static gather slabs g_l[k] : [B*l_out, B*l_in]
            (fold zero-padding + tap shift + stride decimation; block-diag in B)
    out   : [B*L_OUT, 2*Cout]
    """
    *g_refs, out_ref = rest
    h = x_ref[...]                                          # [B*L_IN, CH]

    for l in range(NL):                                     # static unroll over layers
        g = g_refs[l]
        # K independent gather matmuls (pad+shift+stride as one 0/1 matrix each),
        # then one lane-concat and ONE big im2col matmul (contraction K*CH = 160).
        cols = [
            jnp.dot(g[k], h,
                    preferred_element_type=jnp.float32,
                    precision=lax.Precision.HIGHEST)
            for k in range(CONV_KERNEL)
        ]
        win = jnp.concatenate(cols, axis=1)                 # [B*l_out, K*CH]
        h = jnp.dot(win, w_ref[l],
                    preferred_element_type=jnp.float32,
                    precision=lax.Precision.HIGHEST) + b_ref[l]
        if l != NL - 1:                                     # ReLU on all but the last layer
            h = jnp.maximum(h, 0.0)

    out_ref[...] = h.astype(out_ref.dtype)                  # single fused output slab


# ------------------------------- wrapper / glue ----------------------------------

def _encoder_pallas(x_slab, w_flat, b_all, g_mats):
    # Gridless single-step pallas_call: every operand is small (< 400 KiB total),
    # so the whole problem lives in VMEM for one invocation — no serial grid loop.
    return pl.pallas_call(
        encoder_kernel,
        out_shape=jax.ShapeDtypeStruct((B * L_OUT, 2 * CONV_OUT), jnp.float32),
    )(x_slab, w_flat, b_all, *g_mats)


@jax.jit
def encoder_forward(x, w_flat, b_all, g0, g1, g2):
    """x: [B, 1, L_IN] raw waveform (PyTorch Conv1d layout).

    Returns (z_mean [B, T, CONV_OUT], z_var [B, T, CONV_OUT]).
    """
    # Layout plumbing only: batch stacked along sublanes, waveform in channel 0.
    x_col = jnp.transpose(x, (0, 2, 1)).reshape(B * L_IN, 1)
    x_slab = jnp.pad(x_col, ((0, 0), (0, CH - 1)))          # [B*L_IN, CH]
    z = _encoder_pallas(x_slab, w_flat, b_all, (g0, g1, g2))  # [B*L_OUT, 2*Cout]
    z = z.reshape(B, L_OUT, 2 * CONV_OUT)                   # torch transpose(1,2) is free
    return z[..., :CONV_OUT], z[..., CONV_OUT:]             # split done in the wrapper


# ------------------------------- static operators --------------------------------

def build_gather_mats():
    """Per-layer [K, B*l_out, B*l_in] 0/1 matrices: out row (b, t) picks input row
    (b, t*stride + k - PAD), or all-zeros when that index falls in the zero padding.
    Block-diagonal over the batch, so B is folded into one kernel step."""
    mats = []
    for l in range(NL):
        s = STRIDES[l]
        l_in, l_out = _LENS[l], _LENS[l + 1]
        g = np.zeros((CONV_KERNEL, B * l_out, B * l_in), np.float32)
        for k in range(CONV_KERNEL):
            for b in range(B):
                for t in range(l_out):
                    j = t * s + k - PAD
                    if 0 <= j < l_in:
                        g[k, b * l_out + t, b * l_in + j] = 1.0
        mats.append(jnp.asarray(g))
    return tuple(mats)


# ------------------------------- parameter init ----------------------------------

def init_params(key):
    """Flattened im2col slabs: w_flat[l, k*CH + ci, co] == torch conv_l.weight[co, ci, k]."""
    w_flat = np.zeros((NL, CONV_KERNEL * CH, CH), np.float32)
    b = np.zeros((NL, 1, CH), np.float32)
    keys = jax.random.split(key, 2 * NL)
    for l in range(NL):
        c_in = C_IN_L[l]
        scale = 1.0 / np.sqrt(c_in * CONV_KERNEL)            # PyTorch Conv1d default init
        wl = np.asarray(jax.random.uniform(keys[2 * l], (CONV_KERNEL, c_in, CH),
                                           jnp.float32, -scale, scale))
        bl = np.asarray(jax.random.uniform(keys[2 * l + 1], (1, CH),
                                           jnp.float32, -scale, scale))
        for k in range(CONV_KERNEL):
            w_flat[l, k * CH:k * CH + c_in, :] = wl[k]
        b[l] = bl
    return jnp.asarray(w_flat), jnp.asarray(b)


# ------------------------------- pure-JAX reference --------------------------------

def encoder_reference(x, w_flat, b_all):
    h = x                                                    # [B, 1, L]
    for l in range(NL):
        c_in = C_IN_L[l]
        w = w_flat[l].reshape(CONV_KERNEL, CH, CH)[:, :c_in, :]   # [K, c_in, C_out]
        w = jnp.transpose(w, (2, 1, 0))                           # [C_out, C_in, K]
        h = lax.conv_general_dilated(
            h, w, window_strides=(STRIDES[l],), padding=[(PAD, PAD)],
            dimension_numbers=("NCH", "OIH", "NCH"),
            precision=lax.Precision.HIGHEST)
        h = h + b_all[l].reshape(1, CH, 1)
        if l != NL - 1:
            h = jnp.maximum(h, 0.0)
    h = jnp.transpose(h, (0, 2, 1))                          # [B, T, 2*Cout]
    return h[..., :CONV_OUT], h[..., CONV_OUT:]


# ------------------------------------ main ----------------------------------------

if __name__ == "__main__":
    key = jax.random.PRNGKey(0)
    k_p, k_x = jax.random.split(key)

    w_flat, b_all = init_params(k_p)
    g0, g1, g2 = build_gather_mats()
    x = jax.random.normal(k_x, (B, 1, L_IN), jnp.float32)    # raw waveform

    z_mean, z_var = encoder_forward(x, w_flat, b_all, g0, g1, g2)
    jax.block_until_ready((z_mean, z_var))

    assert z_mean.shape == (B, L_OUT, CONV_OUT)
    assert z_var.shape == (B, L_OUT, CONV_OUT)
    assert bool(jnp.all(jnp.isfinite(z_mean))) and bool(jnp.all(jnp.isfinite(z_var)))

    # correctness vs XLA conv reference (tight tol: both sides run f32 HIGHEST precision)
    rm, rv = encoder_reference(x, w_flat, b_all)
    ok = (np.allclose(np.asarray(z_mean), np.asarray(rm), rtol=1e-4, atol=1e-5)
          and np.allclose(np.asarray(z_var), np.asarray(rv), rtol=1e-4, atol=1e-5))
    if not ok:
        raise AssertionError("Pallas encoder disagrees with the reference conv stack")

    print("KERNEL_OK")
</pallas_src>

<mosaic_0001>
module attributes {stable_mosaic.version = 11 : i64} {
  func.func @encoder_kernel(%arg0: memref<128x32xf32, #tpu.memory_space<vmem>>, %arg1: memref<3x160x32xf32, #tpu.memory_space<vmem>>, %arg2: memref<3x1x32xf32, #tpu.memory_space<vmem>>, %arg3: memref<5x64x128xf32, #tpu.memory_space<vmem>>, %arg4: memref<5x32x64xf32, #tpu.memory_space<vmem>>, %arg5: memref<5x16x32xf32, #tpu.memory_space<vmem>>, %arg6: memref<16x32xf32, #tpu.memory_space<vmem>>) attributes {dimension_semantics = [], scalar_prefetch = 0 : i64, scratch_operands = 0 : i64, tpu.core_type = #tpu.core_type<tc>} {
    %c0 = arith.constant 0 : index
    %c0_0 = arith.constant 0 : index
    %0 = vector.load %arg0[%c0, %c0_0] : memref<128x32xf32, #tpu.memory_space<vmem>>, vector<128x32xf32>
    %c0_1 = arith.constant 0 : index
    %c0_2 = arith.constant 0 : index
    %c0_3 = arith.constant 0 : index
    %1 = vector.load %arg3[%c0_1, %c0_2, %c0_3] : memref<5x64x128xf32, #tpu.memory_space<vmem>>, vector<1x64x128xf32>
    %2 = vector.shape_cast %1 : vector<1x64x128xf32> to vector<64x128xf32>
    %cst = arith.constant dense<0.000000e+00> : vector<64x32xf32>
    %3 = tpu.matmul %2, %0, %cst {dimension_numbers = #tpu.dot_dimension_numbers<[1], [0], [0], [1], [0, 0, 1, 1], [], []>, precision = #tpu.contract_precision<fp32>} : vector<64x128xf32>, vector<128x32xf32>, vector<64x32xf32> -> vector<64x32xf32>
    %c1 = arith.constant 1 : index
    %c0_4 = arith.constant 0 : index
    %c0_5 = arith.constant 0 : index
    %4 = vector.load %arg3[%c1, %c0_4, %c0_5] : memref<5x64x128xf32, #tpu.memory_space<vmem>>, vector<1x64x128xf32>
    %5 = vector.shape_cast %4 : vector<1x64x128xf32> to vector<64x128xf32>
    %cst_6 = arith.constant dense<0.000000e+00> : vector<64x32xf32>
    %6 = tpu.matmul %5, %0, %cst_6 {dimension_numbers = #tpu.dot_dimension_numbers<[1], [0], [0], [1], [0, 0, 1, 1], [], []>, precision = #tpu.contract_precision<fp32>} : vector<64x128xf32>, vector<128x32xf32>, vector<64x32xf32> -> vector<64x32xf32>
    %c2 = arith.constant 2 : index
    %c0_7 = arith.constant 0 : index
    %c0_8 = arith.constant 0 : index
    %7 = vector.load %arg3[%c2, %c0_7, %c0_8] : memref<5x64x128xf32, #tpu.memory_space<vmem>>, vector<1x64x128xf32>
    %8 = vector.shape_cast %7 : vector<1x64x128xf32> to vector<64x128xf32>
    %cst_9 = arith.constant dense<0.000000e+00> : vector<64x32xf32>
    %9 = tpu.matmul %8, %0, %cst_9 {dimension_numbers = #tpu.dot_dimension_numbers<[1], [0], [0], [1], [0, 0, 1, 1], [], []>, precision = #tpu.contract_precision<fp32>} : vector<64x128xf32>, vector<128x32xf32>, vector<64x32xf32> -> vector<64x32xf32>
    %c3 = arith.constant 3 : index
    %c0_10 = arith.constant 0 : index
    %c0_11 = arith.constant 0 : index
    %10 = vector.load %arg3[%c3, %c0_10, %c0_11] : memref<5x64x128xf32, #tpu.memory_space<vmem>>, vector<1x64x128xf32>
    %11 = vector.shape_cast %10 : vector<1x64x128xf32> to vector<64x128xf32>
    %cst_12 = arith.constant dense<0.000000e+00> : vector<64x32xf32>
    %12 = tpu.matmul %11, %0, %cst_12 {dimension_numbers = #tpu.dot_dimension_numbers<[1], [0], [0], [1], [0, 0, 1, 1], [], []>, precision = #tpu.contract_precision<fp32>} : vector<64x128xf32>, vector<128x32xf32>, vector<64x32xf32> -> vector<64x32xf32>
    %c4 = arith.constant 4 : index
    %c0_13 = arith.constant 0 : index
    %c0_14 = arith.constant 0 : index
    %13 = vector.load %arg3[%c4, %c0_13, %c0_14] : memref<5x64x128xf32, #tpu.memory_space<vmem>>, vector<1x64x128xf32>
    %14 = vector.shape_cast %13 : vector<1x64x128xf32> to vector<64x128xf32>
    %cst_15 = arith.constant dense<0.000000e+00> : vector<64x32xf32>
    %15 = tpu.matmul %14, %0, %cst_15 {dimension_numbers = #tpu.dot_dimension_numbers<[1], [0], [0], [1], [0, 0, 1, 1], [], []>, precision = #tpu.contract_precision<fp32>} : vector<64x128xf32>, vector<128x32xf32>, vector<64x32xf32> -> vector<64x32xf32>
    %16 = tpu.concatenate %3, %6, %9, %12, %15 in 1 : vector<64x32xf32>, vector<64x32xf32>, vector<64x32xf32>, vector<64x32xf32>, vector<64x32xf32> -> vector<64x160xf32>
    %c0_16 = arith.constant 0 : index
    %c0_17 = arith.constant 0 : index
    %c0_18 = arith.constant 0 : index
    %17 = vector.load %arg1[%c0_16, %c0_17, %c0_18] : memref<3x160x32xf32, #tpu.memory_space<vmem>>, vector<1x160x32xf32>
    %18 = vector.shape_cast %17 : vector<1x160x32xf32> to vector<160x32xf32>
    %cst_19 = arith.constant dense<0.000000e+00> : vector<64x32xf32>
    %19 = tpu.matmul %16, %18, %cst_19 {dimension_numbers = #tpu.dot_dimension_numbers<[1], [0], [0], [1], [0, 0, 1, 1], [], []>, precision = #tpu.contract_precision<fp32>} : vector<64x160xf32>, vector<160x32xf32>, vector<64x32xf32> -> vector<64x32xf32>
    %c0_20 = arith.constant 0 : index
    %c0_21 = arith.constant 0 : index
    %c0_22 = arith.constant 0 : index
    %20 = vector.load %arg2[%c0_20, %c0_21, %c0_22] : memref<3x1x32xf32, #tpu.memory_space<vmem>>, vector<1x1x32xf32>
    %21 = vector.shape_cast %20 : vector<1x1x32xf32> to vector<1x32xf32>
    %22 = vector.broadcast %21 : vector<1x32xf32> to vector<64x32xf32>
    %23 = arith.addf %19, %22 : vector<64x32xf32>
    %cst_23 = arith.constant 0.000000e+00 : f32
    %24 = vector.broadcast %cst_23 : f32 to vector<64x32xf32>
    %25 = arith.maximumf %23, %24 : vector<64x32xf32>
    %c0_24 = arith.constant 0 : index
    %c0_25 = arith.constant 0 : index
    %c0_26 = arith.constant 0 : index
    %26 = vector.load %arg4[%c0_24, %c0_25, %c0_26] : memref<5x32x64xf32, #tpu.memory_space<vmem>>, vector<1x32x64xf32>
    %27 = vector.shape_cast %26 : vector<1x32x64xf32> to vector<32x64xf32>
    %cst_27 = arith.constant dense<0.000000e+00> : vector<32x32xf32>
    %28 = tpu.matmul %27, %25, %cst_27 {dimension_numbers = #tpu.dot_dimension_numbers<[1], [0], [0], [1], [0, 0, 1, 1], [], []>, precision = #tpu.contract_precision<fp32>} : vector<32x64xf32>, vector<64x32xf32>, vector<32x32xf32> -> vector<32x32xf32>
    %c1_28 = arith.constant 1 : index
    %c0_29 = arith.constant 0 : index
    %c0_30 = arith.constant 0 : index
    %29 = vector.load %arg4[%c1_28, %c0_29, %c0_30] : memref<5x32x64xf32, #tpu.memory_space<vmem>>, vector<1x32x64xf32>
    %30 = vector.shape_cast %29 : vector<1x32x64xf32> to vector<32x64xf32>
    %cst_31 = arith.constant dense<0.000000e+00> : vector<32x32xf32>
    %31 = tpu.matmul %30, %25, %cst_31 {dimension_numbers = #tpu.dot_dimension_numbers<[1], [0], [0], [1], [0, 0, 1, 1], [], []>, precision = #tpu.contract_precision<fp32>} : vector<32x64xf32>, vector<64x32xf32>, vector<32x32xf32> -> vector<32x32xf32>
    %c2_32 = arith.constant 2 : index
    %c0_33 = arith.constant 0 : index
    %c0_34 = arith.constant 0 : index
    %32 = vector.load %arg4[%c2_32, %c0_33, %c0_34] : memref<5x32x64xf32, #tpu.memory_space<vmem>>, vector<1x32x64xf32>
    %33 = vector.shape_cast %32 : vector<1x32x64xf32> to vector<32x64xf32>
    %cst_35 = arith.constant dense<0.000000e+00> : vector<32x32xf32>
    %34 = tpu.matmul %33, %25, %cst_35 {dimension_numbers = #tpu.dot_dimension_numbers<[1], [0], [0], [1], [0, 0, 1, 1], [], []>, precision = #tpu.contract_precision<fp32>} : vector<32x64xf32>, vector<64x32xf32>, vector<32x32xf32> -> vector<32x32xf32>
    %c3_36 = arith.constant 3 : index
    %c0_37 = arith.constant 0 : index
    %c0_38 = arith.constant 0 : index
    %35 = vector.load %arg4[%c3_36, %c0_37, %c0_38] : memref<5x32x64xf32, #tpu.memory_space<vmem>>, vector<1x32x64xf32>
    %36 = vector.shape_cast %35 : vector<1x32x64xf32> to vector<32x64xf32>
    %cst_39 = arith.constant dense<0.000000e+00> : vector<32x32xf32>
    %37 = tpu.matmul %36, %25, %cst_39 {dimension_numbers = #tpu.dot_dimension_numbers<[1], [0], [0], [1], [0, 0, 1, 1], [], []>, precision = #tpu.contract_precision<fp32>} : vector<32x64xf32>, vector<64x32xf32>, vector<32x32xf32> -> vector<32x32xf32>
    %c4_40 = arith.constant 4 : index
    %c0_41 = arith.constant 0 : index
    %c0_42 = arith.constant 0 : index
    %38 = vector.load %arg4[%c4_40, %c0_41, %c0_42] : memref<5x32x64xf32, #tpu.memory_space<vmem>>, vector<1x32x64xf32>
    %39 = vector.shape_cast %38 : vector<1x32x64xf32> to vector<32x64xf32>
    %cst_43 = arith.constant dense<0.000000e+00> : vector<32x32xf32>
    %40 = tpu.matmul %39, %25, %cst_43 {dimension_numbers = #tpu.dot_dimension_numbers<[1], [0], [0], [1], [0, 0, 1, 1], [], []>, precision = #tpu.contract_precision<fp32>} : vector<32x64xf32>, vector<64x32xf32>, vector<32x32xf32> -> vector<32x32xf32>
    %41 = tpu.concatenate %28, %31, %34, %37, %40 in 1 : vector<32x32xf32>, vector<32x32xf32>, vector<32x32xf32>, vector<32x32xf32>, vector<32x32xf32> -> vector<32x160xf32>
    %c1_44 = arith.constant 1 : index
    %c0_45 = arith.constant 0 : index
    %c0_46 = arith.constant 0 : index
    %42 = vector.load %arg1[%c1_44, %c0_45, %c0_46] : memref<3x160x32xf32, #tpu.memory_space<vmem>>, vector<1x160x32xf32>
    %43 = vector.shape_cast %42 : vector<1x160x32xf32> to vector<160x32xf32>
    %cst_47 = arith.constant dense<0.000000e+00> : vector<32x32xf32>
    %44 = tpu.matmul %41, %43, %cst_47 {dimension_numbers = #tpu.dot_dimension_numbers<[1], [0], [0], [1], [0, 0, 1, 1], [], []>, precision = #tpu.contract_precision<fp32>} : vector<32x160xf32>, vector<160x32xf32>, vector<32x32xf32> -> vector<32x32xf32>
    %c1_48 = arith.constant 1 : index
    %c0_49 = arith.constant 0 : index
    %c0_50 = arith.constant 0 : index
    %45 = vector.load %arg2[%c1_48, %c0_49, %c0_50] : memref<3x1x32xf32, #tpu.memory_space<vmem>>, vector<1x1x32xf32>
    %46 = vector.shape_cast %45 : vector<1x1x32xf32> to vector<1x32xf32>
    %47 = vector.broadcast %46 : vector<1x32xf32> to vector<32x32xf32>
    %48 = arith.addf %44, %47 : vector<32x32xf32>
    %cst_51 = arith.constant 0.000000e+00 : f32
    %49 = vector.broadcast %cst_51 : f32 to vector<32x32xf32>
    %50 = arith.maximumf %48, %49 : vector<32x32xf32>
    %c0_52 = arith.constant 0 : index
    %c0_53 = arith.constant 0 : index
    %c0_54 = arith.constant 0 : index
    %51 = vector.load %arg5[%c0_52, %c0_53, %c0_54] : memref<5x16x32xf32, #tpu.memory_space<vmem>>, vector<1x16x32xf32>
    %52 = vector.shape_cast %51 : vector<1x16x32xf32> to vector<16x32xf32>
    %cst_55 = arith.constant dense<0.000000e+00> : vector<16x32xf32>
    %53 = tpu.matmul %52, %50, %cst_55 {dimension_numbers = #tpu.dot_dimension_numbers<[1], [0], [0], [1], [0, 0, 1, 1], [], []>, precision = #tpu.contract_precision<fp32>} : vector<16x32xf32>, vector<32x32xf32>, vector<16x32xf32> -> vector<16x32xf32>
    %c1_56 = arith.constant 1 : index
    %c0_57 = arith.constant 0 : index
    %c0_58 = arith.constant 0 : index
    %54 = vector.load %arg5[%c1_56, %c0_57, %c0_58] : memref<5x16x32xf32, #tpu.memory_space<vmem>>, vector<1x16x32xf32>
    %55 = vector.shape_cast %54 : vector<1x16x32xf32> to vector<16x32xf32>
    %cst_59 = arith.constant dense<0.000000e+00> : vector<16x32xf32>
    %56 = tpu.matmul %55, %50, %cst_59 {dimension_numbers = #tpu.dot_dimension_numbers<[1], [0], [0], [1], [0, 0, 1, 1], [], []>, precision = #tpu.contract_precision<fp32>} : vector<16x32xf32>, vector<32x32xf32>, vector<16x32xf32> -> vector<16x32xf32>
    %c2_60 = arith.constant 2 : index
    %c0_61 = arith.constant 0 : index
    %c0_62 = arith.constant 0 : index
    %57 = vector.load %arg5[%c2_60, %c0_61, %c0_62] : memref<5x16x32xf32, #tpu.memory_space<vmem>>, vector<1x16x32xf32>
    %58 = vector.shape_cast %57 : vector<1x16x32xf32> to vector<16x32xf32>
    %cst_63 = arith.constant dense<0.000000e+00> : vector<16x32xf32>
    %59 = tpu.matmul %58, %50, %cst_63 {dimension_numbers = #tpu.dot_dimension_numbers<[1], [0], [0], [1], [0, 0, 1, 1], [], []>, precision = #tpu.contract_precision<fp32>} : vector<16x32xf32>, vector<32x32xf32>, vector<16x32xf32> -> vector<16x32xf32>
    %c3_64 = arith.constant 3 : index
    %c0_65 = arith.constant 0 : index
    %c0_66 = arith.constant 0 : index
    %60 = vector.load %arg5[%c3_64, %c0_65, %c0_66] : memref<5x16x32xf32, #tpu.memory_space<vmem>>, vector<1x16x32xf32>
    %61 = vector.shape_cast %60 : vector<1x16x32xf32> to vector<16x32xf32>
    %cst_67 = arith.constant dense<0.000000e+00> : vector<16x32xf32>
    %62 = tpu.matmul %61, %50, %cst_67 {dimension_numbers = #tpu.dot_dimension_numbers<[1], [0], [0], [1], [0, 0, 1, 1], [], []>, precision = #tpu.contract_precision<fp32>} : vector<16x32xf32>, vector<32x32xf32>, vector<16x32xf32> -> vector<16x32xf32>
    %c4_68 = arith.constant 4 : index
    %c0_69 = arith.constant 0 : index
    %c0_70 = arith.constant 0 : index
    %63 = vector.load %arg5[%c4_68, %c0_69, %c0_70] : memref<5x16x32xf32, #tpu.memory_space<vmem>>, vector<1x16x32xf32>
    %64 = vector.shape_cast %63 : vector<1x16x32xf32> to vector<16x32xf32>
    %cst_71 = arith.constant dense<0.000000e+00> : vector<16x32xf32>
    %65 = tpu.matmul %64, %50, %cst_71 {dimension_numbers = #tpu.dot_dimension_numbers<[1], [0], [0], [1], [0, 0, 1, 1], [], []>, precision = #tpu.contract_precision<fp32>} : vector<16x32xf32>, vector<32x32xf32>, vector<16x32xf32> -> vector<16x32xf32>
    %66 = tpu.concatenate %53, %56, %59, %62, %65 in 1 : vector<16x32xf32>, vector<16x32xf32>, vector<16x32xf32>, vector<16x32xf32>, vector<16x32xf32> -> vector<16x160xf32>
    %c2_72 = arith.constant 2 : index
    %c0_73 = arith.constant 0 : index
    %c0_74 = arith.constant 0 : index
    %67 = vector.load %arg1[%c2_72, %c0_73, %c0_74] : memref<3x160x32xf32, #tpu.memory_space<vmem>>, vector<1x160x32xf32>
    %68 = vector.shape_cast %67 : vector<1x160x32xf32> to vector<160x32xf32>
    %cst_75 = arith.constant dense<0.000000e+00> : vector<16x32xf32>
    %69 = tpu.matmul %66, %68, %cst_75 {dimension_numbers = #tpu.dot_dimension_numbers<[1], [0], [0], [1], [0, 0, 1, 1], [], []>, precision = #tpu.contract_precision<fp32>} : vector<16x160xf32>, vector<160x32xf32>, vector<16x32xf32> -> vector<16x32xf32>
    %c2_76 = arith.constant 2 : index
    %c0_77 = arith.constant 0 : index
    %c0_78 = arith.constant 0 : index
    %70 = vector.load %arg2[%c2_76, %c0_77, %c0_78] : memref<3x1x32xf32, #tpu.memory_space<vmem>>, vector<1x1x32xf32>
    %71 = vector.shape_cast %70 : vector<1x1x32xf32> to vector<1x32xf32>
    %72 = vector.broadcast %71 : vector<1x32xf32> to vector<16x32xf32>
    %73 = arith.addf %69, %72 : vector<16x32xf32>
    %c0_79 = arith.constant 0 : index
    %c0_80 = arith.constant 0 : index
    %74 = vector.load %arg6[%c0_79, %c0_80] : memref<16x32xf32, #tpu.memory_space<vmem>>, vector<16x32xf32>
    tpu.vector_store %arg6[%c0_79, %c0_80], %73 {strides = array<i32>} : memref<16x32xf32, #tpu.memory_space<vmem>>, vector<16x32xf32>,
    return
  }
}

</mosaic_0001>

<bundles_post_ra>
// kernel: encoder_forward.1
= control target key start
LH: loop header
LB: loop body
LE: loop exit
PB: predicated region body
PF: predicated region fallthrough
CT: control target
= control target key end

     0   :  { %s20374_s8 = smov 32   ;;  %s20376_s11 = smov 64   ;;  %vm4889_vm0 = vcmask 261120   ;;  %vm4898_vm1 = vcmask 523264   ;;  %vm4907_vm2 = vcmask 785408   ;;  %s24639_s0 = inlined_call_operand.vmem [shape: f32[128,32], index: 0, kind: input, shape index: {}]   ;;  %s24640_s3 = inlined_call_operand.vmem [shape: f32[5,64,128], index: 3, kind: input, shape index: {}]   ;;  %s24641_s1 = inlined_call_operand.vmem [shape: f32[3,160,32], index: 1, kind: input, shape index: {}]   ;;  %s24642_s4 = inlined_call_operand.vmem [shape: f32[5,32,64], index: 4, kind: input, shape index: {}]   ;;  %s24643_s2 = inlined_call_operand.vmem [shape: f32[3,1,32], index: 2, kind: input, shape index: {}]   ;;  %s24644_s5 = inlined_call_operand.vmem [shape: f32[5,16,32], index: 5, kind: input, shape index: {}]   ;;  %s24645_s6 = inlined_call_operand.vmem [shape: f32[16,32], index: 6, kind: output, shape index: {}]  }
   0x1   :  { %v23_v0 = vld [vmem:[%s24639_s0] sm:$0xff]  ;;  %v24_v1 = vld [vmem:[%s24639_s0 + $0x8] sm:$0xff]  ;;  %v25_v2 = vld [vmem:[%s24639_s0 + $0x10] sm:$0xff] }
   0x2   :  { %v48_v3 = vand.u32 4294901760, %v23_v0  ;;  %v51_v4 = vand.u32 4294901760, %v24_v1  ;;  %v26_v5 = vld [vmem:[%s24639_s0 + $0x18] sm:$0xff]  ;;  %v54_v6 = vand.u32 4294901760, %v25_v2  ;;  %v20428_v7 = vld [vmem:[%s24639_s0 + $0x20] sm:$0xff]  ;;  %v20433_v8 = vld [vmem:[%s24639_s0 + $0x28] sm:$0xff] }
   0x3   :  { %v57_v9 = vand.u32 4294901760, %v26_v5  ;;  %v60_v11 = vand.u32 4294901760, %v20428_v7  ;;  %v63_v12 = vand.u32 4294901760, %v20433_v8  ;;  %v20442_v13 = vld [vmem:[%s24639_s0 + $0x30] sm:$0xff]  ;;  %v20449_v15 = vld [vmem:[%s24639_s0 + $0x38] sm:$0xff]  ;;  %v39_v16 = vld [vmem:[%s24640_s3] sm:$0xff] }
   0x4   :  { %v20435_v10 = vpack.c.bf16 %v51_v4, %v48_v3  ;;  %v13983_v17 = vld [vmem:[%s24640_s3 + $0x40] sm:$0xff]  ;;  %v66_v18 = vand.u32 4294901760, %v20442_v13  ;;  %v20467_v20 = vand.u32 4294901760, %v39_v16  ;;  %v40_v21 = vld [vmem:[%s24640_s3 + $0x8] sm:$0xff]  ;;  %v69_v24 = vand.u32 4294901760, %v20449_v15  ;;  %v20504_v32 = vld [vmem:[%s24639_s0 + $0x50] sm:$0xff] }
   0x5   :  { %v20444_v14 = vpack.c.bf16 %v57_v9, %v54_v6  ;;  %v20465_v19 = vld [vmem:[%s24639_s0 + $0x40] sm:$0xff]  ;;  %v13984_v22 = vld [vmem:[%s24640_s3 + $0x48] sm:$0xff]  ;;  %v20481_v23 = vpack.c.bf16 %v63_v12, %v60_v11  ;;  %v20489_v26 = vsub.f32 %v23_v0, %v48_v3  ;;  %v20491_v27 = vand.u32 4294901760, %v13983_v17  ;;  %v20517_v36 = vld [vmem:[%s24639_s0 + $0x58] sm:$0xff] }
   0x6   :  { %17655 = vmatprep.subr.bf16.mxu0 %v20435_v10  ;;  %17847 = vmatprep.subr.bf16.mxu1 %v20435_v10  ;;  %v20487_v25 = vld [vmem:[%s24639_s0 + $0x48] sm:$0xff]  ;;  %v20494_v28 = vsub.f32 %v39_v16, %v20467_v20  ;;  %v20496_v29 = vsub.f32 %v24_v1, %v51_v4  ;;  %v20498_v30 = vand.u32 4294901760, %v40_v21  ;;  %v72_v31 = vand.u32 4294901760, %v20465_v19  ;;  %v20522_v37 = vld [vmem:[%s24639_s0 + $0x60] sm:$0xff]  ;;  %v20559_v53 = vld [vmem:[%s24639_s0 + $0x70] sm:$0xff] }
   0x7   :  { %24812 = vst [vmem:[#allocation2_spill] sm:$0xff] %v20444_v14  ;;  %17657 = vmatpush3.bf16.msra.mxu0 %v20435_v10  ;;  %17849 = vmatpush3.bf16.msra.mxu1 %v20435_v10  ;;  %24813 = vst [vmem:[#allocation3_spill] sm:$0xff] %v20481_v23  ;;  %v20507_v33 = vsub.f32 %v13983_v17, %v20491_v27  ;;  %v20509_v34 = vand.u32 4294901760, %v13984_v22  ;;  %v75_v35 = vand.u32 4294901760, %v20487_v25  ;;  %v20527_v38 = vld [vmem:[%s24639_s0 + $0x68] sm:$0xff]  ;;  %v24657_v40 = vand.u32 4294901760, %v20489_v26 }
   0x8   :  { %17659 = vmatprep.subr.bf16.mxu0 %v20444_v14  ;;  %17851 = vmatprep.subr.bf16.mxu1 %v20444_v14  ;;  %v24649_v39 = vand.u32 4294901760, %v20494_v28  ;;  %v20531_v41 = vsub.f32 %v25_v2, %v54_v6  ;;  %v20537_v42 = vpack.c.bf16 %v69_v24, %v66_v18  ;;  %v24654_v43 = vand.u32 4294901760, %v20496_v29  ;;  %v20571_v56 = vld [vmem:[%s24639_s0 + $0x78] sm:$0xff]  ;;  %v41_v4 = vld [vmem:[%s24640_s3 + $0x10] sm:$0xff] }
   0x9   :  { %v24648_v44 = vand.u32 4294901760, %v20507_v33  ;;  %v20542_v45 = vsub.f32 %v40_v21, %v20498_v30  ;;  %v78_v46 = vand.u32 4294901760, %v20504_v32  ;;  %v20549_v48 = vsub.f32 %v13984_v22, %v20509_v34 }
   0xa   :  { %24814 = vst [vmem:[#allocation4_spill] sm:$0xff] %v20537_v42  ;;  %v131_v47 = vsub.f32 %v20494_v28, %v24649_v39  ;;  %v20551_v49 = vsub.f32 %v26_v5, %v57_v9  ;;  %v81_v50 = vand.u32 4294901760, %v20517_v36  ;;  %v24663_v51 = vand.u32 4294901760, %v20522_v37 }
   0xb   :  { %17661 = vmatpush3.bf16.msra.mxu0 %v20444_v14  ;;  %17853 = vmatpush3.bf16.msra.mxu1 %v20444_v14  ;;  %24815 = vst [vmem:[#allocation5_spill] sm:$0xff] %v20549_v48  ;;  %v24660_v52 = vand.u32 4294901760, %v20527_v38  ;;  %v1082_v54 = vsub.f32 %v20507_v33, %v24648_v44  ;;  %v20566_v55 = vpack.c.bf16 %v75_v35, %v72_v31  ;;  %v24653_v59 = vand.u32 4294901760, %v20531_v41  ;;  %v13986_v44 = vld [vmem:[%s24640_s3 + $0x58] sm:$0xff] }
   0xc   :  { %17663 = vmatprep.subr.bf16.mxu0 %v20481_v23  ;;  %17855 = vmatprep.subr.bf16.mxu1 %v20481_v23  ;;  %v132_v57 = vand.u32 4294901760, %v131_v47  ;;  %v212_v58 = vsub.f32 %v20489_v26, %v24657_v40  ;;  %v219_v60 = vsub.f32 %v20496_v29, %v24654_v43  ;;  %v24647_v62 = vand.u32 4294901760, %v20542_v45 }
   0xd   :  { %24816 = vst [vmem:[#allocation6_spill] sm:$0xff] %v20566_v55  ;;  %v1083_v61 = vand.u32 4294901760, %v1082_v54  ;;  %v20586_v63 = vsub.f32 %v20428_v7, %v60_v11  ;;  %v24659_v0 = vand.u32 4294901760, %v20559_v53  ;;  %v24646_v1 = vand.u32 4294901760, %v20549_v48 }
   0xe   :  { %15376 = vmatprep.mubr.f32.mxu0 %v132_v57  ;;  %v24652_v2 = vand.u32 4294901760, %v20551_v49  ;;  %v20594_v3 = vsub.f32 %v20433_v8, %v63_v12  ;;  %v24658_v5 = vand.u32 4294901760, %v20571_v56  ;;  %v20604_v7 = vsub.f32 %v20442_v13, %v66_v18 }
   0xf   :  { %17665 = vmatpush3.bf16.msra.mxu0 %v20481_v23  ;;  %17857 = vmatpush3.bf16.msra.mxu1 %v20481_v23  ;;  %v24651_v6 = vand.u32 4294901760, %v20586_v63  ;;  %v20607_v9 = vsub.f32 %v20449_v15, %v69_v24  ;;  %v20615_v8 = vpack.c.bf16 %v81_v50, %v78_v46  ;;  %v213_v11 = vand.u32 4294901760, %v212_v58  ;;  %v13985_v58 = vld [vmem:[%s24640_s3 + $0x50] sm:$0xff] }
  0x10   :  { %17667 = vmatprep.subr.bf16.mxu0 %v20537_v42  ;;  %17859 = vmatprep.subr.bf16.mxu1 %v20537_v42  ;;  %v20620_v12 = vsub.f32 %v20531_v41, %v24653_v59  ;;  %v24650_v13 = vand.u32 4294901760, %v20594_v3  ;;  %v220_v15 = vand.u32 4294901760, %v219_v60  ;;  %v20628_v16 = vsub.f32 %v20542_v45, %v24647_v62 }
  0x11   :  { %15640 = vmatprep.mubr.f32.mxu1 %v1083_v61  ;;  %24817 = vst [vmem:[#allocation7_spill] sm:$0xff] %v20615_v8  ;;  %v20631_v17 = vsub.f32 %v20465_v19, %v72_v31  ;;  %v20633_v18 = vand.u32 4294901760, %v41_v4  ;;  %v20638_v21 = vsub.f32 %v20549_v48, %v24646_v1  ;;  %v233_v22 = vsub.f32 %v20551_v49, %v24652_v2 }
  0x12   :  { %v20644_v24 = vsub.f32 %v20487_v25, %v75_v35  ;;  %v20650_v19 = vpack.c.bf16 %v24660_v52, %v24663_v51  ;;  %v240_v31 = vsub.f32 %v20586_v63, %v24651_v6  ;;  %v24655_v47 = vand.u32 4294901760, %v20604_v7 }
  0x13   :  { %17669 = vmatpush3.bf16.msra.mxu0 %v20537_v42  ;;  %17861 = vmatpush3.bf16.msra.mxu1 %v20537_v42  ;;  %v24656_v54 = vand.u32 4294901760, %v20607_v9  ;;  %v20663_v25 = vpack.c.bf16 %v24658_v5, %v24659_v0  ;;  %v247_v35 = vsub.f32 %v20594_v3, %v24650_v13  ;;  %v20669_v57 = vsub.f32 %v41_v4, %v20633_v18  ;;  %v42_v4 = vld [vmem:[%s24640_s3 + $0x18] sm:$0xff]  ;;  %v13989_v42 = vld [vmem:[%s24640_s3 + $0x70] sm:$0xff] }
  0x14   :  { %17671 = vmatprep.subr.bf16.mxu0 %v20566_v55  ;;  %17863 = vmatprep.subr.bf16.mxu1 %v20566_v55  ;;  %24818 = vst [vmem:[#allocation8_spill] sm:$0xff] %v20650_v19  ;;  %v20676_v60 = vpack.c.bf16 %v220_v15, %v213_v11  ;;  %v227_v1 = vand.u32 4294901760, %v20620_v12  ;;  %v24661_v62 = vand.u32 4294901760, %v20631_v17  ;;  %v234_v13 = vand.u32 4294901760, %v233_v22  ;;  %v43_v12 = vld [vmem:[%s24640_s3 + $0x20] sm:$0xff] }
  0x15   :  { %24819 = vst [vmem:[#allocation9_spill] sm:$0xff] %v20663_v25  ;;  %24820 = vst [vmem:[#allocation10_spill] sm:$0xff] %v20669_v57  ;;  %v24662_v11 = vand.u32 4294901760, %v20644_v24  ;;  %v20692_v15 = vsub.f32 %v20504_v32, %v78_v46  ;;  %v241_v6 = vand.u32 4294901760, %v240_v31  ;;  %v254_v2 = vsub.f32 %v20604_v7, %v24655_v47  ;;  %v13987_v47 = vld [vmem:[%s24640_s3 + $0x60] sm:$0xff] }
  0x16   :  { %24821 = vst [vmem:[#allocation11_spill] sm:$0xff] %v20676_v60  ;;  %v261_v22 = vsub.f32 %v20607_v9, %v24656_v54  ;;  %v20703_v59 = vand.u32 4294901760, %v13985_v58  ;;  %v248_v32 = vand.u32 4294901760, %v247_v35  ;;  %v24664_v46 = vand.u32 4294901760, %v20669_v57 }
  0x17   :  { %17673 = vmatpush3.bf16.msra.mxu0 %v20566_v55  ;;  %17865 = vmatpush3.bf16.msra.mxu1 %v20566_v55  ;;  %v20708_v43 = vand.u32 4294901760, %v42_v4  ;;  %v20710_v31 = vand.u32 4294901760, %v13986_v44  ;;  %v20720_v54 = vsub.f32 %v20631_v17, %v24661_v62  ;;  %v20725_v35 = vsub.f32 %v20517_v36, %v81_v50 }
  0x18   :  { %17675 = vmatprep.subr.bf16.mxu0 %v20615_v8  ;;  %17867 = vmatprep.subr.bf16.mxu1 %v20615_v8  ;;  %v20728_v40 = vsub.f32 %v13985_v58, %v20703_v59  ;;  %v20730_v5 = vand.u32 4294901760, %v43_v12  ;;  %v20735_v0 = vsub.f32 %v20644_v24, %v24662_v11  ;;  %v255_v36 = vand.u32 4294901760, %v254_v2 }
  0x19   :  { %v20739_v62 = vsub.f32 %v42_v4, %v20708_v43  ;;  %v20742_v39 = vsub.f32 %v13986_v44, %v20710_v31  ;;  %v20748_v61 = vand.u32 4294901760, %v13987_v47  ;;  %v262_v11 = vand.u32 4294901760, %v261_v22 }
  0x1a   :  { %24822 = vst [vmem:[#allocation12_spill] sm:$0xff] %v20728_v40  ;;  %v24669_v50 = vand.u32 4294901760, %v20728_v40  ;;  %v20746_v58 = vsub.f32 %v43_v12, %v20730_v5  ;;  %v151_v4 = vsub.f32 %v20669_v57, %v24664_v46  ;;  %v44_v12 = vld [vmem:[%s24640_s3 + $0x28] sm:$0xff]  ;;  %v20762_v51 = vpack.c.bf16 %v234_v13, %v227_v1 }
  0x1b   :  { %17677 = vmatpush3.bf16.msra.mxu0 %v20615_v8  ;;  %17869 = vmatpush3.bf16.msra.mxu1 %v20615_v8  ;;  %24823 = vst [vmem:[#allocation13_spill] sm:$0xff] %v20739_v62  ;;  %24824 = vst [vmem:[#allocation14_spill] sm:$0xff] %v20742_v39  ;;  %v20769_v52 = vsub.f32 %v13987_v47, %v20748_v61  ;;  %v20771_v2 = vpack.c.bf16 %v248_v32, %v241_v6  ;;  %v13988_v13 = vld [vmem:[%s24640_s3 + $0x68] sm:$0xff]  ;;  %v20786_v32 = vand.u32 4294901760, %v44_v12 }
  0x1c   :  { %17679 = vmatprep.subr.bf16.mxu0 %v20650_v19  ;;  %17871 = vmatprep.subr.bf16.mxu1 %v20650_v19  ;;  %24825 = vst [vmem:[#allocation15_spill] sm:$0xff] %v20746_v58  ;;  %24826 = vst [vmem:[#allocation16_spill] sm:$0xff] %v20762_v51  ;;  %v1102_v46 = vsub.f32 %v20728_v40, %v24669_v50  ;;  %v24830_v50 = vand.u32 4294901760, %v20742_v39  ;;  %v20793_v44 = vpack.c.bf16 %v262_v11, %v255_v36 }
  0x1d   :  { %24827 = vst [vmem:[#allocation17_spill] sm:$0xff] %v20769_v52  ;;  %24828 = vst [vmem:[#allocation18_spill] sm:$0xff] %v20771_v2  ;;  %v152_v1 = vand.u32 4294901760, %v151_v4  ;;  %v24831_v22 = vand.u32 4294901760, %v20692_v15  ;;  %v24833_v11 = vand.u32 4294901760, %v20725_v35  ;;  %v24835_v23 = vand.u32 4294901760, %v20746_v58 }
  0x1e   :  { %v1112_v47 = vsub.f32 %v20742_v39, %v24830_v50  ;;  %v24832_v50 = vand.u32 4294901760, %v20522_v37  ;;  %v1103_v4 = vand.u32 4294901760, %v1102_v46  ;;  %v13990_v46 = vld [vmem:[%s24640_s3 + $0x78] sm:$0xff]  ;;  %v24838_v57 = vand.u32 4294901760, %v20638_v21 }
  0x1f   :  { %17681 = vmatpush3.bf16.msra.mxu0 %v20650_v19  ;;  %17873 = vmatpush3.bf16.msra.mxu1 %v20650_v19  ;;  %v24829_v19 = vand.u32 4294901760, %v20739_v62  ;;  %v20798_v55 = vsub.f32 %v20692_v15, %v24831_v22  ;;  %v20813_v36 = vsub.f32 %v20725_v35, %v24833_v11  ;;  %v20816_v22 = vsub.f32 %v44_v12, %v20786_v32 }
  0x20   :  { %17683 = vmatprep.subr.bf16.mxu0 %v20663_v25  ;;  %17875 = vmatprep.subr.bf16.mxu1 %v20663_v25  ;;  %v20803_v6 = vsub.f32 %v20522_v37, %v24832_v50  ;;  %v46_v37 = vld [vmem:[%s24640_s3 + $0x38] sm:$0xff]  ;;  %v171_v39 = vsub.f32 %v20746_v58, %v24835_v23  ;;  %v24837_v12 = vand.u32 4294901760, %v20628_v16  ;;  %v20842_v58 = vand.u32 4294901760, %v13989_v42 }
  0x21   :  { %v161_v8 = vsub.f32 %v20739_v62, %v24829_v19  ;;  %v45_v19 = vld [vmem:[%s24640_s3 + $0x30] sm:$0xff]  ;;  %24834 = vst [vmem:[#allocation19_spill] sm:$0xff] %v20816_v22  ;;  %v24836_v62 = vand.u32 4294901760, %v20769_v52  ;;  %v24696_v14 = vand.u32 4294901760, %v20816_v22  ;;  %v24839_v16 = vand.u32 4294901760, %v20527_v38 }
  0x22   :  { %v20829_v40 = vand.u32 4294901760, %v45_v19 }
  0x23   :  { %17685 = vmatpush3.bf16.msra.mxu0 %v20663_v25  ;;  %17877 = vmatpush3.bf16.msra.mxu1 %v20663_v25  ;;  %v20818_v25 = vand.u32 4294901760, %v13988_v13  ;;  %v162_v50 = vand.u32 4294901760, %v161_v8  ;;  %v1122_v11 = vsub.f32 %v20769_v52, %v24836_v62  ;;  %v1113_v8 = vand.u32 4294901760, %v1112_v47 }
  0x24   :  { %17687 = vmatprep.subr.bf16.mxu0 %v20676_v60  ;;  %17879 = vmatprep.subr.bf16.mxu1 %v20676_v60  ;;  %v20853_v21 = vsub.f32 %v45_v19, %v20829_v40  ;;  %v20864_v62 = vsub.f32 %v13989_v42, %v20842_v58  ;;  %v172_v19 = vand.u32 4294901760, %v171_v39 }
  0x25   :  { %v20840_v23 = vsub.f32 %v13988_v13, %v20818_v25  ;;  %v181_v13 = vsub.f32 %v20816_v22, %v24696_v14 }
  0x26   :  { %15377 = vmatmul.mubr.f32.vlgmr.msra.gmra.mrb[0].mxu0 %v24837_v12  ;;  %15641 = vmatmul.mubr.f32.vlgmr.msra.gmra.mrb[0].mxu1 %v24838_v57  ;;  %v20850_v12 = vsub.f32 %v20527_v38, %v24839_v16  ;;  %v20855_v57 = vand.u32 4294901760, %v46_v37  ;;  %v20866_v38 = vand.u32 4294901760, %v13990_v46  ;;  %v1123_v16 = vand.u32 4294901760, %v1122_v11 }
  0x27   :  { %17689 = vmatpush3.bf16.msra.mxu0 %v20676_v60  ;;  %17881 = vmatpush3.bf16.msra.mxu1 %v20676_v60  ;;  %v24700_v47 = vand.u32 4294901760, %v20840_v23  ;;  %v24699_v60 = vand.u32 4294901760, %v20853_v21  ;;  %v182_v48 = vand.u32 4294901760, %v181_v13  ;;  %v24703_v42 = vand.u32 4294901760, %v20864_v62 }
  0x28   :  { %17691 = vmatprep.subr.bf16.mxu0 %v20762_v51  ;;  %17883 = vmatprep.subr.bf16.mxu1 %v20762_v51  ;;  %v20870_v52 = vsub.f32 %v46_v37, %v20855_v57  ;;  %v20877_v22 = vsub.f32 %v13990_v46, %v20866_v38  ;;  %v302_v39 = vand.u32 4294901760, %v20850_v12  ;;  %v24842_v46 = vand.u32 4294901760, %v20571_v56 }
  0x29   :  { %15379 = vmatprep.mubr.f32.mxu0 %v152_v1  ;;  %15643 = vmatprep.mubr.f32.mxu1 %v1103_v4  ;;  %v1132_v14 = vsub.f32 %v20840_v23, %v24700_v47  ;;  %v191_v1 = vsub.f32 %v20853_v21, %v24699_v60  ;;  %v24841_v4 = vand.u32 4294901760, %v20559_v53  ;;  %v1142_v13 = vsub.f32 %v20864_v62, %v24703_v42 }
  0x2a   :  { %15380 = vmatmul.mubr.f32.gmra.mrb[2].mxu0 %v162_v50  ;;  %15644 = vmatmul.mubr.f32.gmra.mrb[2].mxu1 %v1113_v8  ;;  %24840 = vst [vmem:[#allocation20_spill] sm:$0xff] %v20877_v22  ;;  %v24705_v50 = vand.u32 4294901760, %v20870_v52  ;;  %v20896_v8 = vsub.f32 %v20571_v56, %v24842_v46  ;;  %v24704_v60 = vand.u32 4294901760, %v20877_v22  ;;  %v283_v46 = vand.u32 4294901760, %v20798_v55 }
  0x2b   :  { %17693 = vmatpush3.bf16.msra.mxu0 %v20762_v51  ;;  %17885 = vmatpush3.bf16.msra.mxu1 %v20762_v51  ;;  %v20888_v37 = vsub.f32 %v20559_v53, %v24841_v4  ;;  %v1133_v11 = vand.u32 4294901760, %v1132_v14  ;;  %v24843_v53 = vand.u32 4294901760, %v20720_v54  ;;  %v24844_v4 = vand.u32 4294901760, %v20735_v0 }
  0x2c   :  { %17695 = vmatprep.subr.bf16.mxu0 %v20771_v2  ;;  %17887 = vmatprep.subr.bf16.mxu1 %v20771_v2  ;;  %v192_v14 = vand.u32 4294901760, %v191_v1  ;;  %v201_v56 = vsub.f32 %v20870_v52, %v24705_v50  ;;  %v290_v51 = vand.u32 4294901760, %v20813_v36  ;;  %v1143_v42 = vand.u32 4294901760, %v1142_v13 }
  0x2d   :  { %v20906_v47 = vpack.c.bf16 %v24844_v4, %v24843_v53  ;;  %15382 = vmatprep.mubr.f32.mxu0 %v172_v19  ;;  %15646 = vmatprep.mubr.f32.mxu1 %v1123_v16  ;;  %v1152_v0 = vsub.f32 %v20877_v22, %v24704_v60  ;;  %v24845_v54 = vand.u32 4294901760, %v20803_v6  ;;  %v303_v16 = vsub.f32 %v20850_v12, %v302_v39 }
  0x2e   :  { %15383 = vmatmul.mubr.f32.gmra.mrb[4].mxu0 %v182_v48  ;;  %15647 = vmatmul.mubr.f32.gmra.mrb[4].mxu1 %v1133_v11  ;;  %v309_v55 = vand.u32 4294901760, %v20888_v37  ;;  %v202_v36 = vand.u32 4294901760, %v201_v56  ;;  %v316_v48 = vand.u32 4294901760, %v20896_v8  ;;  %v24846_v11 = vand.u32 4294901760, %v20489_v26 }
  0x2f   :  { %17697 = vmatpush3.bf16.msra.mxu0 %v20771_v2  ;;  %17889 = vmatpush3.bf16.msra.mxu1 %v20771_v2  ;;  %v296_v19 = vsub.f32 %v20803_v6, %v24845_v54  ;;  %v1153_v1 = vand.u32 4294901760, %v1152_v0  ;;  %v24847_v13 = vand.u32 4294901760, %v20496_v29  ;;  %v24849_v4 = vand.u32 4294901760, %v20531_v41 }
  0x30   :  { %17699 = vmatprep.subr.bf16.mxu0 %v20793_v44  ;;  %17891 = vmatprep.subr.bf16.mxu1 %v20793_v44  ;;  %v24850_v54 = vand.u32 4294901760, %v20551_v49  ;;  %v24852_v56 = vand.u32 4294901760, %v20586_v63  ;;  %v24853_v50 = vand.u32 4294901760, %v20594_v3  ;;  %v24855_v0 = vand.u32 4294901760, %v20604_v7 }
  0x31   :  { %v20930_v53 = vpack.c.bf16 %v24847_v13, %v24846_v11  ;;  %15385 = vmatprep.mubr.f32.mxu0 %v192_v14  ;;  %15649 = vmatprep.mubr.f32.mxu1 %v1143_v42  ;;  %v24856_v22 = vand.u32 4294901760, %v20607_v9  ;;  %v24858_v13 = vand.u32 4294901760, %v20631_v17  ;;  %v24861_v42 = vand.u32 4294901760, %v20692_v15 }
  0x32   :  { %v20936_v60 = vpack.c.bf16 %v24850_v54, %v24849_v4  ;;  %v20942_v2 = vpack.c.bf16 %v24853_v50, %v24852_v56  ;;  %15386 = vmatmul.mubr.f32.gmra.mrb[6].mxu0 %v202_v36  ;;  %15650 = vmatmul.mubr.f32.gmra.mrb[6].mxu1 %v1153_v1  ;;  %v24862_v14 = vand.u32 4294901760, %v20725_v35  ;;  %v24864_v54 = vand.u32 4294901760, %v20803_v6 }
  0x33   :  { %24848 = vst [vmem:[#allocation21_spill] sm:$0xff] %v20930_v53  ;;  %v20948_v11 = vpack.c.bf16 %v24856_v22, %v24855_v0  ;;  %v24859_v53 = vand.u32 4294901760, %v20644_v24  ;;  %v20966_v22 = vpack.c.bf16 %v316_v48, %v309_v55  ;;  %17701 = vmatpush3.bf16.msra.mxu0 %v20793_v44  ;;  %17893 = vmatpush3.bf16.msra.mxu1 %v20793_v44  ;;  %v297_v36 = vand.u32 4294901760, %v296_v19 }
  0x34   :  { %24851 = vst [vmem:[#allocation22_spill] sm:$0xff] %v20936_v60  ;;  %24854 = vst [vmem:[#allocation23_spill] sm:$0xff] %v20942_v2  ;;  %v20960_v50 = vpack.c.bf16 %v24862_v14, %v24861_v42  ;;  %v20964_v56 = vpack.c.bf16 %v302_v39, %v24864_v54  ;;  %17703 = vmatprep.subr.bf16.mxu0 %v20906_v47  ;;  %17895 = vmatprep.subr.bf16.mxu1 %v20906_v47  ;;  %v304_v1 = vand.u32 4294901760, %v303_v16  ;;  %v24878_v42 = vld [vmem:[#allocation20_spill] sm:$0xff]  ;;  %v24879_v14 = vld [vmem:[#allocation6_spill] sm:$0xff] }
  0x35   :  { %24857 = vst [vmem:[#allocation24_spill] sm:$0xff] %v20948_v11  ;;  %v20954_v4 = vpack.c.bf16 %v24859_v53, %v24858_v13  ;;  %24866 = vst [vmem:[#allocation28_spill] sm:$0xff] %v20966_v22  ;;  %v20970_v53 = vpack.c.bf16 %v290_v51, %v283_v46  ;;  %v310_v0 = vsub.f32 %v20888_v37, %v309_v55  ;;  %15420 = vmatprep.mubr.f32.mxu0 %v20467_v20 }
  0x36   :  { %24863 = vst [vmem:[#allocation26_spill] sm:$0xff] %v20960_v50  ;;  %24865 = vst [vmem:[#allocation27_spill] sm:$0xff] %v20964_v56  ;;  %v317_v13 = vsub.f32 %v20896_v8, %v316_v48  ;;  %15684 = vmatprep.mubr.f32.mxu1 %v20491_v27  ;;  %v20982_v51 = vpack.c.bf16 %v304_v1, %v297_v36  ;;  %v20996_v16 = vpack.c.bf16 %v20496_v29, %v20489_v26  ;;  %v24877_v48 = vld [vmem:[#allocation4_spill] sm:$0xff]  ;;  %v24882_v1 = vld [vmem:[#allocation7_spill] sm:$0xff] }
  0x37   :  { %24860 = vst [vmem:[#allocation25_spill] sm:$0xff] %v20954_v4  ;;  %17705 = vmatpush3.bf16.msra.mxu0 %v20906_v47  ;;  %17897 = vmatpush3.bf16.msra.mxu1 %v20906_v47  ;;  %v311_v39 = vand.u32 4294901760, %v310_v0  ;;  %v21004_v55 = vpack.c.bf16 %v20551_v49, %v20531_v41  ;;  %v21014_v26 = vpack.c.bf16 %v20594_v3, %v20586_v63  ;;  %v24880_v54 = vand.u32 4294901760, %v20494_v28  ;;  %v24883_v0 = vld [vmem:[#allocation8_spill] sm:$0xff] }
  0x38   :  { %17707 = vmatprep.subr.bf16.mxu0 %v20970_v53  ;;  %17899 = vmatprep.subr.bf16.mxu1 %v20970_v53  ;;  %v318_v46 = vand.u32 4294901760, %v317_v13  ;;  %v21026_v29 = vpack.c.bf16 %v20607_v9, %v20604_v7  ;;  %v21038_v41 = vpack.c.bf16 %v20644_v24, %v20631_v17  ;;  %v21050_v49 = vpack.c.bf16 %v20725_v35, %v20692_v15  ;;  %v24867_v7 = vld [vmem:[#allocation5_spill] sm:$0xff]  ;;  %v24868_v9 = vld [vmem:[#allocation2_spill] sm:$0xff]  ;;  %v24870_v24 = vld [vmem:[#allocation12_spill] sm:$0xff] }
  0x39   :  { %v21060_v63 = vpack.c.bf16 %v20850_v12, %v20803_v6  ;;  %v21068_v3 = vpack.c.bf16 %v20896_v8, %v20888_v37  ;;  %v24869_v17 = vld [vmem:[#allocation10_spill] sm:$0xff]  ;;  %v24871_v15 = vld [vmem:[#allocation13_spill] sm:$0xff]  ;;  %v24873_v6 = vld [vmem:[#allocation3_spill] sm:$0xff]  ;;  %v24881_v36 = vand.u32 4294901760, %v20507_v33  ;;  %v24886_v13 = vand.u32 4294901760, %v20542_v45 }
  0x3a   :  { %v20988_v19 = vpack.c.bf16 %v318_v46, %v311_v39  ;;  %v24872_v35 = vld [vmem:[#allocation14_spill] sm:$0xff]  ;;  %v24874_v12 = vld [vmem:[#allocation15_spill] sm:$0xff]  ;;  %v24875_v37 = vld [vmem:[#allocation17_spill] sm:$0xff]  ;;  %v24887_v39 = vand.u32 4294901760, %v24867_v7  ;;  %v24888_v46 = vand.u32 4294901760, %v24869_v17 }
  0x3b   :  { %17709 = vmatpush3.bf16.msra.mxu0 %v20970_v53  ;;  %17901 = vmatpush3.bf16.msra.mxu1 %v20970_v53  ;;  %v24876_v8 = vld [vmem:[#allocation19_spill] sm:$0xff] }
  0x3c   :  { %17711 = vmatprep.subr.bf16.mxu0 %v20982_v51  ;;  %17903 = vmatprep.subr.bf16.mxu1 %v20982_v51 }
  0x3f   :  { %17713 = vmatpush3.bf16.msra.mxu0 %v20982_v51  ;;  %17905 = vmatpush3.bf16.msra.mxu1 %v20982_v51 }
  0x40   :  { %17715 = vmatprep.subr.bf16.mxu0 %v20988_v19  ;;  %17907 = vmatprep.subr.bf16.mxu1 %v20988_v19 }
  0x43   :  { %17717 = vmatpush3.bf16.msra.mxu0 %v20988_v19  ;;  %17909 = vmatpush3.bf16.msra.mxu1 %v20988_v19 }
  0x44   :  { %17719 = vmatprep.subr.bf16.mxu0 %v20996_v16  ;;  %17911 = vmatprep.subr.bf16.mxu1 %v20996_v16 }
  0x46   :  { %15421 = vmatmul.mubr.f32.vlgmr.msra.gmra.mrb[0].mxu0 %v20498_v30  ;;  %15685 = vmatmul.mubr.f32.vlgmr.msra.gmra.mrb[0].mxu1 %v20509_v34 }
  0x47   :  { %17721 = vmatpush3.bf16.msra.mxu0 %v20996_v16  ;;  %17913 = vmatpush3.bf16.msra.mxu1 %v20996_v16 }
  0x48   :  { %17723 = vmatprep.subr.bf16.mxu0 %v21004_v55  ;;  %17915 = vmatprep.subr.bf16.mxu1 %v21004_v55 }
  0x49   :  { %15423 = vmatprep.mubr.f32.mxu0 %v20633_v18  ;;  %15687 = vmatprep.mubr.f32.mxu1 %v20703_v59 }
  0x4a   :  { %15424 = vmatmul.mubr.f32.gmra.mrb[2].mxu0 %v20708_v43  ;;  %15688 = vmatmul.mubr.f32.gmra.mrb[2].mxu1 %v20710_v31 }
  0x4b   :  { %17725 = vmatpush3.bf16.msra.mxu0 %v21004_v55  ;;  %17917 = vmatpush3.bf16.msra.mxu1 %v21004_v55 }
  0x4c   :  { %17727 = vmatprep.subr.bf16.mxu0 %v21014_v26  ;;  %17919 = vmatprep.subr.bf16.mxu1 %v21014_v26 }
  0x4d   :  { %15426 = vmatprep.mubr.f32.mxu0 %v20730_v5  ;;  %15690 = vmatprep.mubr.f32.mxu1 %v20748_v61 }
  0x4e   :  { %15427 = vmatmul.mubr.f32.gmra.mrb[4].mxu0 %v20786_v32  ;;  %15691 = vmatmul.mubr.f32.gmra.mrb[4].mxu1 %v20818_v25 }
  0x4f   :  { %17729 = vmatpush3.bf16.msra.mxu0 %v21014_v26  ;;  %17921 = vmatpush3.bf16.msra.mxu1 %v21014_v26 }
  0x50   :  { %17731 = vmatprep.subr.bf16.mxu0 %v21026_v29  ;;  %17923 = vmatprep.subr.bf16.mxu1 %v21026_v29 }
  0x51   :  { %15429 = vmatprep.mubr.f32.mxu0 %v20829_v40  ;;  %15693 = vmatprep.mubr.f32.mxu1 %v20842_v58 }
  0x52   :  { %15430 = vmatmul.mubr.f32.gmra.mrb[6].mxu0 %v20855_v57  ;;  %15694 = vmatmul.mubr.f32.gmra.mrb[6].mxu1 %v20866_v38 }
  0x53   :  { %17733 = vmatpush3.bf16.msra.mxu0 %v21026_v29  ;;  %17925 = vmatpush3.bf16.msra.mxu1 %v21026_v29 }
  0x54   :  { %17735 = vmatprep.subr.bf16.mxu0 %v21038_v41  ;;  %17927 = vmatprep.subr.bf16.mxu1 %v21038_v41 }
  0x55   :  { %15464 = vmatprep.mubr.f32.mxu0 %v20494_v28  ;;  %15728 = vmatprep.mubr.f32.mxu1 %v20507_v33  ;;  %v24884_v28 = vld [vmem:[#allocation9_spill] sm:$0xff] }
  0x56   :  { %v24885_v33 = vld [vmem:[#allocation21_spill] sm:$0xff] }
  0x57   :  { %17737 = vmatpush3.bf16.msra.mxu0 %v21038_v41  ;;  %17929 = vmatpush3.bf16.msra.mxu1 %v21038_v41 }
  0x58   :  { %17739 = vmatprep.subr.bf16.mxu0 %v21050_v49  ;;  %17931 = vmatprep.subr.bf16.mxu1 %v21050_v49 }
  0x5b   :  { %17741 = vmatpush3.bf16.msra.mxu0 %v21050_v49  ;;  %17933 = vmatpush3.bf16.msra.mxu1 %v21050_v49 }
  0x5c   :  { %17743 = vmatprep.subr.bf16.mxu0 %v21060_v63  ;;  %17935 = vmatprep.subr.bf16.mxu1 %v21060_v63 }
  0x5f   :  { %17745 = vmatpush3.bf16.msra.mxu0 %v21060_v63  ;;  %17937 = vmatpush3.bf16.msra.mxu1 %v21060_v63 }
  0x60   :  { %17747 = vmatprep.subr.bf16.mxu0 %v21068_v3  ;;  %17939 = vmatprep.subr.bf16.mxu1 %v21068_v3 }
  0x63   :  { %17749 = vmatpush3.bf16.msra.mxu0 %v21068_v3  ;;  %17941 = vmatpush3.bf16.msra.mxu1 %v21068_v3 }
  0x64   :  { %17751 = vmatprep.subr.bf16.mxu0 %v20435_v10  ;;  %17943 = vmatprep.subr.bf16.mxu1 %v20435_v10 }
  0x66   :  { %15465 = vmatmul.mubr.f32.vlgmr.msra.gmra.mrb[0].mxu0 %v20542_v45  ;;  %15729 = vmatmul.mubr.f32.vlgmr.msra.gmra.mrb[0].mxu1 %v24867_v7  ;;  %v24890_v45 = vand.u32 4294901760, %v24871_v15  ;;  %v24891_v7 = vand.u32 4294901760, %v24872_v35 }
  0x67   :  { %17753 = vmatpush3.bf16.msra.mxu0 %v20435_v10  ;;  %17945 = vmatpush3.bf16.msra.mxu1 %v20435_v10 }
  0x68   :  { %17755 = vmatprep.subr.bf16.mxu0 %v24868_v9  ;;  %17947 = vmatprep.subr.bf16.mxu1 %v24868_v9 }
  0x69   :  { %15467 = vmatprep.mubr.f32.mxu0 %v24869_v17  ;;  %15731 = vmatprep.mubr.f32.mxu1 %v24870_v24  ;;  %v24892_v17 = vand.u32 4294901760, %v24874_v12 }
  0x6a   :  { %15468 = vmatmul.mubr.f32.gmra.mrb[2].mxu0 %v24871_v15  ;;  %15732 = vmatmul.mubr.f32.gmra.mrb[2].mxu1 %v24872_v35  ;;  %v24894_v15 = vand.u32 4294901760, %v24876_v8  ;;  %v24895_v35 = vand.u32 4294901760, %v20840_v23 }
  0x6b   :  { %17757 = vmatpush3.bf16.msra.mxu0 %v24868_v9  ;;  %17949 = vmatpush3.bf16.msra.mxu1 %v24868_v9 }
  0x6c   :  { %17759 = vmatprep.subr.bf16.mxu0 %v24873_v6  ;;  %17951 = vmatprep.subr.bf16.mxu1 %v24873_v6 }
  0x6d   :  { %15470 = vmatprep.mubr.f32.mxu0 %v24874_v12  ;;  %15734 = vmatprep.mubr.f32.mxu1 %v24875_v37  ;;  %v24896_v12 = vand.u32 4294901760, %v20853_v21 }
  0x6e   :  { %15471 = vmatmul.mubr.f32.gmra.mrb[4].mxu0 %v24876_v8  ;;  %15735 = vmatmul.mubr.f32.gmra.mrb[4].mxu1 %v20840_v23  ;;  %v24898_v8 = vand.u32 4294901760, %v20870_v52  ;;  %v24899_v23 = vand.u32 4294901760, %v24878_v42 }
  0x6f   :  { %17761 = vmatpush3.bf16.msra.mxu0 %v24873_v6  ;;  %17953 = vmatpush3.bf16.msra.mxu1 %v24873_v6 }
  0x70   :  { %17763 = vmatprep.subr.bf16.mxu0 %v24877_v48  ;;  %17955 = vmatprep.subr.bf16.mxu1 %v24877_v48 }
  0x71   :  { %15473 = vmatprep.mubr.f32.mxu0 %v20853_v21  ;;  %15737 = vmatprep.mubr.f32.mxu1 %v20864_v62 }
  0x72   :  { %15474 = vmatmul.mubr.f32.gmra.mrb[6].mxu0 %v20870_v52  ;;  %15738 = vmatmul.mubr.f32.gmra.mrb[6].mxu1 %v24878_v42 }
  0x73   :  { %17765 = vmatpush3.bf16.msra.mxu0 %v24877_v48  ;;  %17957 = vmatpush3.bf16.msra.mxu1 %v24877_v48 }
  0x74   :  { %17767 = vmatprep.subr.bf16.mxu0 %v24879_v14  ;;  %17959 = vmatprep.subr.bf16.mxu1 %v24879_v14 }
  0x75   :  { %15508 = vmatprep.mubr.f32.mxu0 %v24880_v54  ;;  %15772 = vmatprep.mubr.f32.mxu1 %v24881_v36  ;;  %v24889_v54 = vand.u32 4294901760, %v24870_v24  ;;  %v24893_v24 = vand.u32 4294901760, %v24875_v37  ;;  %v24897_v37 = vand.u32 4294901760, %v20864_v62 }
  0x77   :  { %17769 = vmatpush3.bf16.msra.mxu0 %v24879_v14  ;;  %17961 = vmatpush3.bf16.msra.mxu1 %v24879_v14 }
  0x78   :  { %17771 = vmatprep.subr.bf16.mxu0 %v24882_v1  ;;  %17963 = vmatprep.subr.bf16.mxu1 %v24882_v1 }
  0x7b   :  { %17773 = vmatpush3.bf16.msra.mxu0 %v24882_v1  ;;  %17965 = vmatpush3.bf16.msra.mxu1 %v24882_v1 }
  0x7c   :  { %17775 = vmatprep.subr.bf16.mxu0 %v24883_v0  ;;  %17967 = vmatprep.subr.bf16.mxu1 %v24883_v0 }
  0x7f   :  { %17777 = vmatpush3.bf16.msra.mxu0 %v24883_v0  ;;  %17969 = vmatpush3.bf16.msra.mxu1 %v24883_v0 }
  0x80   :  { %17779 = vmatprep.subr.bf16.mxu0 %v24884_v28  ;;  %17971 = vmatprep.subr.bf16.mxu1 %v24884_v28 }
  0x83   :  { %17781 = vmatpush3.bf16.msra.mxu0 %v24884_v28  ;;  %17973 = vmatpush3.bf16.msra.mxu1 %v24884_v28 }
  0x84   :  { %17783 = vmatprep.subr.bf16.mxu0 %v24885_v33  ;;  %17975 = vmatprep.subr.bf16.mxu1 %v24885_v33 }
  0x86   :  { %15509 = vmatmul.mubr.f32.vlgmr.msra.gmra.mrb[0].mxu0 %v24886_v13  ;;  %15773 = vmatmul.mubr.f32.vlgmr.msra.gmra.mrb[0].mxu1 %v24887_v39 }
  0x87   :  { %17785 = vmatpush3.bf16.msra.mxu0 %v24885_v33  ;;  %17977 = vmatpush3.bf16.msra.mxu1 %v24885_v33 }
  0x88   :  { %17787 = vmatprep.subr.bf16.mxu0 %v20936_v60  ;;  %17979 = vmatprep.subr.bf16.mxu1 %v20936_v60 }
  0x89   :  { %15511 = vmatprep.mubr.f32.mxu0 %v24888_v46  ;;  %15775 = vmatprep.mubr.f32.mxu1 %v24889_v54 }
  0x8a   :  { %15512 = vmatmul.mubr.f32.gmra.mrb[2].mxu0 %v24890_v45  ;;  %15776 = vmatmul.mubr.f32.gmra.mrb[2].mxu1 %v24891_v7  ;;  %v13995_v7 = vld [vmem:[%s24640_s3 + $0xa0] sm:$0xff] }
  0x8b   :  { %17789 = vmatpush3.bf16.msra.mxu0 %v20936_v60  ;;  %17981 = vmatpush3.bf16.msra.mxu1 %v20936_v60 }
  0x8c   :  { %17791 = vmatprep.subr.bf16.mxu0 %v20942_v2  ;;  %17983 = vmatprep.subr.bf16.mxu1 %v20942_v2 }
  0x8d   :  { %15514 = vmatprep.mubr.f32.mxu0 %v24892_v17  ;;  %15778 = vmatprep.mubr.f32.mxu1 %v24893_v24  ;;  %v14003_v17 = vld [vmem:[%s24640_s3 + $0xe0] sm:$0xff] }
  0x8e   :  { %15515 = vmatmul.mubr.f32.gmra.mrb[4].mxu0 %v24894_v15  ;;  %15779 = vmatmul.mubr.f32.gmra.mrb[4].mxu1 %v24895_v35  ;;  %v13996_v35 = vld [vmem:[%s24640_s3 + $0xa8] sm:$0xff] }
  0x8f   :  { %17793 = vmatpush3.bf16.msra.mxu0 %v20942_v2  ;;  %17985 = vmatpush3.bf16.msra.mxu1 %v20942_v2 }
  0x90   :  { %17795 = vmatprep.subr.bf16.mxu0 %v20948_v11  ;;  %17987 = vmatprep.subr.bf16.mxu1 %v20948_v11 }
  0x91   :  { %15517 = vmatprep.mubr.f32.mxu0 %v24896_v12  ;;  %15781 = vmatprep.mubr.f32.mxu1 %v24897_v37  ;;  %v14004_v12 = vld [vmem:[%s24640_s3 + $0xe8] sm:$0xff] }
  0x92   :  { %15518 = vmatmul.mubr.f32.gmra.mrb[6].mxu0 %v24898_v8  ;;  %15782 = vmatmul.mubr.f32.gmra.mrb[6].mxu1 %v24899_v23 }
  0x93   :  { %17797 = vmatpush3.bf16.msra.mxu0 %v20948_v11  ;;  %17989 = vmatpush3.bf16.msra.mxu1 %v20948_v11 }
  0x94   :  { %17799 = vmatprep.subr.bf16.mxu0 %v20954_v4  ;;  %17991 = vmatprep.subr.bf16.mxu1 %v20954_v4 }
  0x95   :  { %15552 = vmatprep.mubr.f32.mxu0 %v20467_v20  ;;  %15816 = vmatprep.mubr.f32.mxu1 %v20491_v27 }
  0x97   :  { %17801 = vmatpush3.bf16.msra.mxu0 %v20954_v4  ;;  %17993 = vmatpush3.bf16.msra.mxu1 %v20954_v4 }
  0x98   :  { %17803 = vmatprep.subr.bf16.mxu0 %v20960_v50  ;;  %17995 = vmatprep.subr.bf16.mxu1 %v20960_v50 }
  0x9b   :  { %17805 = vmatpush3.bf16.msra.mxu0 %v20960_v50  ;;  %17997 = vmatpush3.bf16.msra.mxu1 %v20960_v50 }
  0x9c   :  { %17807 = vmatprep.subr.bf16.mxu0 %v20964_v56  ;;  %17999 = vmatprep.subr.bf16.mxu1 %v20964_v56 }
  0x9f   :  { %17809 = vmatpush3.bf16.msra.mxu0 %v20964_v56  ;;  %18001 = vmatpush3.bf16.msra.mxu1 %v20964_v56 }
  0xa0   :  { %17811 = vmatprep.subr.bf16.mxu0 %v20966_v22  ;;  %18003 = vmatprep.subr.bf16.mxu1 %v20966_v22 }
  0xa3   :  { %17813 = vmatpush3.bf16.msra.mxu0 %v20966_v22  ;;  %18005 = vmatpush3.bf16.msra.mxu1 %v20966_v22 }
  0xa4   :  { %17815 = vmatprep.subr.bf16.mxu0 %v20435_v10  ;;  %18007 = vmatprep.subr.bf16.mxu1 %v20435_v10 }
  0xa6   :  { %15553 = vmatmul.mubr.f32.vlgmr.msra.gmra.mrb[0].mxu0 %v20498_v30  ;;  %15817 = vmatmul.mubr.f32.vlgmr.msra.gmra.mrb[0].mxu1 %v20509_v34 }
  0xa7   :  { %17817 = vmatpush3.bf16.msra.mxu0 %v20435_v10  ;;  %18009 = vmatpush3.bf16.msra.mxu1 %v20435_v10 }
  0xa8   :  { %17819 = vmatprep.subr.bf16.mxu0 %v24868_v9  ;;  %18011 = vmatprep.subr.bf16.mxu1 %v24868_v9 }
  0xa9   :  { %15555 = vmatprep.mubr.f32.mxu0 %v20633_v18  ;;  %15819 = vmatprep.mubr.f32.mxu1 %v20703_v59 }
  0xaa   :  { %15556 = vmatmul.mubr.f32.gmra.mrb[2].mxu0 %v20708_v43  ;;  %15820 = vmatmul.mubr.f32.gmra.mrb[2].mxu1 %v20710_v31 }
  0xab   :  { %17821 = vmatpush3.bf16.msra.mxu0 %v24868_v9  ;;  %18013 = vmatpush3.bf16.msra.mxu1 %v24868_v9 }
  0xac   :  { %17823 = vmatprep.subr.bf16.mxu0 %v24873_v6  ;;  %18015 = vmatprep.subr.bf16.mxu1 %v24873_v6 }
  0xad   :  { %15558 = vmatprep.mubr.f32.mxu0 %v20730_v5  ;;  %15822 = vmatprep.mubr.f32.mxu1 %v20748_v61 }
  0xae   :  { %15559 = vmatmul.mubr.f32.gmra.mrb[4].mxu0 %v20786_v32  ;;  %15823 = vmatmul.mubr.f32.gmra.mrb[4].mxu1 %v20818_v25 }
  0xaf   :  { %17825 = vmatpush3.bf16.msra.mxu0 %v24873_v6  ;;  %18017 = vmatpush3.bf16.msra.mxu1 %v24873_v6 }
  0xb0   :  { %17827 = vmatprep.subr.bf16.mxu0 %v24877_v48  ;;  %18019 = vmatprep.subr.bf16.mxu1 %v24877_v48 }
  0xb1   :  { %15561 = vmatprep.mubr.f32.mxu0 %v20829_v40  ;;  %15825 = vmatprep.mubr.f32.mxu1 %v20842_v58 }
  0xb2   :  { %15562 = vmatmul.mubr.f32.gmra.mrb[6].mxu0 %v20855_v57  ;;  %15826 = vmatmul.mubr.f32.gmra.mrb[6].mxu1 %v20866_v38 }
  0xb3   :  { %17829 = vmatpush3.bf16.msra.mxu0 %v24877_v48  ;;  %18021 = vmatpush3.bf16.msra.mxu1 %v24877_v48 }
  0xb4   :  { %17831 = vmatprep.subr.bf16.mxu0 %v24879_v14  ;;  %18023 = vmatprep.subr.bf16.mxu1 %v24879_v14 }
  0xb5   :  { %15596 = vmatprep.mubr.f32.mxu0 %v20467_v20  ;;  %15860 = vmatprep.mubr.f32.mxu1 %v20491_v27  ;;  %v13991_v20 = vld [vmem:[%s24640_s3 + $0x80] sm:$0xff] }
  0xb6   :  { %v13999_v27 = vld [vmem:[%s24640_s3 + $0xc0] sm:$0xff]  ;;  %v21240_v52 = vand.u32 4294901760, %v13991_v20 }
  0xb7   :  { %17833 = vmatpush3.bf16.msra.mxu0 %v24879_v14  ;;  %18025 = vmatpush3.bf16.msra.mxu1 %v24879_v14  ;;  %v21242_v62 = vand.u32 4294901760, %v13999_v27 }
  0xb8   :  { %17835 = vmatprep.subr.bf16.mxu0 %v24882_v1  ;;  %18027 = vmatprep.subr.bf16.mxu1 %v24882_v1  ;;  %v21249_v21 = vsub.f32 %v13991_v20, %v21240_v52 }
  0xb9   :  { %v21252_v42 = vsub.f32 %v13999_v27, %v21242_v62  ;;  %v21358_v27 = vand.u32 4294901760, %v13995_v7 }
  0xba   :  { %v24713_v36 = vand.u32 4294901760, %v21249_v21 }
  0xbb   :  { %17837 = vmatpush3.bf16.msra.mxu0 %v24882_v1  ;;  %18029 = vmatpush3.bf16.msra.mxu1 %v24882_v1  ;;  %v24712_v13 = vand.u32 4294901760, %v21252_v42 }
  0xbc   :  { %17839 = vmatprep.subr.bf16.mxu0 %v24883_v0  ;;  %18031 = vmatprep.subr.bf16.mxu1 %v24883_v0 }
  0xbf   :  { %17841 = vmatpush3.bf16.msra.mxu0 %v24883_v0  ;;  %18033 = vmatpush3.bf16.msra.mxu1 %v24883_v0 }
  0xc0   :  { %17843 = vmatprep.subr.bf16.mxu0 %v24884_v28  ;;  %18035 = vmatprep.subr.bf16.mxu1 %v24884_v28 }
  0xc3   :  { %17845 = vmatpush3.bf16.msra.mxu0 %v24884_v28  ;;  %18037 = vmatpush3.bf16.msra.mxu1 %v24884_v28 }
  0xc4   :  { %18039 = vmatprep.subr.bf16.mxu0 %v20435_v10  ;;  %18231 = vmatprep.subr.bf16.mxu1 %v20435_v10 }
  0xc6   :  { %15597 = vmatmul.mubr.f32.vlgmr.msra.gmra.mrb[0].mxu0 %v20498_v30  ;;  %15861 = vmatmul.mubr.f32.vlgmr.msra.gmra.mrb[0].mxu1 %v20509_v34  ;;  %v13992_v30 = vld [vmem:[%s24640_s3 + $0x88] sm:$0xff]  ;;  %v2033_v34 = vsub.f32 %v21249_v21, %v24713_v36 }
  0xc7   :  { %18041 = vmatpush3.bf16.msra.mxu0 %v20435_v10  ;;  %18233 = vmatpush3.bf16.msra.mxu1 %v20435_v10 }
  0xc8   :  { %15599 = vmatprep.mubr.f32.mxu0 %v20633_v18  ;;  %15863 = vmatprep.mubr.f32.mxu1 %v20703_v59  ;;  %v14000_v59 = vld [vmem:[%s24640_s3 + $0xc8] sm:$0xff] }
  0xc9   :  { %18043 = vmatprep.subr.bf16.mxu0 %v24868_v9  ;;  %18235 = vmatprep.subr.bf16.mxu1 %v24868_v9  ;;  %v21292_v18 = vand.u32 4294901760, %v14000_v59 }
  0xca   :  { %15600 = vmatmul.mubr.f32.gmra.mrb[2].mxu0 %v20708_v43  ;;  %15864 = vmatmul.mubr.f32.gmra.mrb[2].mxu1 %v20710_v31  ;;  %v2984_v43 = vsub.f32 %v21252_v42, %v24712_v13 }
  0xcb   :  { %18045 = vmatpush3.bf16.msra.mxu0 %v24868_v9  ;;  %18237 = vmatpush3.bf16.msra.mxu1 %v24868_v9  ;;  %v21320_v54 = vsub.f32 %v14000_v59, %v21292_v18  ;;  %v13997_v59 = vld [vmem:[%s24640_s3 + $0xb0] sm:$0xff] }
  0xcc   :  { %15602 = vmatprep.mubr.f32.mxu0 %v20730_v5  ;;  %15866 = vmatprep.mubr.f32.mxu1 %v20748_v61  ;;  %v21288_v5 = vand.u32 4294901760, %v13992_v30  ;;  %v13993_v61 = vld [vmem:[%s24640_s3 + $0x90] sm:$0xff]  ;;  %v2985_v31 = vand.u32 4294901760, %v2984_v43  ;;  %v21364_v43 = vand.u32 4294901760, %v14004_v12  ;;  %v21398_v56 = vand.u32 4294901760, %v13997_v59 }
  0xcd   :  { %18047 = vmatprep.subr.bf16.mxu0 %v24873_v6  ;;  %18239 = vmatprep.subr.bf16.mxu1 %v24873_v6  ;;  %v21315_v46 = vand.u32 4294901760, %v13993_v61  ;;  %v24722_v37 = vand.u32 4294901760, %v21320_v54 }
  0xce   :  { %15603 = vmatmul.mubr.f32.gmra.mrb[4].mxu0 %v20786_v32  ;;  %15867 = vmatmul.mubr.f32.gmra.mrb[4].mxu1 %v20818_v25  ;;  %v2034_v25 = vand.u32 4294901760, %v2033_v34  ;;  %v14001_v32 = vld [vmem:[%s24640_s3 + $0xd0] sm:$0xff]  ;;  %v21313_v39 = vsub.f32 %v13992_v30, %v21288_v5  ;;  %v21360_v30 = vand.u32 4294901760, %v14003_v17  ;;  %v21362_v34 = vand.u32 4294901760, %v13996_v35 }
  0xcf   :  { %18049 = vmatpush3.bf16.msra.mxu0 %v24873_v6  ;;  %18241 = vmatpush3.bf16.msra.mxu1 %v24873_v6  ;;  %v21322_v45 = vand.u32 4294901760, %v14001_v32  ;;  %v21338_v15 = vsub.f32 %v13993_v61, %v21315_v46  ;;  %v14005_v61 = vld [vmem:[%s24640_s3 + $0xf0] sm:$0xff] }
  0xd0   :  { %15605 = vmatprep.mubr.f32.mxu0 %v20829_v40  ;;  %15869 = vmatprep.mubr.f32.mxu1 %v20842_v58  ;;  %v13994_v40 = vld [vmem:[%s24640_s3 + $0x98] sm:$0xff]  ;;  %v24711_v24 = vand.u32 4294901760, %v21313_v39  ;;  %v21396_v22 = vsub.f32 %v14003_v17, %v21360_v30  ;;  %v21400_v50 = vand.u32 4294901760, %v14005_v61  ;;  %v21403_v4 = vsub.f32 %v13996_v35, %v21362_v34 }
  0xd1   :  { %18051 = vmatprep.subr.bf16.mxu0 %v24877_v48  ;;  %18243 = vmatprep.subr.bf16.mxu1 %v24877_v48  ;;  %v14002_v58 = vld [vmem:[%s24640_s3 + $0xd8] sm:$0xff]  ;;  %v21350_v8 = vsub.f32 %v14001_v32, %v21322_v45  ;;  %v24902_v17 = vand.u32 4294901760, %v21338_v15 }
  0xd2   :  { %15606 = vmatmul.mubr.f32.gmra.mrb[6].mxu0 %v20855_v57  ;;  %15870 = vmatmul.mubr.f32.gmra.mrb[6].mxu1 %v20866_v38  ;;  %v21324_v57 = vand.u32 4294901760, %v13994_v40  ;;  %v21326_v38 = vand.u32 4294901760, %v14002_v58  ;;  %v13998_v32 = vld [vmem:[%s24640_s3 + $0xb8] sm:$0xff] }
  0xd3   :  { %18053 = vmatpush3.bf16.msra.mxu0 %v24877_v48  ;;  %18245 = vmatpush3.bf16.msra.mxu1 %v24877_v48  ;;  %v2053_v36 = vsub.f32 %v21338_v15, %v24902_v17 }
  0xd4   :  { %18055 = vmatprep.subr.bf16.mxu0 %v24879_v14  ;;  %18247 = vmatprep.subr.bf16.mxu1 %v24879_v14  ;;  %v21353_v23 = vsub.f32 %v13994_v40, %v21324_v57  ;;  %v21356_v20 = vsub.f32 %v14002_v58, %v21326_v38  ;;  %v14006_v40 = vld [vmem:[%s24640_s3 + $0xf8] sm:$0xff]  ;;  %v2994_v58 = vsub.f32 %v21320_v54, %v24722_v37 }
  0xd5   :  { %15904 = vmatprep.mubr.f32.mxu0 %v2034_v25  ;;  %16168 = vmatprep.mubr.f32.mxu1 %v2985_v31  ;;  %v2043_v25 = vsub.f32 %v21313_v39, %v24711_v24  ;;  %v21393_v31 = vsub.f32 %v13995_v7, %v21358_v27  ;;  %v21406_v37 = vsub.f32 %v14004_v12, %v21364_v43  ;;  %v21408_v24 = vand.u32 4294901760, %v13998_v32 }
  0xd6   :  { %24900 = vst [vmem:[#allocation5_spill] sm:$0xff] %v21356_v20  ;;  %v21410_v13 = vand.u32 4294901760, %v14006_v40  ;;  %v2995_v35 = vand.u32 4294901760, %v2994_v58  ;;  %v24903_v12 = vand.u32 4294901760, %v21350_v8  ;;  %v24904_v2 = vand.u32 4294901760, %v21353_v23 }
  0xd7   :  { %18057 = vmatpush3.bf16.msra.mxu0 %v24879_v14  ;;  %18249 = vmatpush3.bf16.msra.mxu1 %v24879_v14  ;;  %24901 = vst [vmem:[#allocation2_spill] sm:$0xff] %v21406_v37  ;;  %v2044_v7 = vand.u32 4294901760, %v2043_v25  ;;  %v24905_v33 = vand.u32 4294901760, %v21356_v20  ;;  %v21434_v58 = vsub.f32 %v14005_v61, %v21400_v50  ;;  %v24907_v14 = vand.u32 4294901760, %v21396_v22 }
  0xd8   :  { %18059 = vmatprep.subr.bf16.mxu0 %v24882_v1  ;;  %18251 = vmatprep.subr.bf16.mxu1 %v24882_v1  ;;  %v3004_v11 = vsub.f32 %v21350_v8, %v24903_v12  ;;  %v2063_v60 = vsub.f32 %v21353_v23, %v24904_v2  ;;  %v21439_v2 = vsub.f32 %v13998_v32, %v21408_v24 }
  0xd9   :  { %v3014_v25 = vsub.f32 %v21356_v20, %v24905_v33  ;;  %v21442_v48 = vsub.f32 %v14006_v40, %v21410_v13  ;;  %v24906_v33 = vld [vmem:[#allocation11_spill] sm:$0xff]  ;;  %v3024_v40 = vsub.f32 %v21396_v22, %v24907_v14  ;;  %v24908_v20 = vand.u32 4294901760, %v21403_v4  ;;  %v24910_v14 = vld [vmem:[#allocation16_spill] sm:$0xff] }
  0xda   :  { %v3005_v61 = vand.u32 4294901760, %v3004_v11  ;;  %v2064_v17 = vand.u32 4294901760, %v2063_v60  ;;  %v24909_v60 = vand.u32 4294901760, %v21406_v37 }
  0xdb   :  { %18061 = vmatpush3.bf16.msra.mxu0 %v24882_v1  ;;  %18253 = vmatpush3.bf16.msra.mxu1 %v24882_v1  ;;  %v21431_v1 = vsub.f32 %v13997_v59, %v21398_v56  ;;  %v2054_v59 = vand.u32 4294901760, %v2053_v36  ;;  %v3015_v12 = vand.u32 4294901760, %v3014_v25  ;;  %v2083_v11 = vsub.f32 %v21403_v4, %v24908_v20 }
  0xdc   :  { %18063 = vmatprep.subr.bf16.mxu0 %v24883_v0  ;;  %18255 = vmatprep.subr.bf16.mxu1 %v24883_v0  ;;  %v3034_v36 = vsub.f32 %v21406_v37, %v24909_v60  ;;  %v3025_v20 = vand.u32 4294901760, %v3024_v40 }
  0xdd   :  { %v2092_v6 = vand.u32 4294901760, %v21431_v1 }
  0xde   :  { %v3035_v25 = vand.u32 4294901760, %v3034_v36  ;;  %v24917_v36 = vld [vmem:[#allocation4_spill] sm:$0xff] }
  0xdf   :  { %18065 = vmatpush3.bf16.msra.mxu0 %v24883_v0  ;;  %18257 = vmatpush3.bf16.msra.mxu1 %v24883_v0  ;;  %v24738_v0 = vand.u32 4294901760, %v21393_v31 }
  0xe0   :  { %18067 = vmatprep.subr.bf16.mxu0 %v24884_v28  ;;  %18259 = vmatprep.subr.bf16.mxu1 %v24884_v28 }
  0xe1   :  { %v2073_v32 = vsub.f32 %v21393_v31, %v24738_v0  ;;  %v2084_v0 = vand.u32 4294901760, %v2083_v11  ;;  %v24916_v11 = vld [vmem:[#allocation2_spill] sm:$0xff] }
  0xe3   :  { %18069 = vmatpush3.bf16.msra.mxu0 %v24884_v28  ;;  %18261 = vmatpush3.bf16.msra.mxu1 %v24884_v28  ;;  %v3043_v28 = vand.u32 4294901760, %v21434_v58 }
  0xe4   :  { %18071 = vmatprep.subr.bf16.mxu0 %v24906_v33  ;;  %18263 = vmatprep.subr.bf16.mxu1 %v24906_v33 }
  0xe5   :  { %v3044_v60 = vsub.f32 %v21434_v58, %v3043_v28 }
  0xe6   :  { %15905 = vmatmul.mubr.f32.vlgmr.msra.gmra.mrb[8].mxu0 %v2044_v7  ;;  %16169 = vmatmul.mubr.f32.vlgmr.msra.gmra.mrb[8].mxu1 %v2995_v35  ;;  %v2074_v7 = vand.u32 4294901760, %v2073_v32  ;;  %v2093_v35 = vsub.f32 %v21431_v1, %v2092_v6  ;;  %v24913_v32 = vld [vmem:[#allocation18_spill] sm:$0xff] }
  0xe7   :  { %18073 = vmatpush3.bf16.msra.mxu0 %v24906_v33  ;;  %18265 = vmatpush3.bf16.msra.mxu1 %v24906_v33  ;;  %v24911_v33 = vand.u32 4294901760, %v21439_v2 }
  0xe8   :  { %18075 = vmatprep.subr.bf16.mxu0 %v24910_v14  ;;  %18267 = vmatprep.subr.bf16.mxu1 %v24910_v14 }
  0xe9   :  { %15907 = vmatprep.mubr.f32.mxu0 %v2054_v59  ;;  %16171 = vmatprep.mubr.f32.mxu1 %v3005_v61  ;;  %v2103_v37 = vsub.f32 %v21439_v2, %v24911_v33  ;;  %v24912_v59 = vand.u32 4294901760, %v21442_v48 }
  0xea   :  { %15908 = vmatmul.mubr.f32.gmra.mrb[10].mxu0 %v2064_v17  ;;  %16172 = vmatmul.mubr.f32.gmra.mrb[10].mxu1 %v3015_v12  ;;  %v2094_v17 = vand.u32 4294901760, %v2093_v35  ;;  %v3045_v12 = vand.u32 4294901760, %v3044_v60  ;;  %v24921_v35 = vld [vmem:[#allocation7_spill] sm:$0xff]  ;;  %v24922_v60 = vld [vmem:[#allocation8_spill] sm:$0xff] }
  0xeb   :  { %v3054_v61 = vsub.f32 %v21442_v48, %v24912_v59  ;;  %18077 = vmatpush3.bf16.msra.mxu0 %v24910_v14  ;;  %18269 = vmatpush3.bf16.msra.mxu1 %v24910_v14  ;;  %v2104_v40 = vand.u32 4294901760, %v2103_v37  ;;  %v24915_v37 = vld [vmem:[#allocation3_spill] sm:$0xff]  ;;  %v24925_v59 = vand.u32 4294901760, %v21313_v39 }
  0xec   :  { %18079 = vmatprep.subr.bf16.mxu0 %v24913_v32  ;;  %18271 = vmatprep.subr.bf16.mxu1 %v24913_v32 }
  0xed   :  { %15910 = vmatprep.mubr.f32.mxu0 %v2074_v7  ;;  %16174 = vmatprep.mubr.f32.mxu1 %v3025_v20  ;;  %v3055_v33 = vand.u32 4294901760, %v3054_v61  ;;  %v24919_v7 = vand.u32 4294901760, %v21249_v21  ;;  %v24920_v20 = vand.u32 4294901760, %v21252_v42  ;;  %v24926_v61 = vand.u32 4294901760, %v21320_v54 }
  0xee   :  { %15911 = vmatmul.mubr.f32.gmra.mrb[12].mxu0 %v2084_v0  ;;  %16175 = vmatmul.mubr.f32.gmra.mrb[12].mxu1 %v3035_v25  ;;  %v24914_v0 = vld [vmem:[#allocation5_spill] sm:$0xff]  ;;  %v24918_v25 = vld [vmem:[#allocation6_spill] sm:$0xff] }
  0xef   :  { %18081 = vmatpush3.bf16.msra.mxu0 %v24913_v32  ;;  %18273 = vmatpush3.bf16.msra.mxu1 %v24913_v32 }
  0xf0   :  { %18083 = vmatprep.subr.bf16.mxu0 %v20793_v44  ;;  %18275 = vmatprep.subr.bf16.mxu1 %v20793_v44 }
  0xf1   :  { %15913 = vmatprep.mubr.f32.mxu0 %v2094_v17  ;;  %16177 = vmatprep.mubr.f32.mxu1 %v3045_v12  ;;  %v24927_v17 = vld [vmem:[#allocation22_spill] sm:$0xff]  ;;  %v24928_v12 = vand.u32 4294901760, %v21338_v15 }
  0xf2   :  { %15914 = vmatmul.mubr.f32.gmra.mrb[14].mxu0 %v2104_v40  ;;  %16178 = vmatmul.mubr.f32.gmra.mrb[14].mxu1 %v3055_v33  ;;  %v24929_v40 = vand.u32 4294901760, %v21350_v8  ;;  %v24932_v33 = vld [vmem:[#allocation23_spill] sm:$0xff] }
  0xf3   :  { %18085 = vmatpush3.bf16.msra.mxu0 %v20793_v44  ;;  %18277 = vmatpush3.bf16.msra.mxu1 %v20793_v44 }
  0xf4   :  { %18087 = vmatprep.subr.bf16.mxu0 %v20906_v47  ;;  %18279 = vmatprep.subr.bf16.mxu1 %v20906_v47 }
  0xf5   :  { %15948 = vmatprep.mubr.f32.mxu0 %v21240_v52  ;;  %16212 = vmatprep.mubr.f32.mxu1 %v21242_v62 }
  0xf7   :  { %18089 = vmatpush3.bf16.msra.mxu0 %v20906_v47  ;;  %18281 = vmatpush3.bf16.msra.mxu1 %v20906_v47 }
  0xf8   :  { %18091 = vmatprep.subr.bf16.mxu0 %v20970_v53  ;;  %18283 = vmatprep.subr.bf16.mxu1 %v20970_v53 }
  0xfb   :  { %18093 = vmatpush3.bf16.msra.mxu0 %v20970_v53  ;;  %18285 = vmatpush3.bf16.msra.mxu1 %v20970_v53 }
  0xfc   :  { %18095 = vmatprep.subr.bf16.mxu0 %v20982_v51  ;;  %18287 = vmatprep.subr.bf16.mxu1 %v20982_v51 }
  0xff   :  { %18097 = vmatpush3.bf16.msra.mxu0 %v20982_v51  ;;  %18289 = vmatpush3.bf16.msra.mxu1 %v20982_v51 }
 0x100   :  { %18099 = vmatprep.subr.bf16.mxu0 %v20988_v19  ;;  %18291 = vmatprep.subr.bf16.mxu1 %v20988_v19 }
 0x103   :  { %18101 = vmatpush3.bf16.msra.mxu0 %v20988_v19  ;;  %18293 = vmatpush3.bf16.msra.mxu1 %v20988_v19 }
 0x104   :  { %18103 = vmatprep.subr.bf16.mxu0 %v20996_v16  ;;  %18295 = vmatprep.subr.bf16.mxu1 %v20996_v16 }
 0x106   :  { %15949 = vmatmul.mubr.f32.vlgmr.msra.gmra.mrb[8].mxu0 %v21288_v5  ;;  %16213 = vmatmul.mubr.f32.vlgmr.msra.gmra.mrb[8].mxu1 %v21292_v18 }
 0x107   :  { %18105 = vmatpush3.bf16.msra.mxu0 %v20996_v16  ;;  %18297 = vmatpush3.bf16.msra.mxu1 %v20996_v16 }
 0x108   :  { %18107 = vmatprep.subr.bf16.mxu0 %v21004_v55  ;;  %18299 = vmatprep.subr.bf16.mxu1 %v21004_v55 }
 0x109   :  { %15951 = vmatprep.mubr.f32.mxu0 %v21315_v46  ;;  %16215 = vmatprep.mubr.f32.mxu1 %v21322_v45 }
 0x10a   :  { %15952 = vmatmul.mubr.f32.gmra.mrb[10].mxu0 %v21324_v57  ;;  %16216 = vmatmul.mubr.f32.gmra.mrb[10].mxu1 %v21326_v38 }
 0x10b   :  { %18109 = vmatpush3.bf16.msra.mxu0 %v21004_v55  ;;  %18301 = vmatpush3.bf16.msra.mxu1 %v21004_v55 }
 0x10c   :  { %18111 = vmatprep.subr.bf16.mxu0 %v21014_v26  ;;  %18303 = vmatprep.subr.bf16.mxu1 %v21014_v26 }
 0x10d   :  { %15954 = vmatprep.mubr.f32.mxu0 %v21358_v27  ;;  %16218 = vmatprep.mubr.f32.mxu1 %v21360_v30 }
 0x10e   :  { %15955 = vmatmul.mubr.f32.gmra.mrb[12].mxu0 %v21362_v34  ;;  %16219 = vmatmul.mubr.f32.gmra.mrb[12].mxu1 %v21364_v43 }
 0x10f   :  { %18113 = vmatpush3.bf16.msra.mxu0 %v21014_v26  ;;  %18305 = vmatpush3.bf16.msra.mxu1 %v21014_v26 }
 0x110   :  { %18115 = vmatprep.subr.bf16.mxu0 %v21026_v29  ;;  %18307 = vmatprep.subr.bf16.mxu1 %v21026_v29 }
 0x111   :  { %15957 = vmatprep.mubr.f32.mxu0 %v21398_v56  ;;  %16221 = vmatprep.mubr.f32.mxu1 %v21400_v50 }
 0x112   :  { %15958 = vmatmul.mubr.f32.gmra.mrb[14].mxu0 %v21408_v24  ;;  %16222 = vmatmul.mubr.f32.gmra.mrb[14].mxu1 %v21410_v13 }
 0x113   :  { %18117 = vmatpush3.bf16.msra.mxu0 %v21026_v29  ;;  %18309 = vmatpush3.bf16.msra.mxu1 %v21026_v29 }
 0x114   :  { %18119 = vmatprep.subr.bf16.mxu0 %v21038_v41  ;;  %18311 = vmatprep.subr.bf16.mxu1 %v21038_v41 }
 0x115   :  { %15992 = vmatprep.mubr.f32.mxu0 %v21249_v21  ;;  %16256 = vmatprep.mubr.f32.mxu1 %v21252_v42  ;;  %v24923_v21 = vld [vmem:[#allocation9_spill] sm:$0xff] }
 0x116   :  { %v24924_v42 = vld [vmem:[#allocation21_spill] sm:$0xff] }
 0x117   :  { %18121 = vmatpush3.bf16.msra.mxu0 %v21038_v41  ;;  %18313 = vmatpush3.bf16.msra.mxu1 %v21038_v41 }
 0x118   :  { %18123 = vmatprep.subr.bf16.mxu0 %v21050_v49  ;;  %18315 = vmatprep.subr.bf16.mxu1 %v21050_v49 }
 0x11b   :  { %18125 = vmatpush3.bf16.msra.mxu0 %v21050_v49  ;;  %18317 = vmatpush3.bf16.msra.mxu1 %v21050_v49 }
 0x11c   :  { %18127 = vmatprep.subr.bf16.mxu0 %v21060_v63  ;;  %18319 = vmatprep.subr.bf16.mxu1 %v21060_v63 }
 0x11f   :  { %18129 = vmatpush3.bf16.msra.mxu0 %v21060_v63  ;;  %18321 = vmatpush3.bf16.msra.mxu1 %v21060_v63 }
 0x120   :  { %18131 = vmatprep.subr.bf16.mxu0 %v21068_v3  ;;  %18323 = vmatprep.subr.bf16.mxu1 %v21068_v3 }
 0x123   :  { %18133 = vmatpush3.bf16.msra.mxu0 %v21068_v3  ;;  %18325 = vmatpush3.bf16.msra.mxu1 %v21068_v3 }
 0x124   :  { %18135 = vmatprep.subr.bf16.mxu0 %v20435_v10  ;;  %18327 = vmatprep.subr.bf16.mxu1 %v20435_v10 }
 0x126   :  { %15993 = vmatmul.mubr.f32.vlgmr.msra.gmra.mrb[8].mxu0 %v21313_v39  ;;  %16257 = vmatmul.mubr.f32.vlgmr.msra.gmra.mrb[8].mxu1 %v21320_v54  ;;  %v24930_v39 = vand.u32 4294901760, %v21353_v23  ;;  %v24931_v54 = vand.u32 4294901760, %v24914_v0 }
 0x127   :  { %18137 = vmatpush3.bf16.msra.mxu0 %v20435_v10  ;;  %18329 = vmatpush3.bf16.msra.mxu1 %v20435_v10 }
 0x128   :  { %18139 = vmatprep.subr.bf16.mxu0 %v24868_v9  ;;  %18331 = vmatprep.subr.bf16.mxu1 %v24868_v9 }
 0x129   :  { %15995 = vmatprep.mubr.f32.mxu0 %v21338_v15  ;;  %16259 = vmatprep.mubr.f32.mxu1 %v21350_v8  ;;  %v24933_v15 = vand.u32 4294901760, %v21393_v31  ;;  %v24934_v8 = vand.u32 4294901760, %v21396_v22 }
 0x12a   :  { %15996 = vmatmul.mubr.f32.gmra.mrb[10].mxu0 %v21353_v23  ;;  %16260 = vmatmul.mubr.f32.gmra.mrb[10].mxu1 %v24914_v0  ;;  %v24935_v23 = vand.u32 4294901760, %v21403_v4  ;;  %v24936_v0 = vand.u32 4294901760, %v24916_v11 }
 0x12b   :  { %18141 = vmatpush3.bf16.msra.mxu0 %v24868_v9  ;;  %18333 = vmatpush3.bf16.msra.mxu1 %v24868_v9 }
 0x12c   :  { %18143 = vmatprep.subr.bf16.mxu0 %v24915_v37  ;;  %18335 = vmatprep.subr.bf16.mxu1 %v24915_v37 }
 0x12d   :  { %15998 = vmatprep.mubr.f32.mxu0 %v21393_v31  ;;  %16262 = vmatprep.mubr.f32.mxu1 %v21396_v22  ;;  %v24939_v22 = vand.u32 4294901760, %v21442_v48  ;;  %v24940_v31 = vld [vmem:[#allocation25_spill] sm:$0xff] }
 0x12e   :  { %15999 = vmatmul.mubr.f32.gmra.mrb[12].mxu0 %v21403_v4  ;;  %16263 = vmatmul.mubr.f32.gmra.mrb[12].mxu1 %v24916_v11  ;;  %v24938_v4 = vand.u32 4294901760, %v21439_v2 }
 0x12f   :  { %18145 = vmatpush3.bf16.msra.mxu0 %v24915_v37  ;;  %18337 = vmatpush3.bf16.msra.mxu1 %v24915_v37 }
 0x130   :  { %18147 = vmatprep.subr.bf16.mxu0 %v24917_v36  ;;  %18339 = vmatprep.subr.bf16.mxu1 %v24917_v36 }
 0x131   :  { %16001 = vmatprep.mubr.f32.mxu0 %v21431_v1  ;;  %16265 = vmatprep.mubr.f32.mxu1 %v21434_v58  ;;  %v24943_v1 = vld [vmem:[#allocation28_spill] sm:$0xff] }
 0x132   :  { %16002 = vmatmul.mubr.f32.gmra.mrb[14].mxu0 %v21439_v2  ;;  %16266 = vmatmul.mubr.f32.gmra.mrb[14].mxu1 %v21442_v48  ;;  %v24942_v48 = vld [vmem:[#allocation27_spill] sm:$0xff] }
 0x133   :  { %18149 = vmatpush3.bf16.msra.mxu0 %v24917_v36  ;;  %18341 = vmatpush3.bf16.msra.mxu1 %v24917_v36 }
 0x134   :  { %18151 = vmatprep.subr.bf16.mxu0 %v24918_v25  ;;  %18343 = vmatprep.subr.bf16.mxu1 %v24918_v25 }
 0x135   :  { %16036 = vmatprep.mubr.f32.mxu0 %v24919_v7  ;;  %16300 = vmatprep.mubr.f32.mxu1 %v24920_v20  ;;  %v24937_v7 = vld [vmem:[#allocation24_spill] sm:$0xff] }
 0x137   :  { %18153 = vmatpush3.bf16.msra.mxu0 %v24918_v25  ;;  %18345 = vmatpush3.bf16.msra.mxu1 %v24918_v25 }
 0x138   :  { %18155 = vmatprep.subr.bf16.mxu0 %v24921_v35  ;;  %18347 = vmatprep.subr.bf16.mxu1 %v24921_v35 }
 0x13b   :  { %18157 = vmatpush3.bf16.msra.mxu0 %v24921_v35  ;;  %18349 = vmatpush3.bf16.msra.mxu1 %v24921_v35 }
 0x13c   :  { %18159 = vmatprep.subr.bf16.mxu0 %v24922_v60  ;;  %18351 = vmatprep.subr.bf16.mxu1 %v24922_v60 }
 0x13f   :  { %18161 = vmatpush3.bf16.msra.mxu0 %v24922_v60  ;;  %18353 = vmatpush3.bf16.msra.mxu1 %v24922_v60 }
 0x140   :  { %18163 = vmatprep.subr.bf16.mxu0 %v24923_v21  ;;  %18355 = vmatprep.subr.bf16.mxu1 %v24923_v21 }
 0x143   :  { %18165 = vmatpush3.bf16.msra.mxu0 %v24923_v21  ;;  %18357 = vmatpush3.bf16.msra.mxu1 %v24923_v21 }
 0x144   :  { %18167 = vmatprep.subr.bf16.mxu0 %v24924_v42  ;;  %18359 = vmatprep.subr.bf16.mxu1 %v24924_v42 }
 0x146   :  { %16037 = vmatmul.mubr.f32.vlgmr.msra.gmra.mrb[8].mxu0 %v24925_v59  ;;  %16301 = vmatmul.mubr.f32.vlgmr.msra.gmra.mrb[8].mxu1 %v24926_v61 }
 0x147   :  { %18169 = vmatpush3.bf16.msra.mxu0 %v24924_v42  ;;  %18361 = vmatpush3.bf16.msra.mxu1 %v24924_v42 }
 0x148   :  { %18171 = vmatprep.subr.bf16.mxu0 %v24927_v17  ;;  %18363 = vmatprep.subr.bf16.mxu1 %v24927_v17 }
 0x149   :  { %16039 = vmatprep.mubr.f32.mxu0 %v24928_v12  ;;  %16303 = vmatprep.mubr.f32.mxu1 %v24929_v40 }
 0x14a   :  { %16040 = vmatmul.mubr.f32.gmra.mrb[10].mxu0 %v24930_v39  ;;  %16304 = vmatmul.mubr.f32.gmra.mrb[10].mxu1 %v24931_v54 }
 0x14b   :  { %18173 = vmatpush3.bf16.msra.mxu0 %v24927_v17  ;;  %18365 = vmatpush3.bf16.msra.mxu1 %v24927_v17 }
 0x14c   :  { %18175 = vmatprep.subr.bf16.mxu0 %v24932_v33  ;;  %18367 = vmatprep.subr.bf16.mxu1 %v24932_v33 }
 0x14d   :  { %16042 = vmatprep.mubr.f32.mxu0 %v24933_v15  ;;  %16306 = vmatprep.mubr.f32.mxu1 %v24934_v8  ;;  %v14014_v8 = vld [vmem:[%s24640_s3 + $0x138] sm:$0xff] }
 0x14e   :  { %16043 = vmatmul.mubr.f32.gmra.mrb[12].mxu0 %v24935_v23  ;;  %16307 = vmatmul.mubr.f32.gmra.mrb[12].mxu1 %v24936_v0 }
 0x14f   :  { %18177 = vmatpush3.bf16.msra.mxu0 %v24932_v33  ;;  %18369 = vmatpush3.bf16.msra.mxu1 %v24932_v33 }
 0x150   :  { %18179 = vmatprep.subr.bf16.mxu0 %v24937_v7  ;;  %18371 = vmatprep.subr.bf16.mxu1 %v24937_v7 }
 0x151   :  { %16045 = vmatprep.mubr.f32.mxu0 %v2092_v6  ;;  %16309 = vmatprep.mubr.f32.mxu1 %v3043_v28  ;;  %v24941_v6 = vld [vmem:[#allocation26_spill] sm:$0xff] }
 0x152   :  { %16046 = vmatmul.mubr.f32.gmra.mrb[14].mxu0 %v24938_v4  ;;  %16310 = vmatmul.mubr.f32.gmra.mrb[14].mxu1 %v24939_v22  ;;  %v14007_v28 = vld [vmem:[%s24640_s3 + $0x100] sm:$0xff] }
 0x153   :  { %18181 = vmatpush3.bf16.msra.mxu0 %v24937_v7  ;;  %18373 = vmatpush3.bf16.msra.mxu1 %v24937_v7 }
 0x154   :  { %18183 = vmatprep.subr.bf16.mxu0 %v24940_v31  ;;  %18375 = vmatprep.subr.bf16.mxu1 %v24940_v31 }
 0x155   :  { %16080 = vmatprep.mubr.f32.mxu0 %v21240_v52  ;;  %16344 = vmatprep.mubr.f32.mxu1 %v21242_v62 }
 0x157   :  { %18185 = vmatpush3.bf16.msra.mxu0 %v24940_v31  ;;  %18377 = vmatpush3.bf16.msra.mxu1 %v24940_v31 }
 0x158   :  { %18187 = vmatprep.subr.bf16.mxu0 %v24941_v6  ;;  %18379 = vmatprep.subr.bf16.mxu1 %v24941_v6 }
 0x15b   :  { %18189 = vmatpush3.bf16.msra.mxu0 %v24941_v6  ;;  %18381 = vmatpush3.bf16.msra.mxu1 %v24941_v6 }
 0x15c   :  { %18191 = vmatprep.subr.bf16.mxu0 %v24942_v48  ;;  %18383 = vmatprep.subr.bf16.mxu1 %v24942_v48 }
 0x15f   :  { %18193 = vmatpush3.bf16.msra.mxu0 %v24942_v48  ;;  %18385 = vmatpush3.bf16.msra.mxu1 %v24942_v48 }
 0x160   :  { %18195 = vmatprep.subr.bf16.mxu0 %v24943_v1  ;;  %18387 = vmatprep.subr.bf16.mxu1 %v24943_v1 }
 0x163   :  { %18197 = vmatpush3.bf16.msra.mxu0 %v24943_v1  ;;  %18389 = vmatpush3.bf16.msra.mxu1 %v24943_v1 }
 0x164   :  { %18199 = vmatprep.subr.bf16.mxu0 %v20435_v10  ;;  %18391 = vmatprep.subr.bf16.mxu1 %v20435_v10 }
 0x166   :  { %16081 = vmatmul.mubr.f32.vlgmr.msra.gmra.mrb[8].mxu0 %v21288_v5  ;;  %16345 = vmatmul.mubr.f32.vlgmr.msra.gmra.mrb[8].mxu1 %v21292_v18 }
 0x167   :  { %18201 = vmatpush3.bf16.msra.mxu0 %v20435_v10  ;;  %18393 = vmatpush3.bf16.msra.mxu1 %v20435_v10 }
 0x168   :  { %18203 = vmatprep.subr.bf16.mxu0 %v24868_v9  ;;  %18395 = vmatprep.subr.bf16.mxu1 %v24868_v9 }
 0x169   :  { %16083 = vmatprep.mubr.f32.mxu0 %v21315_v46  ;;  %16347 = vmatprep.mubr.f32.mxu1 %v21322_v45 }
 0x16a   :  { %16084 = vmatmul.mubr.f32.gmra.mrb[10].mxu0 %v21324_v57  ;;  %16348 = vmatmul.mubr.f32.gmra.mrb[10].mxu1 %v21326_v38 }
 0x16b   :  { %18205 = vmatpush3.bf16.msra.mxu0 %v24868_v9  ;;  %18397 = vmatpush3.bf16.msra.mxu1 %v24868_v9 }
 0x16c   :  { %18207 = vmatprep.subr.bf16.mxu0 %v24915_v37  ;;  %18399 = vmatprep.subr.bf16.mxu1 %v24915_v37 }
 0x16d   :  { %16086 = vmatprep.mubr.f32.mxu0 %v21358_v27  ;;  %16350 = vmatprep.mubr.f32.mxu1 %v21360_v30 }
 0x16e   :  { %16087 = vmatmul.mubr.f32.gmra.mrb[12].mxu0 %v21362_v34  ;;  %16351 = vmatmul.mubr.f32.gmra.mrb[12].mxu1 %v21364_v43 }
 0x16f   :  { %18209 = vmatpush3.bf16.msra.mxu0 %v24915_v37  ;;  %18401 = vmatpush3.bf16.msra.mxu1 %v24915_v37 }
 0x170   :  { %18211 = vmatprep.subr.bf16.mxu0 %v24917_v36  ;;  %18403 = vmatprep.subr.bf16.mxu1 %v24917_v36 }
 0x171   :  { %16089 = vmatprep.mubr.f32.mxu0 %v21398_v56  ;;  %16353 = vmatprep.mubr.f32.mxu1 %v21400_v50 }
 0x172   :  { %16090 = vmatmul.mubr.f32.gmra.mrb[14].mxu0 %v21408_v24  ;;  %16354 = vmatmul.mubr.f32.gmra.mrb[14].mxu1 %v21410_v13 }
 0x173   :  { %18213 = vmatpush3.bf16.msra.mxu0 %v24917_v36  ;;  %18405 = vmatpush3.bf16.msra.mxu1 %v24917_v36 }
 0x174   :  { %18215 = vmatprep.subr.bf16.mxu0 %v24918_v25  ;;  %18407 = vmatprep.subr.bf16.mxu1 %v24918_v25 }
 0x175   :  { %16124 = vmatprep.mubr.f32.mxu0 %v21240_v52  ;;  %16388 = vmatprep.mubr.f32.mxu1 %v21242_v62  ;;  %v21715_v52 = vand.u32 4294901760, %v14007_v28 }
 0x177   :  { %18217 = vmatpush3.bf16.msra.mxu0 %v24918_v25  ;;  %18409 = vmatpush3.bf16.msra.mxu1 %v24918_v25  ;;  %v21722_v62 = vsub.f32 %v14007_v28, %v21715_v52 }
 0x178   :  { %18219 = vmatprep.subr.bf16.mxu0 %v24921_v35  ;;  %18411 = vmatprep.subr.bf16.mxu1 %v24921_v35 }
 0x179   :  { %v24743_v58 = vand.u32 4294901760, %v21722_v62 }
 0x17b   :  { %18221 = vmatpush3.bf16.msra.mxu0 %v24921_v35  ;;  %18413 = vmatpush3.bf16.msra.mxu1 %v24921_v35 }
 0x17c   :  { %18223 = vmatprep.subr.bf16.mxu0 %v24922_v60  ;;  %18415 = vmatprep.subr.bf16.mxu1 %v24922_v60 }
 0x17f   :  { %18225 = vmatpush3.bf16.msra.mxu0 %v24922_v60  ;;  %18417 = vmatpush3.bf16.msra.mxu1 %v24922_v60 }
 0x180   :  { %18227 = vmatprep.subr.bf16.mxu0 %v24923_v21  ;;  %18419 = vmatprep.subr.bf16.mxu1 %v24923_v21 }
 0x183   :  { %18229 = vmatpush3.bf16.msra.mxu0 %v24923_v21  ;;  %18421 = vmatpush3.bf16.msra.mxu1 %v24923_v21 }
 0x184   :  { %18423 = vmatprep.subr.bf16.mxu0 %v20435_v10 }
 0x186   :  { %16125 = vmatmul.mubr.f32.vlgmr.msra.gmra.mrb[8].mxu0 %v21288_v5  ;;  %16389 = vmatmul.mubr.f32.vlgmr.msra.gmra.mrb[8].mxu1 %v21292_v18  ;;  %v3935_v5 = vsub.f32 %v21722_v62, %v24743_v58 }
 0x187   :  { %18425 = vmatpush3.bf16.msra.mxu0 %v20435_v10  ;;  %16127 = vmatprep.mubr.f32.mxu0 %v21315_v46  ;;  %v14008_v46 = vld [vmem:[%s24640_s3 + $0x108] sm:$0xff] }
 0x188   :  { %16391 = vmatprep.mubr.f32.mxu1 %v21322_v45  ;;  %18427 = vmatprep.subr.bf16.mxu0 %v24868_v9  ;;  %v3936_v18 = vand.u32 4294901760, %v3935_v5  ;;  %v14009_v45 = vld [vmem:[%s24640_s3 + $0x110] sm:$0xff] }
 0x18a   :  { %16128 = vmatmul.mubr.f32.gmra.mrb[10].mxu0 %v21324_v57  ;;  %16392 = vmatmul.mubr.f32.gmra.mrb[10].mxu1 %v21326_v38  ;;  %v21755_v57 = vand.u32 4294901760, %v14008_v46  ;;  %v14011_v38 = vld [vmem:[%s24640_s3 + $0x120] sm:$0xff] }
 0x18b   :  { %18429 = vmatpush3.bf16.msra.mxu0 %v24868_v9  ;;  %16130 = vmatprep.mubr.f32.mxu0 %v21358_v27 }
 0x18c   :  { %16394 = vmatprep.mubr.f32.mxu1 %v21360_v30  ;;  %18431 = vmatprep.subr.bf16.mxu0 %v24915_v37  ;;  %v21776_v30 = vand.u32 4294901760, %v14011_v38 }
 0x18e   :  { %16131 = vmatmul.mubr.f32.gmra.mrb[12].mxu0 %v21362_v34  ;;  %16395 = vmatmul.mubr.f32.gmra.mrb[12].mxu1 %v21364_v43  ;;  %v14012_v34 = vld [vmem:[%s24640_s3 + $0x128] sm:$0xff]  ;;  %v14013_v43 = vld [vmem:[%s24640_s3 + $0x130] sm:$0xff]  ;;  %v21800_v54 = vsub.f32 %v14011_v38, %v21776_v30 }
 0x18f   :  { %18433 = vmatpush3.bf16.msra.mxu0 %v24915_v37  ;;  %16133 = vmatprep.mubr.f32.mxu0 %v21398_v56  ;;  %v21758_v56 = vand.u32 4294901760, %v14009_v45  ;;  %v21794_v40 = vand.u32 4294901760, %v14012_v34  ;;  %v21802_v15 = vand.u32 4294901760, %v14013_v43 }
 0x190   :  { %16397 = vmatprep.mubr.f32.mxu1 %v21400_v50  ;;  %18435 = vmatprep.subr.bf16.mxu0 %v24917_v36  ;;  %v14010_v50 = vld [vmem:[%s24640_s3 + $0x118] sm:$0xff]  ;;  %s20375_s3 = smov 96  }
 0x191   :  { %v21774_v27 = vsub.f32 %v14009_v45, %v21758_v56  ;;  %v21831_v38 = vsub.f32 %v14013_v43, %v21802_v15 }
 0x192   :  { %16134 = vmatmul.mubr.f32.gmra.mrb[14].mxu0 %v21408_v24  ;;  %16398 = vmatmul.mubr.f32.gmra.mrb[14].mxu1 %v21410_v13  ;;  %v21768_v24 = vsub.f32 %v14008_v46, %v21755_v57  ;;  %v21770_v13 = vand.u32 4294901760, %v14010_v50  ;;  %v21823_v46 = vand.u32 4294901760, %v14014_v8 }
 0x193   :  { %18437 = vmatpush3.bf16.msra.mxu0 %v24917_v36  ;;  %16432 = vmatprep.mubr.f32.mxu0 %v3936_v18  ;;  %v24744_v39 = vand.u32 4294901760, %v21774_v27  ;;  %v21821_v18 = vsub.f32 %v14012_v34, %v21794_v40 }
 0x194   :  { %18439 = vmatprep.subr.bf16.mxu0 %v24918_v25  ;;  %v24742_v61 = vand.u32 4294901760, %v21768_v24  ;;  %v21792_v12 = vsub.f32 %v14010_v50, %v21770_v13  ;;  %v21847_v43 = vsub.f32 %v14014_v8, %v21823_v46 }
 0x195   :  { %v3955_v45 = vsub.f32 %v21774_v27, %v24744_v39 }
 0x196   :  { %v3945_v28 = vsub.f32 %v21768_v24, %v24742_v61  ;;  %v24745_v5 = vand.u32 4294901760, %v21792_v12 }
 0x197   :  { %18441 = vmatpush3.bf16.msra.mxu0 %v24918_v25 }
 0x198   :  { %18443 = vmatprep.subr.bf16.mxu0 %v24921_v35  ;;  %v3946_v58 = vand.u32 4294901760, %v3945_v28  ;;  %v3965_v39 = vsub.f32 %v21792_v12, %v24745_v5 }
 0x199   :  { %v21785_v2 = vpop.f32.mrb[0].mxu0  ;;  %v15862_v11 = vpop.f32.mrb[0].mxu1 }
 0x19a   :  { %24944 = vst [vmem:[#allocation10_spill] sm:$0xff] %v21785_v2  ;;  %4803 = vrot.lane.b32.xlu1 %v15862_v11, %s20374_s8  ;;  %v21788_v20 = vpop.f32.mrb[1].mxu0  ;;  %v1894_v59 = vpop.f32.mrb[1].mxu1  ;;  %v3966_v8 = vand.u32 4294901760, %v3965_v39 }
 0x19b   :  { %24945 = vst [vmem:[#allocation12_spill] sm:$0xff] %v21788_v20  ;;  %4801 = vrot.lane.b32.xlu0 %v1894_v59, %s20374_s8  ;;  %18445 = vmatpush3.bf16.msra.mxu0 %v24921_v35  ;;  %v24952_v20 = vld [vmem:[#allocation11_spill] sm:$0xff] }
 0x19c   :  { %18447 = vmatprep.subr.bf16.mxu0 %v24922_v60 }
 0x19d   :  { %v21808_v23 = vpop.f32.mrb[2].mxu0  ;;  %v21810_v0 = vpop.f32.mrb[2].mxu1 }
 0x19e   :  { %24946 = vst [vmem:[#allocation13_spill] sm:$0xff] %v21808_v23  ;;  %v21812_v4 = vpop.f32.mrb[3].mxu0  ;;  %v21814_v22 = vpop.f32.mrb[3].mxu1  ;;  %v3956_v23 = vand.u32 4294901760, %v3955_v45  ;;  %v24956_v45 = vand.u32 4294901760, %v21821_v18 }
 0x19f   :  { %24947 = vst [vmem:[#allocation14_spill] sm:$0xff] %v21812_v4  ;;  %18449 = vmatpush3.bf16.msra.mxu0 %v24922_v60 }
 0x1a0   :  { %18451 = vmatprep.subr.bf16.mxu0 %v24923_v21 }
 0x1a1   :  { %v21834_v11 = vpop.f32.mrb[4].mxu0  ;;  %v21836_v59 = vpop.f32.mrb[4].mxu1 }
 0x1a2   :  { %24948 = vst [vmem:[#allocation15_spill] sm:$0xff] %v21834_v11  ;;  %24949 = vst [vmem:[#allocation17_spill] sm:$0xff] %v21836_v59  ;;  %v21838_v34 = vpop.f32.mrb[5].mxu0  ;;  %v21840_v61 = vpop.f32.mrb[5].mxu1  ;;  %v24951_v11 = vand.u32 4294901760, %v21800_v54  ;;  %v3985_v59 = vsub.f32 %v21821_v18, %v24956_v45 }
 0x1a3   :  { %24950 = vst [vmem:[#allocation19_spill] sm:$0xff] %v21838_v34  ;;  %18453 = vmatpush3.bf16.msra.mxu0 %v24923_v21 }
 0x1a4   :  { %v3975_v4 = vsub.f32 %v21800_v54, %v24951_v11  ;;  %18455 = vmatprep.subr.bf16.mxu0 %v24952_v20  ;;  %v4004_v11 = vand.u32 4294901760, %v21847_v43 }
 0x1a5   :  { %v21855_v28 = vpop.f32.mrb[6].mxu0  ;;  %v21857_v2 = vpop.f32.mrb[6].mxu1 }
 0x1a6   :  { %24953 = vst [vmem:[#allocation20_spill] sm:$0xff] %v21855_v28  ;;  %24954 = vst [vmem:[#allocation16_spill] sm:$0xff] %v21857_v2  ;;  %v21859_v5 = vpop.f32.mrb[7].mxu0  ;;  %v21861_v50 = vpop.f32.mrb[7].mxu1  ;;  %16433 = vmatmul.mubr.f32.vlgmr.msra.gmra.mrb[16].mxu0 %v3946_v58  ;;  %v3976_v34 = vand.u32 4294901760, %v3975_v4  ;;  %v24957_v28 = vand.u32 4294901760, %v21831_v38  ;;  %v4005_v58 = vsub.f32 %v21847_v43, %v4004_v11 }
 0x1a7   :  { %24955 = vst [vmem:[#allocation18_spill] sm:$0xff] %v21859_v5  ;;  %18457 = vmatpush3.bf16.msra.mxu0 %v24952_v20  ;;  %16435 = vmatprep.mubr.f32.mxu0 %v3956_v23  ;;  %v3986_v5 = vand.u32 4294901760, %v3985_v59 }
 0x1a8   :  { %v3995_v2 = vsub.f32 %v21831_v38, %v24957_v28  ;;  %18459 = vmatprep.subr.bf16.mxu0 %v24910_v14  ;;  %v4006_v20 = vand.u32 4294901760, %v4005_v58 }
 0x1aa   :  { %16436 = vmatmul.mubr.f32.gmra.mrb[18].mxu0 %v3966_v8  ;;  %v3996_v39 = vand.u32 4294901760, %v3995_v2  ;;  %v4920_v2 = vld [vmem:[%s24641_s1 + $0x20] sm:$0xff] }
 0x1ab   :  { %18461 = vmatpush3.bf16.msra.mxu0 %v24910_v14  ;;  %16438 = vmatprep.mubr.f32.mxu0 %v3976_v34 }
 0x1ac   :  { %18463 = vmatprep.subr.bf16.mxu0 %v24913_v32 }
 0x1ae   :  { %16439 = vmatmul.mubr.f32.gmra.mrb[20].mxu0 %v3986_v5 }
 0x1af   :  { %18465 = vmatpush3.bf16.msra.mxu0 %v24913_v32  ;;  %16441 = vmatprep.mubr.f32.mxu0 %v3996_v39 }
 0x1b0   :  { %18467 = vmatprep.subr.bf16.mxu0 %v20793_v44 }
 0x1b2   :  { %16442 = vmatmul.mubr.f32.gmra.mrb[22].mxu0 %v4006_v20 }
 0x1b3   :  { %18469 = vmatpush3.bf16.msra.mxu0 %v20793_v44  ;;  %16476 = vmatprep.mubr.f32.mxu0 %v21715_v52  ;;  %v24958_v44 = vand.u32 4294901760, %v21722_v62 }
 0x1b4   :  { %18471 = vmatprep.subr.bf16.mxu0 %v20906_v47 }
 0x1b7   :  { %18473 = vmatpush3.bf16.msra.mxu0 %v20906_v47  ;;  %v24959_v47 = vand.u32 4294901760, %v21768_v24 }
 0x1b8   :  { %18475 = vmatprep.subr.bf16.mxu0 %v20970_v53 }
 0x1bb   :  { %18477 = vmatpush3.bf16.msra.mxu0 %v20970_v53  ;;  %v24960_v53 = vand.u32 4294901760, %v21774_v27 }
 0x1bc   :  { %18479 = vmatprep.subr.bf16.mxu0 %v20982_v51 }
 0x1bf   :  { %18481 = vmatpush3.bf16.msra.mxu0 %v20982_v51  ;;  %v24961_v51 = vand.u32 4294901760, %v21792_v12 }
 0x1c0   :  { %18483 = vmatprep.subr.bf16.mxu0 %v20988_v19 }
 0x1c3   :  { %18485 = vmatpush3.bf16.msra.mxu0 %v20988_v19  ;;  %v24962_v19 = vand.u32 4294901760, %v21800_v54 }
 0x1c4   :  { %18487 = vmatprep.subr.bf16.mxu0 %v20996_v16 }
 0x1c6   :  { %16477 = vmatmul.mubr.f32.vlgmr.msra.gmra.mrb[16].mxu0 %v21755_v57 }
 0x1c7   :  { %18489 = vmatpush3.bf16.msra.mxu0 %v20996_v16  ;;  %16479 = vmatprep.mubr.f32.mxu0 %v21758_v56  ;;  %v24963_v16 = vmov %v24956_v45  ;;  %v4926_v45 = vld [vmem:[%s24641_s1 + $0x50] sm:$0xff] }
 0x1c8   :  { %18491 = vmatprep.subr.bf16.mxu0 %v21004_v55 }
 0x1ca   :  { %16480 = vmatmul.mubr.f32.gmra.mrb[18].mxu0 %v21770_v13 }
 0x1cb   :  { %18493 = vmatpush3.bf16.msra.mxu0 %v21004_v55  ;;  %16482 = vmatprep.mubr.f32.mxu0 %v21776_v30  ;;  %v24964_v55 = vmov %v24957_v28  ;;  %v24968_v28 = vld [vmem:[#allocation16_spill] sm:$0xff] }
 0x1cc   :  { %18495 = vmatprep.subr.bf16.mxu0 %v21014_v26 }
 0x1ce   :  { %16483 = vmatmul.mubr.f32.gmra.mrb[20].mxu0 %v21794_v40 }
 0x1cf   :  { %18497 = vmatpush3.bf16.msra.mxu0 %v21014_v26  ;;  %16485 = vmatprep.mubr.f32.mxu0 %v21802_v15 }
 0x1d0   :  { %18499 = vmatprep.subr.bf16.mxu0 %v21026_v29 }
 0x1d2   :  { %16486 = vmatmul.mubr.f32.gmra.mrb[22].mxu0 %v21823_v46 }
 0x1d3   :  { %18501 = vmatpush3.bf16.msra.mxu0 %v21026_v29  ;;  %16520 = vmatprep.mubr.f32.mxu0 %v21722_v62 }
 0x1d4   :  { %18503 = vmatprep.subr.bf16.mxu0 %v21038_v41 }
 0x1d7   :  { %18505 = vmatpush3.bf16.msra.mxu0 %v21038_v41 }
 0x1d8   :  { %18507 = vmatprep.subr.bf16.mxu0 %v21050_v49 }
 0x1db   :  { %18509 = vmatpush3.bf16.msra.mxu0 %v21050_v49 }
 0x1dc   :  { %18511 = vmatprep.subr.bf16.mxu0 %v21060_v63 }
 0x1df   :  { %18513 = vmatpush3.bf16.msra.mxu0 %v21060_v63 }
 0x1e0   :  { %18515 = vmatprep.subr.bf16.mxu0 %v21068_v3 }
 0x1e3   :  { %18517 = vmatpush3.bf16.msra.mxu0 %v21068_v3 }
 0x1e4   :  { %18519 = vmatprep.subr.bf16.mxu0 %v20435_v10 }
 0x1e6   :  { %16521 = vmatmul.mubr.f32.vlgmr.msra.gmra.mrb[16].mxu0 %v21768_v24  ;;  %v24746_v24 = vmov 0.0|0.0  }
 0x1e7   :  { %18521 = vmatpush3.bf16.msra.mxu0 %v20435_v10  ;;  %16523 = vmatprep.mubr.f32.mxu0 %v21774_v27 }
 0x1e8   :  { %18523 = vmatprep.subr.bf16.mxu0 %v24868_v9  ;;  %18674 = vmatprep.subr.bf16.mxu1 %v24746_v24 }
 0x1ea   :  { %16524 = vmatmul.mubr.f32.gmra.mrb[18].mxu0 %v21792_v12  ;;  %v4922_v12 = vld [vmem:[%s24641_s1 + $0x30] sm:$0xff] }
 0x1eb   :  { %18525 = vmatpush3.bf16.msra.mxu0 %v24868_v9  ;;  %16526 = vmatprep.mubr.f32.mxu0 %v21800_v54  ;;  %v4986_v23 = vand.u32 4294901760, %v4922_v12 }
 0x1ec   :  { %18527 = vmatprep.subr.bf16.mxu0 %v24915_v37 }
 0x1ed   :  { %v22082_v59 = vsub.f32 %v4922_v12, %v4986_v23 }
 0x1ee   :  { %16527 = vmatmul.mubr.f32.gmra.mrb[20].mxu0 %v21821_v18  ;;  %v4925_v18 = vld [vmem:[%s24641_s1 + $0x48] sm:$0xff] }
 0x1ef   :  { %18529 = vmatpush3.bf16.msra.mxu0 %v24915_v37  ;;  %16529 = vmatprep.mubr.f32.mxu0 %v21831_v38 }
 0x1f0   :  { %18531 = vmatprep.subr.bf16.mxu0 %v24917_v36 }
 0x1f2   :  { %16530 = vmatmul.mubr.f32.gmra.mrb[22].mxu0 %v21847_v43  ;;  %v4995_v43 = vand.u32 4294901760, %v4925_v18 }
 0x1f3   :  { %18533 = vmatpush3.bf16.msra.mxu0 %v24917_v36  ;;  %16564 = vmatprep.mubr.f32.mxu0 %v24958_v44 }
 0x1f4   :  { %18535 = vmatprep.subr.bf16.mxu0 %v24918_v25  ;;  %v22106_v44 = vsub.f32 %v4925_v18, %v4995_v43 }
 0x1f7   :  { %18537 = vmatpush3.bf16.msra.mxu0 %v24918_v25 }
 0x1f8   :  { %18539 = vmatprep.subr.bf16.mxu0 %v24921_v35 }
 0x1fb   :  { %18541 = vmatpush3.bf16.msra.mxu0 %v24921_v35 }
 0x1fc   :  { %18543 = vmatprep.subr.bf16.mxu0 %v24922_v60 }
 0x1ff   :  { %18545 = vmatpush3.bf16.msra.mxu0 %v24922_v60 }
 0x200   :  { %18547 = vmatprep.subr.bf16.mxu0 %v24923_v21 }
 0x203   :  { %18549 = vmatpush3.bf16.msra.mxu0 %v24923_v21 }
 0x204   :  { %18551 = vmatprep.subr.bf16.mxu0 %v24924_v42 }
 0x206   :  { %16565 = vmatmul.mubr.f32.vlgmr.msra.gmra.mrb[16].mxu0 %v24959_v47  ;;  %v4998_v47 = vand.u32 4294901760, %v4926_v45 }
 0x207   :  { %18553 = vmatpush3.bf16.msra.mxu0 %v24924_v42  ;;  %16567 = vmatprep.mubr.f32.mxu0 %v24960_v53  ;;  %v24965_v42 = vld [vmem:[#allocation17_spill] sm:$0xff] }
 0x208   :  { %18555 = vmatprep.subr.bf16.mxu0 %v24927_v17 }
 0x20a   :  { %16568 = vmatmul.mubr.f32.gmra.mrb[18].mxu0 %v24961_v51  ;;  %v4928_v51 = vld [vmem:[%s24641_s1 + $0x60] sm:$0xff] }
 0x20b   :  { %18557 = vmatpush3.bf16.msra.mxu0 %v24927_v17  ;;  %16570 = vmatprep.mubr.f32.mxu0 %v24962_v19  ;;  %v4916_v17 = vld [vmem:[%s24641_s1] sm:$0xff]  ;;  %v4929_v19 = vld [vmem:[%s24641_s1 + $0x68] sm:$0xff] }
 0x20c   :  { %18559 = vmatprep.subr.bf16.mxu0 %v24932_v33 }
 0x20e   :  { %16571 = vmatmul.mubr.f32.gmra.mrb[20].mxu0 %v24963_v16 }
 0x20f   :  { %18561 = vmatpush3.bf16.msra.mxu0 %v24932_v33  ;;  %16573 = vmatprep.mubr.f32.mxu0 %v24964_v55  ;;  %v4917_v33 = vld [vmem:[%s24641_s1 + $0x8] sm:$0xff]  ;;  %v5004_v55 = vand.u32 4294901760, %v4928_v51 }
 0x210   :  { %18563 = vmatprep.subr.bf16.mxu0 %v24937_v7 }
 0x212   :  { %16574 = vmatmul.mubr.f32.gmra.mrb[22].mxu0 %v4004_v11  ;;  %v4927_v11 = vld [vmem:[%s24641_s1 + $0x58] sm:$0xff] }
 0x213   :  { %18565 = vmatpush3.bf16.msra.mxu0 %v24937_v7  ;;  %16608 = vmatprep.mubr.f32.mxu0 %v21715_v52  ;;  %v4968_v7 = vand.u32 4294901760, %v4916_v17  ;;  %v5001_v53 = vand.u32 4294901760, %v4927_v11 }
 0x214   :  { %18567 = vmatprep.subr.bf16.mxu0 %v24940_v31 }
 0x217   :  { %18569 = vmatpush3.bf16.msra.mxu0 %v24940_v31  ;;  %v4971_v31 = vand.u32 4294901760, %v4917_v33 }
 0x218   :  { %18571 = vmatprep.subr.bf16.mxu0 %v24941_v6 }
 0x21b   :  { %18573 = vmatpush3.bf16.msra.mxu0 %v24941_v6  ;;  %v22028_v6 = vsub.f32 %v4916_v17, %v4968_v7 }
 0x21c   :  { %18575 = vmatprep.subr.bf16.mxu0 %v24942_v48 }
 0x21f   :  { %18577 = vmatpush3.bf16.msra.mxu0 %v24942_v48  ;;  %v22030_v48 = vsub.f32 %v4917_v33, %v4971_v31  ;;  %v4932_v33 = vld [vmem:[%s24641_s1 + $0x80] sm:$0xff] }
 0x220   :  { %18579 = vmatprep.subr.bf16.mxu0 %v24943_v1 }
 0x221   :  { %v18675_v62 = vpack.c.bf16 %v22030_v48, %v22028_v6 }
 0x223   :  { %18581 = vmatpush3.bf16.msra.mxu0 %v24943_v1  ;;  %v4918_v1 = vld [vmem:[%s24641_s1 + $0x10] sm:$0xff]  ;;  %18676 = vmatpush1.bf16.msra.mxu1 %v18675_v62 }
 0x224   :  { %18583 = vmatprep.subr.bf16.mxu0 %v20435_v10  ;;  %18677 = vmatprep.subr.bf16.mxu1 %v24746_v24 }
 0x226   :  { %16609 = vmatmul.mubr.f32.vlgmr.msra.gmra.mrb[16].mxu0 %v21755_v57 }
 0x227   :  { %18585 = vmatpush3.bf16.msra.mxu0 %v20435_v10  ;;  %16611 = vmatprep.mubr.f32.mxu0 %v21758_v56 }
 0x228   :  { %18587 = vmatprep.subr.bf16.mxu0 %v24868_v9 }
 0x22a   :  { %16612 = vmatmul.mubr.f32.gmra.mrb[18].mxu0 %v21770_v13 }
 0x22b   :  { %18589 = vmatpush3.bf16.msra.mxu0 %v24868_v9  ;;  %16614 = vmatprep.mubr.f32.mxu0 %v21776_v30 }
 0x22c   :  { %18591 = vmatprep.subr.bf16.mxu0 %v24915_v37 }
 0x22e   :  { %16615 = vmatmul.mubr.f32.gmra.mrb[20].mxu0 %v21794_v40 }
 0x22f   :  { %18593 = vmatpush3.bf16.msra.mxu0 %v24915_v37  ;;  %16617 = vmatprep.mubr.f32.mxu0 %v21802_v15 }
 0x230   :  { %18595 = vmatprep.subr.bf16.mxu0 %v24917_v36 }
 0x232   :  { %16618 = vmatmul.mubr.f32.gmra.mrb[22].mxu0 %v21823_v46 }
 0x233   :  { %18597 = vmatpush3.bf16.msra.mxu0 %v24917_v36  ;;  %16652 = vmatprep.mubr.f32.mxu0 %v21715_v52  ;;  %v4919_v52 = vld [vmem:[%s24641_s1 + $0x18] sm:$0xff] }
 0x234   :  { %18599 = vmatprep.subr.bf16.mxu0 %v24918_v25 }
 0x237   :  { %18601 = vmatpush3.bf16.msra.mxu0 %v24918_v25 }
 0x238   :  { %18603 = vmatprep.subr.bf16.mxu0 %v24921_v35 }
 0x23b   :  { %18605 = vmatpush3.bf16.msra.mxu0 %v24921_v35 }
 0x23c   :  { %18607 = vmatprep.subr.bf16.mxu0 %v24922_v60 }
 0x23f   :  { %18609 = vmatpush3.bf16.msra.mxu0 %v24922_v60 }
 0x240   :  { %18611 = vmatprep.subr.bf16.mxu0 %v24923_v21 }
 0x243   :  { %18613 = vmatpush3.bf16.msra.mxu0 %v24923_v21 }
 0x244   :  { %18614 = vmatprep.subr.bf16.mxu0 %v24746_v24 }
 0x246   :  { %16653 = vmatmul.mubr.f32.vlgmr.msra.gmra.mrb[16].mxu0 %v21755_v57  ;;  %v4974_v57 = vand.u32 4294901760, %v4918_v1 }
 0x247   :  { %16655 = vmatprep.mubr.f32.mxu0 %v21758_v56  ;;  %v4977_v56 = vand.u32 4294901760, %v4919_v52 }
 0x249   :  { %v22046_v27 = vsub.f32 %v4919_v52, %v4977_v56 }
 0x24a   :  { %16656 = vmatmul.mubr.f32.gmra.mrb[18].mxu0 %v21770_v13  ;;  %v22044_v13 = vsub.f32 %v4918_v1, %v4974_v57 }
 0x24b   :  { %16658 = vmatprep.mubr.f32.mxu0 %v21776_v30  ;;  %v22048_v30 = vpack.c.bf16 %v4971_v31, %v4968_v7  ;;  %v4933_v7 = vld [vmem:[%s24641_s1 + $0x88] sm:$0xff]  ;;  %v5016_v31 = vand.u32 4294901760, %v4932_v33 }
 0x24c   :  { %v18678_v4 = vpack.c.bf16 %v22046_v27, %v22044_v13  ;;  %v5019_v1 = vand.u32 4294901760, %v4933_v7 }
 0x24d   :  { %24966 = vst [vmem:[#allocation5_spill] sm:$0xff] %v22048_v30  ;;  %18616 = vmatpush1.bf16.msra.mxu0 %v22048_v30  ;;  %v22173_v52 = vsub.f32 %v4932_v33, %v5016_v31 }
 0x24e   :  { %16659 = vmatmul.mubr.f32.gmra.mrb[20].mxu0 %v21794_v40  ;;  %v4980_v40 = vand.u32 4294901760, %v4920_v2  ;;  %18617 = vmatprep.subr.bf16.mxu0 %v24746_v24  ;;  %v22175_v62 = vsub.f32 %v4933_v7, %v5019_v1 }
 0x24f   :  { %16661 = vmatprep.mubr.f32.mxu0 %v21802_v15  ;;  %v4923_v15 = vld [vmem:[%s24641_s1 + $0x38] sm:$0xff]  ;;  %18679 = vmatpush1.bf16.msra.mxu1 %v18678_v4  ;;  %v5175_v4 = vand.u32 4294901760, %v22028_v6 }
 0x250   :  { %v4989_v5 = vand.u32 4294901760, %v4923_v15  ;;  %18680 = vmatprep.subr.bf16.mxu1 %v24746_v24 }
 0x252   :  { %16662 = vmatmul.mubr.f32.gmra.mrb[22].mxu0 %v21823_v46  ;;  %v22077_v46 = vsub.f32 %v4920_v2, %v4980_v40  ;;  %v22084_v34 = vsub.f32 %v4923_v15, %v4989_v5  ;;  %v22120_v16 = vpack.c.bf16 %v4989_v5, %v4986_v23  ;;  %v18699_v2 = vpack.c.bf16 %v22175_v62, %v22173_v52 }
 0x253   :  { %v5182_v5 = vand.u32 4294901760, %v22030_v48 }
 0x254   :  { %v18684_v20 = vpack.c.bf16 %v22084_v34, %v22082_v59 }
 0x259   :  { %v16126_v10 = vpop.f32.mrb[8].mxu0  ;;  %v16390_v26 = vpop.f32.mrb[8].mxu1 }
 0x25a   :  { %4867 = vrot.lane.b32.xlu1 %v16390_v26, %s20375_s3  ;;  %v3796_v29 = vpop.f32.mrb[9].mxu1  ;;  %4835 = vrot.lane.b32.xlu0 %v16126_v10, %s20376_s11  ;;  %v2845_v41 = vpop.f32.mrb[9].mxu0  ;;  %v22125_v26 = vsub.f32 %v4926_v45, %v4998_v47  ;;  %v5189_v45 = vand.u32 4294901760, %v22044_v13 }
 0x25d   :  { %v16129_v49 = vpop.f32.mrb[10].mxu0  ;;  %v16393_v63 = vpop.f32.mrb[10].mxu1 }
 0x25e   :  { %4865 = vrot.lane.b32.xlu1 %v3796_v29, %s20375_s3  ;;  %v3808_v3 = vpop.f32.mrb[11].mxu1  ;;  %4833 = vrot.lane.b32.xlu0 %v2845_v41, %s20376_s11  ;;  %v2857_v9 = vpop.f32.mrb[11].mxu0  ;;  %v22127_v29 = vsub.f32 %v4927_v11, %v5001_v53  ;;  %v5007_v41 = vand.u32 4294901760, %v4929_v19  ;;  %v5196_v11 = vand.u32 4294901760, %v22046_v27 }
 0x261   :  { %v16132_v14 = vpop.f32.mrb[12].mxu0  ;;  %v16396_v32 = vpop.f32.mrb[12].mxu1 }
 0x262   :  { %4807 = vrot.lane.b32.xlu1 %v21810_v0, %s20374_s8  ;;  %v3820_v37 = vpop.f32.mrb[13].mxu1  ;;  %4805 = vrot.lane.b32.xlu0 %v21814_v22, %s20374_s8  ;;  %v2869_v36 = vpop.f32.mrb[13].mxu0  ;;  %v4924_v0 = vld [vmem:[%s24641_s1 + $0x40] sm:$0xff]  ;;  %v22072_v22 = vpack.c.bf16 %v4977_v56, %v4974_v57  ;;  %v4934_v57 = vld [vmem:[%s24641_s1 + $0x90] sm:$0xff] }
 0x263   :  { %v4992_v38 = vand.u32 4294901760, %v4924_v0  ;;  %v4935_v56 = vld [vmem:[%s24641_s1 + $0x98] sm:$0xff] }
 0x264   :  { %24967 = vst [vmem:[#allocation3_spill] sm:$0xff] %v22072_v22  ;;  %18619 = vmatpush1.bf16.msra.mxu0 %v22072_v22  ;;  %v5025_v12 = vand.u32 4294901760, %v4935_v56 }
 0x265   :  { %v22008_v25 = vpop.f32.mrb[14].mxu0  ;;  %v22010_v35 = vpop.f32.mrb[14].mxu1  ;;  %18620 = vmatprep.subr.bf16.mxu0 %v24746_v24  ;;  %v22102_v39 = vsub.f32 %v4924_v0, %v4992_v38  ;;  %v22197_v0 = vpack.c.bf16 %v5019_v1, %v5016_v31 }
 0x266   :  { %4871 = vrot.lane.b32.xlu1 %v16393_v63, %s20375_s3  ;;  %v3832_v60 = vpop.f32.mrb[15].mxu1  ;;  %4809 = vrot.lane.b32.xlu0 %v21840_v61, %s20374_s8  ;;  %v2881_v21 = vpop.f32.mrb[15].mxu0  ;;  %v4921_v61 = vld [vmem:[%s24641_s1 + $0x28] sm:$0xff]  ;;  %v4931_v63 = vld [vmem:[%s24641_s1 + $0x78] sm:$0xff]  ;;  %v22190_v15 = vsub.f32 %v4935_v56, %v5025_v12 }
 0x267   :  { %v4983_v54 = vand.u32 4294901760, %v4921_v61  ;;  %v18687_v10 = vpack.c.bf16 %v22106_v44, %v22102_v39 }
 0x269   :  { %v22099_v58 = vpack.c.bf16 %v4983_v54, %v4980_v40 }
 0x26a   :  { %4839 = vrot.lane.b32.xlu0 %v16129_v49, %s20376_s11  ;;  %4837 = vrot.lane.b32.xlu1 %v2857_v9, %s20376_s11  ;;  %v4930_v49 = vld [vmem:[%s24641_s1 + $0x70] sm:$0xff]  ;;  %v22140_v9 = vsub.f32 %v4928_v51, %v5004_v55 }
 0x26b   :  { %18622 = vmatpush1.bf16.msra.mxu0 %v22099_v58 }
 0x26c   :  { %18623 = vmatprep.subr.bf16.mxu0 %v24746_v24 }
 0x26e   :  { %4869 = vrot.lane.b32.xlu0 %v3808_v3, %s20375_s3  ;;  %4811 = vrot.lane.b32.xlu1 %v24965_v42, %s20374_s8  ;;  %v22137_v3 = vpack.c.bf16 %v4995_v43, %v4992_v38  ;;  %v22159_v42 = vpack.c.bf16 %v5007_v41, %v5004_v55  ;;  %v5176_v38 = vsub.f32 %v22028_v6, %v5175_v4  ;;  %v5203_v55 = vand.u32 4294901760, %v22077_v46 }
 0x26f   :  { %18625 = vmatpush1.bf16.msra.mxu0 %v22120_v16  ;;  %v5183_v43 = vsub.f32 %v22030_v48, %v5182_v5 }
 0x270   :  { %18626 = vmatprep.subr.bf16.mxu0 %v24746_v24 }
 0x272   :  { %4843 = vrot.lane.b32.xlu0 %v16132_v14, %s20376_s11  ;;  %4841 = vrot.lane.b32.xlu1 %v2869_v36, %s20376_s11  ;;  %v18690_v14 = vpack.c.bf16 %v22127_v29, %v22125_v26  ;;  %v5013_v36 = vand.u32 4294901760, %v4931_v63 }
 0x273   :  { %18628 = vmatpush1.bf16.msra.mxu0 %v22137_v3 }
 0x274   :  { %18629 = vmatprep.subr.bf16.mxu0 %v24746_v24 }
 0x276   :  { %4873 = vrot.lane.b32.xlu0 %v3820_v37, %s20375_s3  ;;  %4875 = vrot.lane.b32.xlu1 %v16396_v32, %s20375_s3  ;;  %v22144_v32 = vsub.f32 %v4929_v19, %v5007_v41  ;;  %v5010_v37 = vand.u32 4294901760, %v4930_v49 }
 0x278   :  { %v22186_v40 = vpack.c.bf16 %v5013_v36, %v5010_v37 }
 0x27a   :  { %4813 = vrot.lane.b32.xlu0 %v21861_v50, %s20374_s8  ;;  %4845 = vrot.lane.b32.xlu1 %v2881_v21, %s20376_s11  ;;  %v22079_v50 = vsub.f32 %v4921_v61, %v4983_v54  ;;  %v22155_v21 = vsub.f32 %v4931_v63, %v5013_v36  ;;  %v5022_v61 = vand.u32 4294901760, %v4934_v57  ;;  %v5217_v36 = vand.u32 4294901760, %v22082_v59 }
 0x27c   :  { %v18681_v8 = vpack.c.bf16 %v22079_v50, %v22077_v46  ;;  %v22188_v54 = vsub.f32 %v4934_v57, %v5022_v61  ;;  %v22204_v18 = vpack.c.bf16 %v5025_v12, %v5022_v61  ;;  %v5218_v33 = vsub.f32 %v22082_v59, %v5217_v36 }
 0x27d   :  { %v5231_v57 = vand.u32 4294901760, %v22102_v39  ;;  %v5252_v59 = vand.u32 4294901760, %v22127_v29 }
 0x27e   :  { %4877 = vrot.lane.b32.xlu0 %v3832_v60, %s20375_s3  ;;  %4815 = vrot.lane.b32.xlu1 %v24968_v28, %s20374_s8  ;;  %v22153_v60 = vsub.f32 %v4930_v49, %v5010_v37  ;;  %v18702_v23 = vpack.c.bf16 %v22190_v15, %v22188_v54  ;;  %v5177_v28 = vand.u32 4294901760, %v5176_v38  ;;  %v5204_v49 = vsub.f32 %v22077_v46, %v5203_v55 }
 0x27f   :  { %18682 = vmatpush1.bf16.msra.mxu1 %v18681_v8  ;;  %v5184_v8 = vand.u32 4294901760, %v5183_v43  ;;  %v5219_v31 = vand.u32 4294901760, %v5218_v33  ;;  %v5238_v46 = vand.u32 4294901760, %v22106_v44  ;;  %v5253_v43 = vsub.f32 %v22127_v29, %v5252_v59 }
 0x280   :  { %18683 = vmatprep.subr.bf16.mxu1 %v24746_v24  ;;  %v18696_v17 = vpack.c.bf16 %v22155_v21, %v22153_v60 }
 0x282   :  { %4847 = vrot.lane.b32.xlu0 %v22008_v25, %s20376_s11  ;;  %4879 = vrot.lane.b32.xlu1 %v22010_v35, %s20375_s3  ;;  %v22148_v25 = vpack.c.bf16 %v5001_v53, %v4998_v47  ;;  %v18693_v35 = vpack.c.bf16 %v22144_v32, %v22140_v9  ;;  %v5190_v47 = vsub.f32 %v22044_v13, %v5189_v45  ;;  %v4804_v13 = vpop.permute.xlu1 %4803 }
 0x283   :  { %18685 = vmatpush1.bf16.msra.mxu1 %v18684_v20  ;;  %v22216_v20 = vpack.c.bf16 %v5184_v8, %v5177_v28  ;;  %v5197_v53 = vsub.f32 %v22046_v27, %v5196_v11  ;;  %v5254_v8 = vand.u32 4294901760, %v5253_v43 }
 0x284   :  { %18686 = vmatprep.subr.bf16.mxu1 %v24746_v24  ;;  %18631 = vmatpush1.bf16.msra.mxu0 %v22148_v25  ;;  %v5191_v51 = vand.u32 4294901760, %v5190_v47  ;;  %v5259_v47 = vand.u32 4294901760, %v22140_v9 }
 0x285   :  { %18632 = vmatprep.subr.bf16.mxu0 %v24746_v24  ;;  %v5198_v19 = vand.u32 4294901760, %v5197_v53 }
 0x287   :  { %18688 = vmatpush1.bf16.msra.mxu1 %v18687_v10  ;;  %v5210_v10 = vand.u32 4294901760, %v22079_v50  ;;  %v22226_v41 = vpack.c.bf16 %v5198_v19, %v5191_v51 }
 0x288   :  { %18689 = vmatprep.subr.bf16.mxu1 %v24746_v24  ;;  %18634 = vmatpush1.bf16.msra.mxu0 %v22159_v42 }
 0x289   :  { %18635 = vmatprep.subr.bf16.mxu0 %v24746_v24  ;;  %v5211_v63 = vsub.f32 %v22079_v50, %v5210_v10  ;;  %v5232_v50 = vsub.f32 %v22102_v39, %v5231_v57  ;;  %v5266_v39 = vand.u32 4294901760, %v22144_v32 }
 0x28b   :  { %18691 = vmatpush1.bf16.msra.mxu1 %v18690_v14  ;;  %v5205_v14 = vand.u32 4294901760, %v5204_v49  ;;  %v5212_v37 = vand.u32 4294901760, %v5211_v63  ;;  %v5233_v61 = vand.u32 4294901760, %v5232_v50  ;;  %v5267_v51 = vsub.f32 %v22144_v32, %v5266_v39 }
 0x28c   :  { %18692 = vmatprep.subr.bf16.mxu1 %v24746_v24  ;;  %18637 = vmatpush1.bf16.msra.mxu0 %v22186_v40  ;;  %v5273_v63 = vand.u32 4294901760, %v22153_v60  ;;  %v22294_v48 = vpack.c.bf16 %v5266_v39, %v5259_v47  ;;  %v24975_v39 = vld [vmem:[#allocation10_spill] sm:$0xff] }
 0x28d   :  { %18638 = vmatprep.subr.bf16.mxu0 %v24746_v24  ;;  %v5268_v49 = vand.u32 4294901760, %v5267_v51  ;;  %v22286_v51 = vpack.c.bf16 %v5210_v10, %v5203_v55 }
 0x28e   :  { %v5274_v29 = vsub.f32 %v22153_v60, %v5273_v63  ;;  %v5308_v60 = vand.u32 4294901760, %v22190_v15  ;;  %24971 = vst [vmem:[#allocation6_spill] sm:$0xff] %v22294_v48 }
 0x28f   :  { %18694 = vmatpush1.bf16.msra.mxu1 %v18693_v35  ;;  %v5224_v35 = vand.u32 4294901760, %v22084_v34 }
 0x290   :  { %18695 = vmatprep.subr.bf16.mxu1 %v24746_v24  ;;  %18640 = vmatpush1.bf16.msra.mxu0 %v22197_v0  ;;  %v5275_v33 = vand.u32 4294901760, %v5274_v29  ;;  %v5309_v43 = vsub.f32 %v22190_v15, %v5308_v60  ;;  %v22290_v15 = vpack.c.bf16 %v5238_v46, %v5231_v57 }
 0x291   :  { %18641 = vmatprep.subr.bf16.mxu0 %v24746_v24  ;;  %v5225_v7 = vsub.f32 %v22084_v34, %v5224_v35 }
 0x292   :  { %24969 = vst [vmem:[#allocation2_spill] sm:$0xff] %v22290_v15 }
 0x293   :  { %18697 = vmatpush1.bf16.msra.mxu1 %v18696_v17  ;;  %v22232_v17 = vpack.c.bf16 %v5212_v37, %v5205_v14  ;;  %v5226_v1 = vand.u32 4294901760, %v5225_v7 }
 0x294   :  { %18698 = vmatprep.subr.bf16.mxu1 %v24746_v24  ;;  %18643 = vmatpush1.bf16.msra.mxu0 %v22204_v18 }
 0x295   :  { %18644 = vmatprep.subr.bf16.mxu0 %v24746_v24  ;;  %v22238_v56 = vpack.c.bf16 %v5226_v1, %v5219_v31  ;;  %v5287_v31 = vand.u32 4294901760, %v22173_v52 }
 0x297   :  { %18700 = vmatpush1.bf16.msra.mxu1 %v18699_v2  ;;  %v5239_v2 = vsub.f32 %v22106_v44, %v5238_v46  ;;  %v5260_v44 = vsub.f32 %v22140_v9, %v5259_v47  ;;  %v5294_v9 = vand.u32 4294901760, %v22175_v62  ;;  %v5288_v32 = vsub.f32 %v22173_v52, %v5287_v31 }
 0x298   :  { %18701 = vmatprep.subr.bf16.mxu1 %v24746_v24 }
 0x299   :  { %v5240_v12 = vand.u32 4294901760, %v5239_v2  ;;  %v5261_v19 = vand.u32 4294901760, %v5260_v44  ;;  %v5295_v50 = vsub.f32 %v22175_v62, %v5294_v9  ;;  %v5289_v2 = vand.u32 4294901760, %v5288_v32 }
 0x29a   :  { %v5310_v62 = vand.u32 4294901760, %v5309_v43  ;;  %v22284_v44 = vpack.c.bf16 %v5196_v11, %v5189_v45 }
 0x29b   :  { %18703 = vmatpush1.bf16.msra.mxu1 %v18702_v23  ;;  %v5245_v23 = vand.u32 4294901760, %v22125_v26  ;;  %v22244_v38 = vpack.c.bf16 %v5240_v12, %v5233_v61  ;;  %v22256_v14 = vpack.c.bf16 %v5268_v49, %v5261_v19  ;;  %v5296_v61 = vand.u32 4294901760, %v5295_v50 }
 0x29c   :  { %18704 = vmatprep.subr.bf16.mxu1 %v24746_v24  ;;  %v5301_v12 = vand.u32 4294901760, %v22188_v54  ;;  %v22298_v19 = vpack.c.bf16 %v5294_v9, %v5287_v31 }
 0x29d   :  { %v5246_v34 = vsub.f32 %v22125_v26, %v5245_v23  ;;  %v5280_v26 = vand.u32 4294901760, %v22155_v21  ;;  %v22292_v6 = vpack.c.bf16 %v5252_v59, %v5245_v23 }
 0x29e   :  { %24973 = vst [vmem:[#allocation8_spill] sm:$0xff] %v22298_v19  ;;  %v22300_v27 = vpack.c.bf16 %v5308_v60, %v5301_v12 }
 0x29f   :  { %v5247_v28 = vand.u32 4294901760, %v5246_v34  ;;  %v5281_v37 = vsub.f32 %v22155_v21, %v5280_v26  ;;  %v22268_v34 = vpack.c.bf16 %v5296_v61, %v5289_v2  ;;  %v5302_v21 = vsub.f32 %v22188_v54, %v5301_v12  ;;  %24970 = vst [vmem:[#allocation4_spill] sm:$0xff] %v22292_v6  ;;  %v24977_v12 = vld [vmem:[#allocation14_spill] sm:$0xff] }
 0x2a0   :  { %v22288_v54 = vpack.c.bf16 %v5224_v35, %v5217_v36  ;;  %24974 = vst [vmem:[#allocation9_spill] sm:$0xff] %v22300_v27 }
 0x2a1   :  { %v22250_v53 = vpack.c.bf16 %v5254_v8, %v5247_v28  ;;  %v5282_v7 = vand.u32 4294901760, %v5281_v37  ;;  %v22276_v28 = vpack.c.bf16 %v5182_v5, %v5175_v4  ;;  %v5303_v52 = vand.u32 4294901760, %v5302_v21  ;;  %v4802_v5 = vpop.permute.xlu0 %4801  ;;  %v24978_v21 = vld [vmem:[#allocation13_spill] sm:$0xff] }
 0x2a2   :  { %v22296_v4 = vpack.c.bf16 %v5280_v26, %v5273_v63  ;;  %v4891_v63 = vsel %vm4889_vm0, %v24975_v39, %v4804_v13  ;;  %v24976_v26 = vld [vmem:[#allocation12_spill] sm:$0xff] }
 0x2a3   :  { %v22262_v1 = vpack.c.bf16 %v5282_v7, %v5275_v33  ;;  %v22278_v8 = vpack.c.bf16 %v5310_v62, %v5303_v52  ;;  %v4890_v29 = vsel %vm4889_vm0, %v24976_v26, %v4802_v5 }
 0x2a4   :  { %24972 = vst [vmem:[#allocation7_spill] sm:$0xff] %v22296_v4 }
 0x2cc   :  { %v4836_v49 = vpop.permute.xlu0 %4835  ;;  %v4868_v45 = vpop.permute.xlu1 %4867 }
 0x2cd   :  { %v4900_v37 = vsel %vm4898_vm1, %v4891_v63, %v4836_v49 }
 0x2ce   :  { %v4909_v31 = vsel %vm4907_vm2, %v4900_v37, %v4868_v45 }
 0x2cf   :  { %v22310_v50 = vand.u32 4294901760, %v4909_v31 }
 0x2d0   :  { %v4834_v11 = vpop.permute.xlu0 %4833  ;;  %v4866_v55 = vpop.permute.xlu1 %4865 }
 0x2d1   :  { %v4899_v7 = vsel %vm4898_vm1, %v4890_v29, %v4834_v11  ;;  %v22322_v49 = vsub.f32 %v4909_v31, %v22310_v50  ;;  %v24979_v31 = vld [vmem:[#allocation19_spill] sm:$0xff] }
 0x2d2   :  { %v4908_v9 = vsel %vm4907_vm2, %v4899_v7, %v4866_v55 }
 0x2d3   :  { %v22312_v61 = vand.u32 4294901760, %v4908_v9  ;;  %v24748_v26 = vand.u32 4294901760, %v22322_v49 }
 0x2d4   :  { %v4806_v10 = vpop.permute.xlu0 %4805  ;;  %v4808_v36 = vpop.permute.xlu1 %4807 }
 0x2d5   :  { %v4892_v60 = vsel %vm4889_vm0, %v24977_v12, %v4806_v10  ;;  %v4893_v43 = vsel %vm4889_vm0, %v24978_v21, %v4808_v36  ;;  %v22325_v45 = vsub.f32 %v4908_v9, %v22312_v61 }
 0x2d7   :  { %v24749_v29 = vand.u32 4294901760, %v22325_v45 }
 0x2d8   :  { %v4810_v35 = vpop.permute.xlu0 %4809  ;;  %v4872_v57 = vpop.permute.xlu1 %4871 }
 0x2d9   :  { %v4894_v9 = vsel %vm4889_vm0, %v24979_v31, %v4810_v35 }
 0x2dc   :  { %v4840_v46 = vpop.permute.xlu0 %4839  ;;  %v4838_v23 = vpop.permute.xlu1 %4837 }
 0x2dd   :  { %v4901_v52 = vsel %vm4898_vm1, %v4892_v60, %v4838_v23  ;;  %v4902_v62 = vsel %vm4898_vm1, %v4893_v43, %v4840_v46 }
 0x2de   :  { %v4911_v36 = vsel %vm4907_vm2, %v4902_v62, %v4872_v57 }
 0x2df   :  { %v22343_v57 = vand.u32 4294901760, %v4911_v36 }
 0x2e0   :  { %v4870_v59 = vpop.permute.xlu0 %4869  ;;  %v4812_v47 = vpop.permute.xlu1 %4811 }
 0x2e1   :  { %v4910_v5 = vsel %vm4907_vm2, %v4901_v52, %v4870_v59  ;;  %24980 = vst [vmem:[#allocation21_spill] sm:$0xff] %v22343_v57 }
 0x2e2   :  { %v22329_v63 = vand.u32 4294901760, %v4910_v5 }
 0x2e4   :  { %v4844_v33 = vpop.permute.xlu0 %4843  ;;  %v4842_v32 = vpop.permute.xlu1 %4841  ;;  %v22350_v52 = vsub.f32 %v4910_v5, %v22329_v63  ;;  %v22364_v5 = vsub.f32 %v22322_v49, %v24748_v26 }
 0x2e5   :  { %v4903_v35 = vsel %vm4898_vm1, %v4894_v9, %v4842_v32 }
 0x2e8   :  { %v4874_v2 = vpop.permute.xlu0 %4873  ;;  %v4876_v13 = vpop.permute.xlu1 %4875 }
 0x2e9   :  { %v4912_v32 = vsel %vm4907_vm2, %v4903_v35, %v4874_v2 }
 0x2ea   :  { %v22395_v19 = vand.u32 4294901760, %v4912_v32 }
 0x2ec   :  { %v4814_v55 = vpop.permute.xlu0 %4813  ;;  %v4846_v12 = vpop.permute.xlu1 %4845 }
 0x2f0   :  { %v4816_v4 = vpop.permute.xlu1 %4815 }
 0x319   :  { %v16654_v11 = vpop.f32.mrb[16].mxu0 }
 0x31a   :  { %v4947_v10 = vsel %vm4889_vm0, %v16654_v11, 0  ;;  %v4747_v39 = vpop.f32.mrb[17].mxu0 }
 0x31b   :  { %v22331_v23 = vand.u32 4294901760, %v4947_v10  ;;  %v4944_v46 = vsel %vm4889_vm0, %v4747_v39, 0  ;;  %v4878_v39 = vpop.permute.xlu0 %4877 }
 0x31c   :  { %v22334_v59 = vand.u32 4294901760, %v4944_v46 }
 0x31d   :  { %v22339_v37 = vsub.f32 %v4947_v10, %v22331_v23  ;;  %v16657_v7 = vpop.f32.mrb[18].mxu0 }
 0x31e   :  { %v22346_v60 = vsub.f32 %v4944_v46, %v22334_v59  ;;  %v4953_v21 = vsel %vm4889_vm0, %v16657_v7, 0  ;;  %v4759_v43 = vpop.f32.mrb[19].mxu0  ;;  %v5060_v46 = vsub.f32 %v22325_v45, %v24749_v29  ;;  %v24982_v7 = vld [vmem:[#allocation15_spill] sm:$0xff]  ;;  %v24985_v29 = vmov 0.0|0.0  }
 0x31f   :  { %v22353_v11 = vand.u32 4294901760, %v4953_v21  ;;  %v4950_v10 = vsel %vm4889_vm0, %v4759_v43, 0  ;;  %v4895_v43 = vsel %vm4889_vm0, %v24982_v7, %v4812_v47 }
 0x320   :  { %v22358_v24 = vand.u32 4294901760, %v4950_v10  ;;  %5499 = vmatprep.mubr.f32.mxu1 %v22346_v60  ;;  %v24983_v47 = vand.u32 4294901760, %v22346_v60  ;;  %v4904_v7 = vsel %vm4898_vm1, %v4895_v43, %v4844_v33  ;;  %v24986_v43 = vld [vmem:[#allocation18_spill] sm:$0xff] }
 0x321   :  { %24981 = vst [vmem:[#allocation22_spill] sm:$0xff] %v22353_v11  ;;  %v22373_v9 = vsub.f32 %v4953_v21, %v22353_v11  ;;  %v16660_v62 = vpop.f32.mrb[20].mxu0  ;;  %5502 = vmatmul.mubr.f32.vlgmr.msra.gmra.mrb[16].mxu1 %v22325_v45  ;;  %v24984_v21 = vand.u32 4294901760, %v22339_v37  ;;  %v4913_v33 = vsel %vm4907_vm2, %v4904_v7, %v4876_v13  ;;  %v24987_v7 = vand.u32 4294901760, %v22350_v52 }
 0x322   :  { %v22377_v31 = vsub.f32 %v4950_v10, %v22358_v24  ;;  %v4959_v26 = vsel %vm4889_vm0, %v16660_v62, 0  ;;  %18706 = vmatpush1.bf16.msra.mxu1 %v22048_v30  ;;  %v4771_v27 = vpop.f32.mrb[21].mxu0  ;;  %5508 = vmatprep.mubr.f32.mxu1 %v22339_v37  ;;  %v5054_v2 = vsub.f32 %v22346_v60, %v24983_v47  ;;  %v22392_v62 = vsub.f32 %v4911_v36, %v22343_v57  ;;  %v4848_v30 = vpop.permute.xlu0 %4847 }
 0x323   :  { %v5069_v35 = vsub.f32 %v22339_v37, %v24984_v21  ;;  %v4956_v10 = vsel %vm4889_vm0, %v4771_v27, 0  ;;  %18707 = vmatprep.subr.bf16.mxu1 %v24985_v29  ;;  %v5061_v21 = vand.u32 4294901760, %v5060_v46  ;;  %v4896_v27 = vsel %vm4889_vm0, %v24986_v43, %v4814_v55 }
 0x324   :  { %v24756_v47 = vand.u32 4294901760, %v22377_v31  ;;  %v22398_v48 = vand.u32 4294901760, %v4956_v10  ;;  %v5055_v6 = vand.u32 4294901760, %v5054_v2  ;;  %v22403_v15 = vand.u32 4294901760, %v4959_v26 }
 0x325   :  { %v16663_v36 = vpop.f32.mrb[22].mxu0  ;;  %5511 = vmatmul.mubr.f32.gmra.mrb[18].mxu1 %v22322_v49  ;;  %v5070_v46 = vand.u32 4294901760, %v5069_v35  ;;  %v5090_v43 = vsub.f32 %v22350_v52, %v24987_v7  ;;  %v22421_v57 = vsub.f32 %v4912_v32, %v22395_v19  ;;  %v4905_v35 = vsel %vm4898_vm1, %v4896_v27, %v4846_v12  ;;  %v4880_v12 = vpop.permute.xlu1 %4879 }
 0x326   :  { %v22408_v11 = vsub.f32 %v4956_v10, %v22398_v48  ;;  %18709 = vmatpush1.bf16.msra.mxu1 %v22072_v22  ;;  %v4783_v2 = vpop.f32.mrb[23].mxu0  ;;  %5056 = vmatprep.mubr.f32.mxu0 %v5055_v6  ;;  %v5084_v13 = vsub.f32 %v22377_v31, %v24756_v47  ;;  %v5104_v10 = vand.u32 4294901760, %v22392_v62  ;;  %v22423_v6 = vand.u32 4294901760, %v4913_v33  ;;  %v24988_v22 = vld [vmem:[#allocation20_spill] sm:$0xff] }
 0x327   :  { %v4962_v55 = vsel %vm4889_vm0, %v4783_v2, 0  ;;  %5517 = vmatprep.mubr.f32.mxu1 %v22377_v31  ;;  %5062 = vmatmul.mubr.f32.vlgmr.msra.gmra.mrb[24].mxu0 %v5061_v21  ;;  %v4897_v47 = vsel %vm4889_vm0, %v24988_v22, %v4816_v4  ;;  %v4914_v21 = vsel %vm4907_vm2, %v4905_v35, %v4878_v39  ;;  %v22432_v7 = vsub.f32 %v4959_v26, %v22403_v15 }
 0x328   :  { %18646 = vmatpush1.bf16.msra.mxu0 %v22216_v20  ;;  %5071 = vmatprep.mubr.f32.mxu0 %v5070_v46  ;;  %v4906_v2 = vsel %vm4898_vm1, %v4897_v47, %v4848_v30  ;;  %v5076_v32 = vand.u32 4294901760, %v22364_v5  ;;  %v5113_v27 = vand.u32 4294901760, %v22408_v11  ;;  %v22438_v22 = vand.u32 4294901760, %v4962_v55 }
 0x329   :  { %18710 = vmatprep.subr.bf16.mxu1 %v24985_v29  ;;  %5520 = vmatmul.mubr.f32.gmra.mrb[20].mxu1 %v22350_v52  ;;  %v5085_v20 = vand.u32 4294901760, %v5084_v13  ;;  %v24989_v30 = vand.u32 4294901760, %v22373_v9  ;;  %v4965_v26 = vsel %vm4889_vm0, %v16663_v36, 0  ;;  %v22448_v39 = vsub.f32 %v4913_v33, %v22423_v6 }
 0x32a   :  { %18712 = vmatpush1.bf16.msra.mxu1 %v22099_v58  ;;  %18647 = vmatprep.subr.bf16.mxu0 %v24985_v29  ;;  %v5091_v5 = vand.u32 4294901760, %v5090_v43  ;;  %v5105_v47 = vsub.f32 %v22392_v62, %v5104_v10  ;;  %v22454_v46 = vand.u32 4294901760, %v4914_v21  ;;  %v4915_v13 = vsel %vm4907_vm2, %v4906_v2, %v4880_v12 }
 0x32b   :  { %v5099_v4 = vsub.f32 %v22373_v9, %v24989_v30  ;;  %5526 = vmatprep.mubr.f32.mxu1 %v22373_v9  ;;  %5077 = vmatmul.mubr.f32.gmra.mrb[26].mxu0 %v5076_v32  ;;  %v24757_v36 = vand.u32 4294901760, %v22432_v7  ;;  %v5119_v33 = vand.u32 4294901760, %v22421_v57  ;;  %v22461_v35 = vand.u32 4294901760, %v4965_v26 }
 0x32c   :  { %18649 = vmatpush1.bf16.msra.mxu0 %v22226_v41  ;;  %5086 = vmatprep.mubr.f32.mxu0 %v5085_v20  ;;  %v22464_v41 = vsub.f32 %v4962_v55, %v22438_v22  ;;  %v5114_v2 = vsub.f32 %v22408_v11, %v5113_v27  ;;  %v5106_v32 = vand.u32 4294901760, %v5105_v47  ;;  %v22474_v12 = vsub.f32 %v4914_v21, %v22454_v46 }
 0x32d   :  { %18713 = vmatprep.subr.bf16.mxu1 %v24985_v29  ;;  %5529 = vmatmul.mubr.f32.gmra.mrb[22].mxu1 %v22392_v62  ;;  %v5100_v43 = vand.u32 4294901760, %v5099_v4  ;;  %v22476_v55 = vand.u32 4294901760, %v4915_v13  ;;  %v5120_v20 = vsub.f32 %v22421_v57, %v5119_v33  ;;  %v5134_v30 = vand.u32 4294901760, %v22448_v39 }
 0x32e   :  { %18715 = vmatpush1.bf16.msra.mxu1 %v22120_v16  ;;  %18650 = vmatprep.subr.bf16.mxu0 %v24985_v29  ;;  %v22485_v4 = vsub.f32 %v4965_v26, %v22461_v35  ;;  %v5115_v21 = vand.u32 4294901760, %v5114_v2  ;;  %v5149_v2 = vand.u32 4294901760, %v22474_v12 }
 0x32f   :  { %5535 = vmatprep.mubr.f32.mxu1 %v22408_v11  ;;  %5092 = vmatmul.mubr.f32.gmra.mrb[28].mxu0 %v5091_v5  ;;  %v5129_v5 = vsub.f32 %v22432_v7, %v24757_v36  ;;  %v22496_v26 = vsub.f32 %v4915_v13, %v22476_v55  ;;  %v5121_v47 = vand.u32 4294901760, %v5120_v20  ;;  %v25006_v11 = vld [vmem:[#allocation5_spill] sm:$0xff] }
 0x330   :  { %18652 = vmatpush1.bf16.msra.mxu0 %v22232_v17  ;;  %5101 = vmatprep.mubr.f32.mxu0 %v5100_v43  ;;  %v5143_v17 = vand.u32 4294901760, %v22464_v41  ;;  %v5135_v43 = vsub.f32 %v22448_v39, %v5134_v30  ;;  %v5158_v36 = vand.u32 4294901760, %v22485_v4  ;;  %v5150_v20 = vsub.f32 %v22474_v12, %v5149_v2 }
 0x331   :  { %18716 = vmatprep.subr.bf16.mxu1 %v24985_v29  ;;  %5538 = vmatmul.mubr.f32.gmra.mrb[24].mxu1 %v22421_v57  ;;  %v25004_v57 = vld [vmem:[#allocation8_spill] sm:$0xff] }
 0x332   :  { %18718 = vmatpush1.bf16.msra.mxu1 %v22137_v3  ;;  %18653 = vmatprep.subr.bf16.mxu0 %v24985_v29  ;;  %v5144_v13 = vsub.f32 %v22464_v41, %v5143_v17 }
 0x333   :  { %5544 = vmatprep.mubr.f32.mxu1 %v22432_v7  ;;  %5107 = vmatmul.mubr.f32.gmra.mrb[30].mxu0 %v5106_v32  ;;  %v5136_v32 = vand.u32 4294901760, %v5135_v43 }
 0x334   :  { %18655 = vmatpush1.bf16.msra.mxu0 %v22238_v56  ;;  %5116 = vmatprep.mubr.f32.mxu0 %v5115_v21  ;;  %v5130_v56 = vand.u32 4294901760, %v5129_v5  ;;  %v5164_v21 = vand.u32 4294901760, %v22496_v26  ;;  %v5145_v5 = vand.u32 4294901760, %v5144_v13  ;;  %v24990_v13 = vand.u32 4294901760, %v22346_v60 }
 0x335   :  { %18719 = vmatprep.subr.bf16.mxu1 %v24985_v29  ;;  %5547 = vmatmul.mubr.f32.gmra.mrb[26].mxu1 %v22448_v39  ;;  %v24992_v60 = vand.u32 4294901760, %v22339_v37  ;;  %v25003_v37 = vld [vmem:[#allocation7_spill] sm:$0xff] }
 0x336   :  { %18721 = vmatpush1.bf16.msra.mxu1 %v22148_v25  ;;  %18656 = vmatprep.subr.bf16.mxu0 %v24985_v29  ;;  %v5165_v43 = vsub.f32 %v22496_v26, %v5164_v21 }
 0x337   :  { %5553 = vmatprep.mubr.f32.mxu1 %v22464_v41  ;;  %5122 = vmatmul.mubr.f32.gmra.mrb[32].mxu0 %v5121_v47  ;;  %v5151_v47 = vand.u32 4294901760, %v5150_v20 }
 0x338   :  { %18658 = vmatpush1.bf16.msra.mxu0 %v22244_v38  ;;  %5131 = vmatprep.mubr.f32.mxu0 %v5130_v56  ;;  %v5159_v38 = vsub.f32 %v22485_v4, %v5158_v36 }
 0x339   :  { %18722 = vmatprep.subr.bf16.mxu1 %v24985_v29  ;;  %5556 = vmatmul.mubr.f32.gmra.mrb[28].mxu1 %v22474_v12 }
 0x33a   :  { %18724 = vmatpush1.bf16.msra.mxu1 %v22159_v42  ;;  %18659 = vmatprep.subr.bf16.mxu0 %v24985_v29  ;;  %v5160_v56 = vand.u32 4294901760, %v5159_v38 }
 0x33b   :  { %5562 = vmatprep.mubr.f32.mxu1 %v22485_v4  ;;  %5137 = vmatmul.mubr.f32.gmra.mrb[34].mxu0 %v5136_v32  ;;  %v24994_v32 = vand.u32 4294901760, %v22377_v31  ;;  %v25007_v31 = vld [vmem:[#allocation3_spill] sm:$0xff] }
 0x33c   :  { %18661 = vmatpush1.bf16.msra.mxu0 %v22250_v53  ;;  %5146 = vmatprep.mubr.f32.mxu0 %v5145_v5  ;;  %v5166_v53 = vand.u32 4294901760, %v5165_v43 }
 0x33d   :  { %18725 = vmatprep.subr.bf16.mxu1 %v24985_v29  ;;  %5565 = vmatmul.mubr.f32.gmra.mrb[30].mxu1 %v22496_v26 }
 0x33e   :  { %18727 = vmatpush1.bf16.msra.mxu1 %v22186_v40  ;;  %18662 = vmatprep.subr.bf16.mxu0 %v24985_v29 }
 0x33f   :  { %5657 = vmatprep.mubr.f32.mxu1 %v24990_v13  ;;  %5152 = vmatmul.mubr.f32.gmra.mrb[36].mxu0 %v5151_v47 }
 0x340   :  { %18664 = vmatpush1.bf16.msra.mxu0 %v22256_v14  ;;  %5161 = vmatprep.mubr.f32.mxu0 %v5160_v56  ;;  %v24991_v14 = vand.u32 4294901760, %v22325_v45  ;;  %v25002_v45 = vld [vmem:[#allocation6_spill] sm:$0xff] }
 0x341   :  { %18728 = vmatprep.subr.bf16.mxu1 %v24985_v29  ;;  %18665 = vmatprep.subr.bf16.mxu0 %v24985_v29 }
 0x342   :  { %18730 = vmatpush1.bf16.msra.mxu1 %v22197_v0 }
 0x343   :  { %5167 = vmatmul.mubr.f32.gmra.mrb[38].mxu0 %v5166_v53  ;;  %18731 = vmatprep.subr.bf16.mxu1 %v24985_v29 }
 0x344   :  { %18667 = vmatpush1.bf16.msra.mxu0 %v22262_v1  ;;  %5337 = vmatprep.mubr.f32.mxu0 %v22334_v59  ;;  %v24993_v1 = vand.u32 4294901760, %v22322_v49  ;;  %v25000_v49 = vld [vmem:[#allocation21_spill] sm:$0xff] }
 0x345   :  { %18668 = vmatprep.subr.bf16.mxu0 %v24985_v29 }
 0x346   :  { %18733 = vmatpush1.bf16.msra.mxu1 %v22204_v18 }
 0x347   :  { %18734 = vmatprep.subr.bf16.mxu1 %v24985_v29 }
 0x348   :  { %18670 = vmatpush1.bf16.msra.mxu0 %v22268_v34  ;;  %v24995_v34 = vand.u32 4294901760, %v22350_v52  ;;  %v25005_v52 = vld [vmem:[#allocation9_spill] sm:$0xff] }
 0x349   :  { %5661 = vmatmul.mubr.f32.vlgmr.msra.gmra.mrb[16].mxu1 %v24991_v14  ;;  %18671 = vmatprep.subr.bf16.mxu0 %v24985_v29 }
 0x34a   :  { %5668 = vmatprep.mubr.f32.mxu1 %v24992_v60  ;;  %18736 = vmatpush1.bf16.msra.mxu1 %v22276_v28  ;;  %v24996_v28 = vand.u32 4294901760, %v22373_v9 }
 0x34b   :  { %18737 = vmatprep.subr.bf16.mxu1 %v24985_v29 }
 0x34c   :  { %18673 = vmatpush1.bf16.msra.mxu0 %v22278_v8  ;;  %v24997_v8 = vld [vmem:[#allocation22_spill] sm:$0xff] }
 0x34d   :  { %5672 = vmatmul.mubr.f32.gmra.mrb[18].mxu1 %v24993_v1 }
 0x34e   :  { %5679 = vmatprep.mubr.f32.mxu1 %v24994_v32  ;;  %18739 = vmatpush1.bf16.msra.mxu1 %v22284_v44  ;;  %v24998_v44 = vand.u32 4294901760, %v22432_v7 }
 0x34f   :  { %5339 = vmatmul.mubr.f32.vlgmr.msra.gmra.mrb[24].mxu0 %v22312_v61  ;;  %18740 = vmatprep.subr.bf16.mxu1 %v24985_v29 }
 0x350   :  { %5344 = vmatprep.mubr.f32.mxu0 %v22331_v23 }
 0x351   :  { %5683 = vmatmul.mubr.f32.gmra.mrb[20].mxu1 %v24995_v34 }
 0x352   :  { %5690 = vmatprep.mubr.f32.mxu1 %v24996_v28  ;;  %18742 = vmatpush1.bf16.msra.mxu1 %v22286_v51  ;;  %v24999_v51 = vld [vmem:[#allocation2_spill] sm:$0xff] }
 0x353   :  { %5346 = vmatmul.mubr.f32.gmra.mrb[26].mxu0 %v22310_v50  ;;  %18743 = vmatprep.subr.bf16.mxu1 %v24985_v29 }
 0x354   :  { %5351 = vmatprep.mubr.f32.mxu0 %v22358_v24 }
 0x355   :  { %5694 = vmatmul.mubr.f32.gmra.mrb[22].mxu1 %v5104_v10 }
 0x356   :  { %5701 = vmatprep.mubr.f32.mxu1 %v5113_v27  ;;  %18745 = vmatpush1.bf16.msra.mxu1 %v22288_v54  ;;  %v25001_v54 = vld [vmem:[#allocation4_spill] sm:$0xff] }
 0x357   :  { %5353 = vmatmul.mubr.f32.gmra.mrb[28].mxu0 %v22329_v63  ;;  %18746 = vmatprep.subr.bf16.mxu1 %v24985_v29 }
 0x358   :  { %5358 = vmatprep.mubr.f32.mxu0 %v24997_v8 }
 0x359   :  { %5705 = vmatmul.mubr.f32.gmra.mrb[24].mxu1 %v5119_v33 }
 0x35a   :  { %5712 = vmatprep.mubr.f32.mxu1 %v24998_v44  ;;  %18748 = vmatpush1.bf16.msra.mxu1 %v24999_v51 }
 0x35b   :  { %5360 = vmatmul.mubr.f32.gmra.mrb[30].mxu0 %v25000_v49  ;;  %18749 = vmatprep.subr.bf16.mxu1 %v24985_v29 }
 0x35c   :  { %5365 = vmatprep.mubr.f32.mxu0 %v22398_v48 }
 0x35d   :  { %5716 = vmatmul.mubr.f32.gmra.mrb[26].mxu1 %v5134_v30 }
 0x35e   :  { %5723 = vmatprep.mubr.f32.mxu1 %v5143_v17  ;;  %18751 = vmatpush1.bf16.msra.mxu1 %v25001_v54  ;;  %v6074_v54 = vld [vmem:[%s24642_s4 + $0x8] sm:$0xff] }
 0x35f   :  { %5367 = vmatmul.mubr.f32.gmra.mrb[32].mxu0 %v22395_v19  ;;  %18752 = vmatprep.subr.bf16.mxu1 %v24985_v29 }
 0x360   :  { %5372 = vmatprep.mubr.f32.mxu0 %v22403_v15 }
 0x361   :  { %5727 = vmatmul.mubr.f32.gmra.mrb[28].mxu1 %v5149_v2 }
 0x362   :  { %5734 = vmatprep.mubr.f32.mxu1 %v5158_v36  ;;  %18754 = vmatpush1.bf16.msra.mxu1 %v25002_v45  ;;  %v22693_v36 = vld [vmem:[%s24643_s2] ss:$0 sm:$0xff] }
 0x363   :  { %5374 = vmatmul.mubr.f32.gmra.mrb[34].mxu0 %v22423_v6  ;;  %18755 = vmatprep.subr.bf16.mxu1 %v24985_v29 }
 0x364   :  { %5379 = vmatprep.mubr.f32.mxu0 %v22438_v22 }
 0x365   :  { %5738 = vmatmul.mubr.f32.gmra.mrb[30].mxu1 %v5164_v21 }
 0x366   :  { %18757 = vmatpush1.bf16.msra.mxu1 %v25003_v37  ;;  %5868 = vmatprep.mubr.f32.mxu1 %v22334_v59 }
 0x367   :  { %5381 = vmatmul.mubr.f32.gmra.mrb[36].mxu0 %v22454_v46  ;;  %18758 = vmatprep.subr.bf16.mxu1 %v24985_v29 }
 0x368   :  { %5386 = vmatprep.mubr.f32.mxu0 %v22461_v35 }
 0x36a   :  { %18760 = vmatpush1.bf16.msra.mxu1 %v25004_v57 }
 0x36b   :  { %5388 = vmatmul.mubr.f32.gmra.mrb[38].mxu0 %v22476_v55  ;;  %18761 = vmatprep.subr.bf16.mxu1 %v24985_v29 }
 0x36e   :  { %18763 = vmatpush1.bf16.msra.mxu1 %v25005_v52 }
 0x36f   :  { %18764 = vmatprep.subr.bf16.mxu1 %v24985_v29 }
 0x371   :  { %5870 = vmatmul.mubr.f32.vlgmr.msra.gmra.mrb[16].mxu1 %v22312_v61 }
 0x372   :  { %5875 = vmatprep.mubr.f32.mxu1 %v22331_v23  ;;  %18766 = vmatpush1.bf16.msra.mxu1 %v25006_v11 }
 0x373   :  { %18767 = vmatprep.subr.bf16.mxu1 %v24985_v29 }
 0x375   :  { %5877 = vmatmul.mubr.f32.gmra.mrb[18].mxu1 %v22310_v50 }
 0x376   :  { %5882 = vmatprep.mubr.f32.mxu1 %v22358_v24  ;;  %18769 = vmatpush1.bf16.msra.mxu1 %v25007_v31 }
 0x377   :  { %18770 = vmatprep.subr.bf16.mxu1 %v24985_v29 }
 0x379   :  { %5884 = vmatmul.mubr.f32.gmra.mrb[20].mxu1 %v22329_v63 }
 0x37a   :  { %5889 = vmatprep.mubr.f32.mxu1 %v24997_v8  ;;  %18772 = vmatpush1.bf16.msra.mxu1 %v22099_v58 }
 0x37b   :  { %18773 = vmatprep.subr.bf16.mxu1 %v24985_v29 }
 0x37d   :  { %5891 = vmatmul.mubr.f32.gmra.mrb[22].mxu1 %v25000_v49 }
 0x37e   :  { %5896 = vmatprep.mubr.f32.mxu1 %v22398_v48  ;;  %18775 = vmatpush1.bf16.msra.mxu1 %v22120_v16 }
 0x37f   :  { %18776 = vmatprep.subr.bf16.mxu1 %v24985_v29 }
 0x381   :  { %5898 = vmatmul.mubr.f32.gmra.mrb[24].mxu1 %v22395_v19 }
 0x382   :  { %5903 = vmatprep.mubr.f32.mxu1 %v22403_v15  ;;  %18778 = vmatpush1.bf16.msra.mxu1 %v22137_v3 }
 0x383   :  { %18779 = vmatprep.subr.bf16.mxu1 %v24985_v29 }
 0x385   :  { %5905 = vmatmul.mubr.f32.gmra.mrb[26].mxu1 %v22423_v6 }
 0x386   :  { %5910 = vmatprep.mubr.f32.mxu1 %v22438_v22  ;;  %18781 = vmatpush1.bf16.msra.mxu1 %v22148_v25 }
 0x387   :  { %18782 = vmatprep.subr.bf16.mxu1 %v24985_v29 }
 0x389   :  { %5912 = vmatmul.mubr.f32.gmra.mrb[28].mxu1 %v22454_v46 }
 0x38a   :  { %5917 = vmatprep.mubr.f32.mxu1 %v22461_v35  ;;  %18784 = vmatpush1.bf16.msra.mxu1 %v22159_v42 }
 0x38b   :  { %18785 = vmatprep.subr.bf16.mxu1 %v24985_v29 }
 0x38d   :  { %5919 = vmatmul.mubr.f32.gmra.mrb[30].mxu1 %v22476_v55 }
 0x38e   :  { %18787 = vmatpush1.bf16.msra.mxu1 %v22186_v40  ;;  %6009 = vmatprep.mubr.f32.mxu1 %v22334_v59 }
 0x38f   :  { %18788 = vmatprep.subr.bf16.mxu1 %v24985_v29 }
 0x392   :  { %18790 = vmatpush1.bf16.msra.mxu1 %v22197_v0  ;;  %v14016_v0 = vld [vmem:[%s24642_s4 + $0x20] sm:$0xff] }
 0x393   :  { %18791 = vmatprep.subr.bf16.mxu1 %v24985_v29 }
 0x396   :  { %18793 = vmatpush1.bf16.msra.mxu1 %v22204_v18  ;;  %v22680_v18 = vsel %vm4898_vm1, %v14016_v0, 0 }
 0x399   :  { %6011 = vmatmul.mubr.f32.vlgmr.msra.gmra.mrb[16].mxu1 %v22312_v61 }
 0x39a   :  { %6016 = vmatprep.mubr.f32.mxu1 %v22331_v23 }
 0x39d   :  { %6018 = vmatmul.mubr.f32.gmra.mrb[18].mxu1 %v22310_v50 }
 0x39e   :  { %6023 = vmatprep.mubr.f32.mxu1 %v22358_v24  ;;  %v6073_v24 = vld [vmem:[%s24642_s4] sm:$0xff] }
 0x39f   :  { %v6078_v58 = vsel %vm4898_vm1, %v6073_v24, 0  ;;  %v6075_v24 = vld [vmem:[%s24642_s4 + $0x10] sm:$0xff] }
 0x3a0   :  { %v22667_v16 = vand.u32 4294901760, %v6078_v58 }
 0x3a1   :  { %6025 = vmatmul.mubr.f32.gmra.mrb[20].mxu1 %v22329_v63 }
 0x3a2   :  { %6030 = vmatprep.mubr.f32.mxu1 %v24997_v8  ;;  %v22670_v3 = vsub.f32 %v6078_v58, %v22667_v16 }
 0x3a4   :  { %v6164_v25 = vand.u32 4294901760, %v22670_v3 }
 0x3a5   :  { %6032 = vmatmul.mubr.f32.gmra.mrb[22].mxu1 %v25000_v49 }
 0x3a6   :  { %6037 = vmatprep.mubr.f32.mxu1 %v22398_v48  ;;  %v6165_v42 = vsub.f32 %v22670_v3, %v6164_v25 }
 0x3a8   :  { %v6166_v40 = vand.u32 4294901760, %v6165_v42 }
 0x3a9   :  { %6039 = vmatmul.mubr.f32.gmra.mrb[24].mxu1 %v22395_v19 }
 0x3aa   :  { %6044 = vmatprep.mubr.f32.mxu1 %v22403_v15  ;;  %16680 = vmatprep.mubr.f32.mxu0 %v6166_v40  ;;  %v22683_v15 = vand.u32 4294901760, %v22680_v18 }
 0x3ad   :  { %6046 = vmatmul.mubr.f32.gmra.mrb[26].mxu1 %v22423_v6 }
 0x3ae   :  { %6051 = vmatprep.mubr.f32.mxu1 %v22438_v22 }
 0x3b1   :  { %6053 = vmatmul.mubr.f32.gmra.mrb[28].mxu1 %v22454_v46 }
 0x3b2   :  { %6058 = vmatprep.mubr.f32.mxu1 %v22461_v35 }
 0x3b5   :  { %6060 = vmatmul.mubr.f32.gmra.mrb[30].mxu1 %v22476_v55 }
 0x3b6   :  { %16834 = vmatprep.mubr.f32.mxu1 %v22683_v15 }
 0x422   :  { %v5340_v48 = vpop.f32.mrb[24].mxu0 }
 0x423   :  { %v5342_v19 = vpop.f32.mrb[25].mxu0  ;;  %v19874_v33 = vadd.f32 %v22693_v36, %v5340_v48  ;;  %v6081_v48 = vsel %vm4898_vm1, %v6074_v54, 0 }
 0x426   :  { %v5347_v50 = vpop.f32.mrb[26].mxu0 }
 0x427   :  { %v5349_v61 = vpop.f32.mrb[27].mxu0  ;;  %v19876_v55 = vadd.f32 %v22693_v36, %v5347_v50 }
 0x42a   :  { %v5354_v63 = vpop.f32.mrb[28].mxu0 }
 0x42b   :  { %v5356_v23 = vpop.f32.mrb[29].mxu0  ;;  %v19878_v20 = vadd.f32 %v22693_v36, %v5354_v63 }
 0x42e   :  { %v5361_v59 = vpop.f32.mrb[30].mxu0 }
 0x42f   :  { %v5363_v9 = vpop.f32.mrb[31].mxu0  ;;  %v19880_v1 = vadd.f32 %v22693_v36, %v5361_v59  ;;  %v6084_v59 = vsel %vm4898_vm1, %v6075_v24, 0 }
 0x432   :  { %v5368_v62 = vpop.f32.mrb[32].mxu0 }
 0x433   :  { %v5370_v10 = vpop.f32.mrb[33].mxu0  ;;  %v19882_v45 = vadd.f32 %v22693_v36, %v5368_v62 }
 0x436   :  { %v5375_v6 = vpop.f32.mrb[34].mxu0 }
 0x437   :  { %v5377_v7 = vpop.f32.mrb[35].mxu0  ;;  %v19884_v61 = vadd.f32 %v22693_v36, %v5375_v6 }
 0x438   :  { %v22721_v7 = vand.u32 4294901760, %v6081_v48 }
 0x43a   :  { %v22686_v27 = vpop.f32.mrb[36].mxu0 }
 0x43b   :  { %v5384_v22 = vpop.f32.mrb[37].mxu0 }
 0x43c   :  { %v6076_v22 = vld [vmem:[%s24642_s4 + $0x18] sm:$0xff] }
 0x43e   :  { %v22688_v39 = vpop.f32.mrb[38].mxu0 }
 0x43f   :  { %v5391_v46 = vpop.f32.mrb[39].mxu0 }
 0x46c   :  { %v6012_v35 = vpop.f32.mrb[16].mxu1 }
 0x46d   :  { %v19875_v41 = vadd.f32 %v19874_v33, %v6012_v35  ;;  %v6014_v12 = vpop.f32.mrb[17].mxu1 }
 0x46f   :  { %v6065_v30 = vmax.f32 %v19875_v41, 0.0 }
 0x470   :  { %v6019_v4 = vpop.f32.mrb[18].mxu1 }
 0x471   :  { %v6090_v17 = vand.u32 4294901760, %v6065_v30  ;;  %v19877_v26 = vadd.f32 %v19876_v55, %v6019_v4  ;;  %v6021_v2 = vpop.f32.mrb[19].mxu1  ;;  %v22731_v55 = vand.u32 4294901760, %v6084_v59 }
 0x473   :  { %v6204_v21 = vsub.f32 %v6065_v30, %v6090_v17  ;;  %v6066_v5 = vmax.f32 %v19877_v26, 0.0  ;;  %v19886_v30 = vadd.f32 %v22693_v36, %v22686_v27  ;;  %v6087_v26 = vsel %vm4898_vm1, %v6076_v22, 0 }
 0x474   :  { %v6026_v38 = vpop.f32.mrb[20].mxu1  ;;  %v22742_v27 = vand.u32 4294901760, %v6087_v26 }
 0x475   :  { %v6205_v47 = vand.u32 4294901760, %v6204_v21  ;;  %v6093_v43 = vand.u32 4294901760, %v6066_v5  ;;  %v19879_v56 = vadd.f32 %v19878_v20, %v6026_v38  ;;  %v6028_v13 = vpop.f32.mrb[21].mxu1 }
 0x477   :  { %v22698_v53 = vpack.c.bf16 %v6093_v43, %v6090_v17  ;;  %v6211_v14 = vsub.f32 %v6066_v5, %v6093_v43  ;;  %v6067_v60 = vmax.f32 %v19879_v56, 0.0  ;;  %v6206_v34 = vsub.f32 %v6204_v21, %v6205_v47 }
 0x478   :  { %v6033_v32 = vpop.f32.mrb[22].mxu1  ;;  %v22740_v5 = vsub.f32 %v6081_v48, %v22721_v7 }
 0x479   :  { %v6212_v28 = vand.u32 4294901760, %v6211_v14  ;;  %v22701_v8 = vpack.c.bf16 %v6211_v14, %v6204_v21  ;;  %v6096_v44 = vand.u32 4294901760, %v6067_v60  ;;  %v6035_v51 = vpop.f32.mrb[23].mxu1  ;;  %18795 = vmatprep.subr.bf16.mxu0 %v22698_v53  ;;  %v19881_v49 = vadd.f32 %v19880_v1, %v6033_v32 }
 0x47a   :  { %18797 = vmatpush3.bf16.msra.mxu0 %v22698_v53  ;;  %v6207_v58 = vand.u32 4294901760, %v6206_v34  ;;  %v22747_v34 = vsub.f32 %v6084_v59, %v22731_v55 }
 0x47b   :  { %v6213_v37 = vsub.f32 %v6211_v14, %v6212_v28  ;;  %v22709_v57 = vpack.c.bf16 %v6212_v28, %v6205_v47  ;;  %v6218_v52 = vsub.f32 %v6067_v60, %v6096_v44  ;;  %v6068_v11 = vmax.f32 %v19881_v49, 0.0 }
 0x47c   :  { %v6040_v31 = vpop.f32.mrb[24].mxu1  ;;  %v19888_v28 = vadd.f32 %v22693_v36, %v22688_v39  ;;  %v6174_v49 = vand.u32 4294901760, %v22740_v5  ;;  %v22760_v39 = vsub.f32 %v6087_v26, %v22742_v27  ;;  %v14017_v26 = vld [vmem:[%s24642_s4 + $0x28] sm:$0xff] }
 0x47d   :  { %v6214_v42 = vand.u32 4294901760, %v6213_v37  ;;  %v19883_v40 = vadd.f32 %v19882_v45, %v6040_v31  ;;  %v6042_v0 = vpop.f32.mrb[25].mxu1  ;;  %v6219_v19 = vand.u32 4294901760, %v6218_v52  ;;  %v6099_v50 = vand.u32 4294901760, %v6068_v11 }
 0x47f   :  { %v22716_v63 = vpack.c.bf16 %v6214_v42, %v6207_v58  ;;  %v6069_v23 = vmax.f32 %v19883_v40, 0.0  ;;  %v22719_v9 = vpack.c.bf16 %v6099_v50, %v6096_v44  ;;  %v6225_v62 = vsub.f32 %v6068_v11, %v6099_v50 }
 0x480   :  { %v6047_v10 = vpop.f32.mrb[26].mxu1  ;;  %v6220_v6 = vsub.f32 %v6218_v52, %v6219_v19  ;;  %v6184_v42 = vand.u32 4294901760, %v22747_v34 }
 0x481   :  { %v6102_v46 = vand.u32 4294901760, %v6069_v23  ;;  %v19885_v33 = vadd.f32 %v19884_v61, %v6047_v10  ;;  %v6049_v35 = vpop.f32.mrb[27].mxu1  ;;  %18907 = vmatprep.subr.bf16.mxu1 %v22716_v63  ;;  %v6226_v41 = vand.u32 4294901760, %v6225_v62  ;;  %v22727_v12 = vpack.c.bf16 %v6225_v62, %v6218_v52  ;;  %18799 = vmatprep.subr.bf16.mxu0 %v22719_v9 }
 0x482   :  { %18909 = vmatpush3.bf16.msra.mxu1 %v22716_v63  ;;  %18801 = vmatpush3.bf16.msra.mxu0 %v22719_v9  ;;  %v6221_v13 = vand.u32 4294901760, %v6220_v6 }
 0x483   :  { %v6232_v4 = vsub.f32 %v6069_v23, %v6102_v46  ;;  %v6070_v17 = vmax.f32 %v19885_v33, 0.0  ;;  %v6227_v2 = vsub.f32 %v6225_v62, %v6226_v41  ;;  %v22737_v20 = vpack.c.bf16 %v6226_v41, %v6219_v19 }
 0x484   :  { %v6054_v21 = vpop.f32.mrb[28].mxu1  ;;  %v6175_v19 = vsub.f32 %v22740_v5, %v6174_v49  ;;  %v6194_v23 = vand.u32 4294901760, %v22760_v39  ;;  %v6185_v62 = vsub.f32 %v22747_v34, %v6184_v42 }
 0x485   :  { %v6233_v38 = vand.u32 4294901760, %v6232_v4  ;;  %v6105_v47 = vand.u32 4294901760, %v6070_v17  ;;  %v19887_v43 = vadd.f32 %v19886_v30, %v6054_v21  ;;  %v6056_v56 = vpop.f32.mrb[29].mxu1  ;;  %v6228_v14 = vand.u32 4294901760, %v6227_v2 }
 0x486   :  { %v6195_v41 = vsub.f32 %v22760_v39, %v6194_v23  ;;  %v6186_v30 = vand.u32 4294901760, %v6185_v62 }
 0x487   :  { %v22744_v60 = vpack.c.bf16 %v6105_v47, %v6102_v46  ;;  %v6239_v1 = vsub.f32 %v6070_v17, %v6105_v47  ;;  %v6071_v32 = vmax.f32 %v19887_v43, 0.0  ;;  %v22751_v44 = vpack.c.bf16 %v6228_v14, %v6221_v13  ;;  %v14018_v43 = vld [vmem:[%s24642_s4 + $0x30] sm:$0xff]  ;;  %v14019_v13 = vld [vmem:[%s24642_s4 + $0x38] sm:$0xff] }
 0x488   :  { %v6061_v51 = vpop.f32.mrb[30].mxu1  ;;  %v6234_v54 = vsub.f32 %v6232_v4, %v6233_v38  ;;  %v6176_v46 = vand.u32 4294901760, %v6175_v19  ;;  %v6764_v47 = vsel %vm4898_vm1, %v14017_v26, 0 }
 0x489   :  { %v6240_v45 = vand.u32 4294901760, %v6239_v1  ;;  %v22754_v37 = vpack.c.bf16 %v6239_v1, %v6232_v4  ;;  %v6108_v52 = vand.u32 4294901760, %v6071_v32  ;;  %v6063_v11 = vpop.f32.mrb[31].mxu1  ;;  %18803 = vmatprep.subr.bf16.mxu0 %v22744_v60  ;;  %v19889_v31 = vadd.f32 %v19888_v28, %v6061_v51  ;;  %18911 = vmatprep.subr.bf16.mxu1 %v22751_v44 }
 0x48a   :  { %18805 = vmatpush3.bf16.msra.mxu0 %v22744_v60  ;;  %18913 = vmatpush3.bf16.msra.mxu1 %v22751_v44  ;;  %v6235_v0 = vand.u32 4294901760, %v6234_v54  ;;  %v22804_v14 = vand.u32 4294901760, %v6764_v47  ;;  %v22825_v54 = vsub.f32 %v22680_v18, %v22683_v15 }
 0x48b   :  { %v6241_v36 = vsub.f32 %v6239_v1, %v6240_v45  ;;  %v22762_v24 = vpack.c.bf16 %v6240_v45, %v6233_v38  ;;  %v6246_v58 = vsub.f32 %v6071_v32, %v6108_v52  ;;  %v6072_v40 = vmax.f32 %v19889_v31, 0.0 }
 0x48c   :  { %v6196_v38 = vand.u32 4294901760, %v6195_v41  ;;  %v6767_v1 = vsel %vm4898_vm1, %v14018_v43, 0  ;;  %v6770_v32 = vsel %vm4898_vm1, %v14019_v13, 0  ;;  %v22840_v18 = vsub.f32 %v6764_v47, %v22804_v14 }
 0x48d   :  { %v6242_v48 = vand.u32 4294901760, %v6241_v36  ;;  %v6247_v50 = vand.u32 4294901760, %v6246_v58  ;;  %v6111_v61 = vand.u32 4294901760, %v6072_v40  ;;  %v22813_v28 = vand.u32 4294901760, %v6767_v1 }
 0x48e   :  { %v22816_v51 = vand.u32 4294901760, %v6770_v32  ;;  %v6847_v11 = vand.u32 4294901760, %v22825_v54  ;;  %v6857_v31 = vand.u32 4294901760, %v22840_v18 }
 0x48f   :  { %v22770_v59 = vpack.c.bf16 %v6242_v48, %v6235_v0  ;;  %v22775_v10 = vpack.c.bf16 %v6111_v61, %v6108_v52  ;;  %v6253_v22 = vsub.f32 %v6072_v40, %v6111_v61  ;;  %v6248_v33 = vsub.f32 %v6246_v58, %v6247_v50 }
 0x490   :  { %v22849_v45 = vsub.f32 %v6767_v1, %v22813_v28  ;;  %v22853_v52 = vsub.f32 %v6770_v32, %v22816_v51  ;;  %v6848_v41 = vsub.f32 %v22825_v54, %v6847_v11 }
 0x491   :  { %18915 = vmatprep.subr.bf16.mxu1 %v22770_v59  ;;  %v6254_v35 = vand.u32 4294901760, %v6253_v22  ;;  %v22778_v6 = vpack.c.bf16 %v6253_v22, %v6246_v58  ;;  %18807 = vmatprep.subr.bf16.mxu0 %v22775_v10  ;;  %v6249_v2 = vand.u32 4294901760, %v6248_v33 }
 0x492   :  { %18917 = vmatpush3.bf16.msra.mxu1 %v22770_v59  ;;  %18809 = vmatpush3.bf16.msra.mxu0 %v22775_v10  ;;  %v6867_v36 = vand.u32 4294901760, %v22849_v45  ;;  %v6877_v58 = vand.u32 4294901760, %v22853_v52 }
 0x493   :  { %v6255_v4 = vsub.f32 %v6253_v22, %v6254_v35  ;;  %v22786_v17 = vpack.c.bf16 %v6254_v35, %v6247_v50  ;;  %18811 = vmatprep.subr.bf16.mxu0 %v22716_v63  ;;  %v14020_v35 = vld [vmem:[%s24642_s4 + $0x40] sm:$0xff] }
 0x495   :  { %v6256_v21 = vand.u32 4294901760, %v6255_v4  ;;  %16681 = vmatmul.mubr.f32.vlgmr.msra.gmra.mrb[40].mxu0 %v6176_v46 }
 0x496   :  { %18813 = vmatpush3.bf16.msra.mxu0 %v22716_v63  ;;  %16683 = vmatprep.mubr.f32.mxu0 %v6186_v30 }
 0x497   :  { %v22797_v56 = vpack.c.bf16 %v6256_v21, %v6249_v2  ;;  %18815 = vmatprep.subr.bf16.mxu0 %v22751_v44  ;;  %v7444_v2 = vsel %vm4898_vm1, %v14020_v35, 0  ;;  %v6849_v21 = vand.u32 4294901760, %v6848_v41 }
 0x499   :  { %18919 = vmatprep.subr.bf16.mxu1 %v22797_v56  ;;  %16684 = vmatmul.mubr.f32.gmra.mrb[42].mxu0 %v6196_v38  ;;  %v23011_v38 = vand.u32 4294901760, %v7444_v2 }
 0x49a   :  { %18817 = vmatpush3.bf16.msra.mxu0 %v22751_v44  ;;  %18921 = vmatpush3.bf16.msra.mxu1 %v22797_v56 }
 0x49b   :  { %18819 = vmatprep.subr.bf16.mxu0 %v22770_v59  ;;  %18923 = vmatprep.subr.bf16.mxu1 %v22701_v8 }
 0x49c   :  { %16702 = vmatprep.mubr.f32.mxu0 %v22667_v16 }
 0x49d   :  { %16835 = vmatmul.mubr.f32.vlgmr.msra.gmra.mrb[32].mxu1 %v22804_v14 }
 0x49e   :  { %18821 = vmatpush3.bf16.msra.mxu0 %v22770_v59  ;;  %18925 = vmatpush3.bf16.msra.mxu1 %v22701_v8 }
 0x49f   :  { %18823 = vmatprep.subr.bf16.mxu0 %v22797_v56  ;;  %18927 = vmatprep.subr.bf16.mxu1 %v22727_v12 }
 0x4a0   :  { %16837 = vmatprep.mubr.f32.mxu1 %v22813_v28 }
 0x4a1   :  { %16838 = vmatmul.mubr.f32.gmra.mrb[34].mxu1 %v22816_v51 }
 0x4a2   :  { %18825 = vmatpush3.bf16.msra.mxu0 %v22797_v56  ;;  %18929 = vmatpush3.bf16.msra.mxu1 %v22727_v12 }
 0x4a3   :  { %18827 = vmatprep.subr.bf16.mxu0 %v22701_v8  ;;  %18931 = vmatprep.subr.bf16.mxu1 %v22754_v37 }
 0x4a4   :  { %16856 = vmatprep.mubr.f32.mxu1 %v22825_v54  ;;  %v6868_v54 = vsub.f32 %v22849_v45, %v6867_v36 }
 0x4a5   :  { %16703 = vmatmul.mubr.f32.vlgmr.msra.gmra.mrb[40].mxu0 %v22721_v7 }
 0x4a6   :  { %18829 = vmatpush3.bf16.msra.mxu0 %v22701_v8  ;;  %18933 = vmatpush3.bf16.msra.mxu1 %v22754_v37 }
 0x4a7   :  { %18831 = vmatprep.subr.bf16.mxu0 %v22727_v12  ;;  %18935 = vmatprep.subr.bf16.mxu1 %v22778_v6 }
 0x4a8   :  { %16705 = vmatprep.mubr.f32.mxu0 %v22731_v55 }
 0x4a9   :  { %16706 = vmatmul.mubr.f32.gmra.mrb[42].mxu0 %v22742_v27 }
 0x4aa   :  { %18833 = vmatpush3.bf16.msra.mxu0 %v22727_v12  ;;  %18937 = vmatpush3.bf16.msra.mxu1 %v22778_v6 }
 0x4ab   :  { %18835 = vmatprep.subr.bf16.mxu0 %v22754_v37  ;;  %18939 = vmatprep.subr.bf16.mxu1 %v22698_v53 }
 0x4ac   :  { %16724 = vmatprep.mubr.f32.mxu0 %v22670_v3  ;;  %v14024_v3 = vld [vmem:[%s24642_s4 + $0x60] sm:$0xff] }
 0x4ad   :  { %16857 = vmatmul.mubr.f32.vlgmr.msra.gmra.mrb[32].mxu1 %v22840_v18 }
 0x4ae   :  { %18837 = vmatpush3.bf16.msra.mxu0 %v22754_v37  ;;  %18941 = vmatpush3.bf16.msra.mxu1 %v22698_v53 }
 0x4af   :  { %18839 = vmatprep.subr.bf16.mxu0 %v22778_v6  ;;  %18943 = vmatprep.subr.bf16.mxu1 %v22719_v9 }
 0x4b0   :  { %16859 = vmatprep.mubr.f32.mxu1 %v22849_v45  ;;  %v6869_v45 = vand.u32 4294901760, %v6868_v54 }
 0x4b1   :  { %16860 = vmatmul.mubr.f32.gmra.mrb[34].mxu1 %v22853_v52 }
 0x4b2   :  { %18841 = vmatpush3.bf16.msra.mxu0 %v22778_v6  ;;  %18945 = vmatpush3.bf16.msra.mxu1 %v22719_v9 }
 0x4b3   :  { %18843 = vmatprep.subr.bf16.mxu0 %v22698_v53  ;;  %18947 = vmatprep.subr.bf16.mxu1 %v22744_v60 }
 0x4b4   :  { %16878 = vmatprep.mubr.f32.mxu1 %v6847_v11 }
 0x4b5   :  { %16725 = vmatmul.mubr.f32.vlgmr.msra.gmra.mrb[40].mxu0 %v22740_v5 }
 0x4b6   :  { %18845 = vmatpush3.bf16.msra.mxu0 %v22698_v53  ;;  %18949 = vmatpush3.bf16.msra.mxu1 %v22744_v60 }
 0x4b7   :  { %18847 = vmatprep.subr.bf16.mxu0 %v22719_v9  ;;  %18951 = vmatprep.subr.bf16.mxu1 %v22775_v10 }
 0x4b8   :  { %16727 = vmatprep.mubr.f32.mxu0 %v22747_v34  ;;  %v14025_v34 = vld [vmem:[%s24642_s4 + $0x68] sm:$0xff] }
 0x4b9   :  { %16728 = vmatmul.mubr.f32.gmra.mrb[42].mxu0 %v22760_v39  ;;  %v8130_v39 = vsel %vm4898_vm1, %v14025_v34, 0 }
 0x4ba   :  { %18849 = vmatpush3.bf16.msra.mxu0 %v22719_v9  ;;  %18953 = vmatpush3.bf16.msra.mxu1 %v22775_v10  ;;  %v22953_v0 = vand.u32 4294901760, %v8130_v39 }
 0x4bb   :  { %18851 = vmatprep.subr.bf16.mxu0 %v22744_v60  ;;  %18955 = vmatprep.subr.bf16.mxu1 %v22709_v57 }
 0x4bc   :  { %16746 = vmatprep.mubr.f32.mxu0 %v6164_v25  ;;  %v8127_v25 = vsel %vm4898_vm1, %v14024_v3, 0 }
 0x4bd   :  { %16879 = vmatmul.mubr.f32.vlgmr.msra.gmra.mrb[32].mxu1 %v6857_v31  ;;  %v22924_v5 = vand.u32 4294901760, %v8127_v25 }
 0x4be   :  { %18853 = vmatpush3.bf16.msra.mxu0 %v22744_v60  ;;  %18957 = vmatpush3.bf16.msra.mxu1 %v22709_v57 }
 0x4bf   :  { %18855 = vmatprep.subr.bf16.mxu0 %v22775_v10  ;;  %18959 = vmatprep.subr.bf16.mxu1 %v22737_v20 }
 0x4c0   :  { %16881 = vmatprep.mubr.f32.mxu1 %v6867_v36 }
 0x4c1   :  { %16882 = vmatmul.mubr.f32.gmra.mrb[34].mxu1 %v6877_v58 }
 0x4c2   :  { %18857 = vmatpush3.bf16.msra.mxu0 %v22775_v10  ;;  %18961 = vmatpush3.bf16.msra.mxu1 %v22737_v20 }
 0x4c3   :  { %18859 = vmatprep.subr.bf16.mxu0 %v22709_v57  ;;  %18963 = vmatprep.subr.bf16.mxu1 %v22762_v24 }
 0x4c4   :  { %16900 = vmatprep.mubr.f32.mxu1 %v22683_v15 }
 0x4c5   :  { %16747 = vmatmul.mubr.f32.vlgmr.msra.gmra.mrb[40].mxu0 %v6174_v49  ;;  %v22936_v49 = vsub.f32 %v8127_v25, %v22924_v5 }
 0x4c6   :  { %18861 = vmatpush3.bf16.msra.mxu0 %v22709_v57  ;;  %18965 = vmatpush3.bf16.msra.mxu1 %v22762_v24 }
 0x4c7   :  { %18863 = vmatprep.subr.bf16.mxu0 %v22737_v20  ;;  %18967 = vmatprep.subr.bf16.mxu1 %v22786_v17  ;;  %v8213_v40 = vand.u32 4294901760, %v22936_v49 }
 0x4c8   :  { %16749 = vmatprep.mubr.f32.mxu0 %v6184_v42  ;;  %v14026_v42 = vld [vmem:[%s24642_s4 + $0x70] sm:$0xff] }
 0x4c9   :  { %16750 = vmatmul.mubr.f32.gmra.mrb[42].mxu0 %v6194_v23  ;;  %v8133_v48 = vsel %vm4898_vm1, %v14026_v42, 0  ;;  %v8214_v50 = vsub.f32 %v22936_v49, %v8213_v40  ;;  %v22969_v23 = vsub.f32 %v8130_v39, %v22953_v0 }
 0x4ca   :  { %18865 = vmatpush3.bf16.msra.mxu0 %v22737_v20  ;;  %18969 = vmatpush3.bf16.msra.mxu1 %v22786_v17  ;;  %v22965_v61 = vand.u32 4294901760, %v8133_v48 }
 0x4cb   :  { %18867 = vmatprep.subr.bf16.mxu0 %v22762_v24  ;;  %18971 = vmatprep.subr.bf16.mxu1 %v22698_v53  ;;  %v8223_v46 = vand.u32 4294901760, %v22969_v23 }
 0x4cc   :  { %16768 = vmatprep.mubr.f32.mxu0 %v22667_v16  ;;  %v22979_v22 = vsub.f32 %v8133_v48, %v22965_v61 }
 0x4cd   :  { %16901 = vmatmul.mubr.f32.vlgmr.msra.gmra.mrb[32].mxu1 %v22804_v14  ;;  %v8224_v4 = vsub.f32 %v22969_v23, %v8223_v46 }
 0x4ce   :  { %18869 = vmatpush3.bf16.msra.mxu0 %v22762_v24  ;;  %18973 = vmatpush3.bf16.msra.mxu1 %v22698_v53  ;;  %v8233_v30 = vand.u32 4294901760, %v22979_v22 }
 0x4cf   :  { %18871 = vmatprep.subr.bf16.mxu0 %v22786_v17  ;;  %18975 = vmatprep.subr.bf16.mxu1 %v22719_v9  ;;  %v8225_v47 = vand.u32 4294901760, %v8224_v4 }
 0x4d0   :  { %16903 = vmatprep.mubr.f32.mxu1 %v22813_v28 }
 0x4d1   :  { %16904 = vmatmul.mubr.f32.gmra.mrb[34].mxu1 %v22816_v51 }
 0x4d2   :  { %18873 = vmatpush3.bf16.msra.mxu0 %v22786_v17  ;;  %18977 = vmatpush3.bf16.msra.mxu1 %v22719_v9 }
 0x4d3   :  { %18875 = vmatprep.subr.bf16.mxu0 %v22698_v53  ;;  %18979 = vmatprep.subr.bf16.mxu1 %v22744_v60 }
 0x4d4   :  { %16922 = vmatprep.mubr.f32.mxu1 %v22683_v15  ;;  %v14027_v15 = vld [vmem:[%s24642_s4 + $0x78] sm:$0xff] }
 0x4d5   :  { %16769 = vmatmul.mubr.f32.vlgmr.msra.gmra.mrb[40].mxu0 %v22721_v7  ;;  %v8136_v19 = vsel %vm4898_vm1, %v14027_v15, 0 }
 0x4d6   :  { %18877 = vmatpush3.bf16.msra.mxu0 %v22698_v53  ;;  %18981 = vmatpush3.bf16.msra.mxu1 %v22744_v60  ;;  %v22971_v62 = vand.u32 4294901760, %v8136_v19 }
 0x4d7   :  { %18879 = vmatprep.subr.bf16.mxu0 %v22719_v9  ;;  %18983 = vmatprep.subr.bf16.mxu1 %v22775_v10 }
 0x4d8   :  { %16771 = vmatprep.mubr.f32.mxu0 %v22731_v55  ;;  %v22984_v33 = vsub.f32 %v8136_v19, %v22971_v62 }
 0x4d9   :  { %16772 = vmatmul.mubr.f32.gmra.mrb[42].mxu0 %v22742_v27 }
 0x4da   :  { %18881 = vmatpush3.bf16.msra.mxu0 %v22719_v9  ;;  %18985 = vmatpush3.bf16.msra.mxu1 %v22775_v10  ;;  %v8243_v26 = vand.u32 4294901760, %v22984_v33 }
 0x4db   :  { %18883 = vmatprep.subr.bf16.mxu0 %v22744_v60  ;;  %19083 = vmatprep.subr.bf16.mxu1 %v22698_v53 }
 0x4dc   :  { %16790 = vmatprep.mubr.f32.mxu0 %v22667_v16  ;;  %v8215_v16 = vand.u32 4294901760, %v8214_v50  ;;  %v8244_v43 = vsub.f32 %v22984_v33, %v8243_v26 }
 0x4dd   :  { %16923 = vmatmul.mubr.f32.vlgmr.msra.gmra.mrb[32].mxu1 %v22804_v14  ;;  %v6858_v14 = vsub.f32 %v22840_v18, %v6857_v31  ;;  %v6878_v31 = vsub.f32 %v22853_v52, %v6877_v58 }
 0x4de   :  { %18885 = vmatpush3.bf16.msra.mxu0 %v22744_v60  ;;  %19085 = vmatpush3.bf16.msra.mxu1 %v22698_v53  ;;  %v8245_v1 = vand.u32 4294901760, %v8244_v43 }
 0x4df   :  { %18887 = vmatprep.subr.bf16.mxu0 %v22775_v10  ;;  %19087 = vmatprep.subr.bf16.mxu1 %v22719_v9  ;;  %v6859_v11 = vand.u32 4294901760, %v6858_v14  ;;  %v6879_v58 = vand.u32 4294901760, %v6878_v31 }
 0x4e0   :  { %16925 = vmatprep.mubr.f32.mxu1 %v22813_v28  ;;  %v14022_v28 = vld [vmem:[%s24642_s4 + $0x50] sm:$0xff] }
 0x4e1   :  { %16926 = vmatmul.mubr.f32.gmra.mrb[34].mxu1 %v22816_v51  ;;  %v14023_v51 = vld [vmem:[%s24642_s4 + $0x58] sm:$0xff]  ;;  %v7450_v25 = vsel %vm4898_vm1, %v14022_v28, 0 }
 0x4e2   :  { %18889 = vmatpush3.bf16.msra.mxu0 %v22775_v10  ;;  %19089 = vmatpush3.bf16.msra.mxu1 %v22719_v9  ;;  %v7453_v34 = vsel %vm4898_vm1, %v14023_v51, 0  ;;  %v23060_v36 = vand.u32 4294901760, %v7450_v25 }
 0x4e3   :  { %18891 = vmatprep.subr.bf16.mxu0 %v22698_v53  ;;  %19091 = vmatprep.subr.bf16.mxu1 %v22744_v60  ;;  %v23065_v42 = vand.u32 4294901760, %v7453_v34 }
 0x4e4   :  { %17076 = vmatprep.mubr.f32.mxu1 %v8215_v16  ;;  %v23072_v48 = vsub.f32 %v7450_v25, %v23060_v36 }
 0x4e5   :  { %16791 = vmatmul.mubr.f32.vlgmr.msra.gmra.mrb[40].mxu0 %v22721_v7  ;;  %v8234_v7 = vsub.f32 %v22979_v22, %v8233_v30  ;;  %v23076_v50 = vsub.f32 %v7453_v34, %v23065_v42 }
 0x4e6   :  { %18893 = vmatpush3.bf16.msra.mxu0 %v22698_v53  ;;  %19093 = vmatpush3.bf16.msra.mxu1 %v22744_v60  ;;  %v7550_v16 = vand.u32 4294901760, %v23072_v48 }
 0x4e7   :  { %18895 = vmatprep.subr.bf16.mxu0 %v22719_v9  ;;  %19095 = vmatprep.subr.bf16.mxu1 %v22775_v10  ;;  %v8235_v13 = vand.u32 4294901760, %v8234_v7  ;;  %v7560_v41 = vand.u32 4294901760, %v23076_v50 }
 0x4e8   :  { %16793 = vmatprep.mubr.f32.mxu0 %v22731_v55  ;;  %v14021_v55 = vld [vmem:[%s24642_s4 + $0x48] sm:$0xff]  ;;  %v7551_v4 = vsub.f32 %v23072_v48, %v7550_v16 }
 0x4e9   :  { %16794 = vmatmul.mubr.f32.gmra.mrb[42].mxu0 %v22742_v27  ;;  %v23025_v27 = vsub.f32 %v7444_v2, %v23011_v38  ;;  %v7447_v32 = vsel %vm4898_vm1, %v14021_v55, 0 }
 0x4ea   :  { %18897 = vmatpush3.bf16.msra.mxu0 %v22719_v9  ;;  %19097 = vmatpush3.bf16.msra.mxu1 %v22775_v10  ;;  %v23048_v3 = vand.u32 4294901760, %v7447_v32  ;;  %v7552_v7 = vand.u32 4294901760, %v7551_v4  ;;  %v14036_v4 = vld [vmem:[%s24641_s1 + $0xc0] sm:$0xff] }
 0x4eb   :  { %18899 = vmatprep.subr.bf16.mxu0 %v22744_v60  ;;  %19099 = vmatprep.subr.bf16.mxu1 %v22716_v63  ;;  %v7530_v18 = vand.u32 4294901760, %v23025_v27 }
 0x4ec   :  { %16812 = vmatprep.mubr.f32.mxu0 %v6849_v21  ;;  %v23063_v39 = vsub.f32 %v7447_v32, %v23048_v3  ;;  %v7561_v21 = vsub.f32 %v23076_v50, %v7560_v41 }
 0x4ed   :  { %17077 = vmatmul.mubr.f32.vlgmr.msra.gmra.mrb[36].mxu1 %v8225_v47  ;;  %v7531_v52 = vsub.f32 %v23025_v27, %v7530_v18 }
 0x4ee   :  { %18901 = vmatpush3.bf16.msra.mxu0 %v22744_v60  ;;  %19101 = vmatpush3.bf16.msra.mxu1 %v22716_v63  ;;  %v7540_v19 = vand.u32 4294901760, %v23063_v39  ;;  %v7562_v47 = vand.u32 4294901760, %v7561_v21  ;;  %v9601_v21 = vand.u32 4294901760, %v14036_v4 }
 0x4ef   :  { %18903 = vmatprep.subr.bf16.mxu0 %v22775_v10  ;;  %19103 = vmatprep.subr.bf16.mxu1 %v22751_v44  ;;  %v7532_v15 = vand.u32 4294901760, %v7531_v52 }
 0x4f0   :  { %17079 = vmatprep.mubr.f32.mxu1 %v8235_v13  ;;  %v7541_v35 = vsub.f32 %v23063_v39, %v7540_v19 }
 0x4f1   :  { %17080 = vmatmul.mubr.f32.gmra.mrb[38].mxu1 %v8245_v1 }
 0x4f2   :  { %18905 = vmatpush3.bf16.msra.mxu0 %v22775_v10  ;;  %19105 = vmatpush3.bf16.msra.mxu1 %v22751_v44  ;;  %v7542_v2 = vand.u32 4294901760, %v7541_v35 }
 0x4f3   :  { %18987 = vmatprep.subr.bf16.mxu0 %v22698_v53  ;;  %19107 = vmatprep.subr.bf16.mxu1 %v22770_v59 }
 0x4f4   :  { %17098 = vmatprep.mubr.f32.mxu1 %v22924_v5 }
 0x4f5   :  { %16813 = vmatmul.mubr.f32.vlgmr.msra.gmra.mrb[44].mxu0 %v6859_v11 }
 0x4f6   :  { %18989 = vmatpush3.bf16.msra.mxu0 %v22698_v53  ;;  %19109 = vmatpush3.bf16.msra.mxu1 %v22770_v59 }
 0x4f7   :  { %18991 = vmatprep.subr.bf16.mxu0 %v22719_v9  ;;  %19111 = vmatprep.subr.bf16.mxu1 %v22797_v56 }
 0x4f8   :  { %16815 = vmatprep.mubr.f32.mxu0 %v6869_v45 }
 0x4f9   :  { %16816 = vmatmul.mubr.f32.gmra.mrb[46].mxu0 %v6879_v58 }
 0x4fa   :  { %18993 = vmatpush3.bf16.msra.mxu0 %v22719_v9  ;;  %19113 = vmatpush3.bf16.msra.mxu1 %v22797_v56 }
 0x4fb   :  { %18995 = vmatprep.subr.bf16.mxu0 %v22744_v60  ;;  %19115 = vmatprep.subr.bf16.mxu1 %v22701_v8 }
 0x4fc   :  { %16944 = vmatprep.mubr.f32.mxu0 %v7532_v15  ;;  %v14034_v15 = vld [vmem:[%s24641_s1 + $0xb0] sm:$0xff] }
 0x4fd   :  { %17099 = vmatmul.mubr.f32.vlgmr.msra.gmra.mrb[36].mxu1 %v22953_v0 }
 0x4fe   :  { %18997 = vmatpush3.bf16.msra.mxu0 %v22744_v60  ;;  %19117 = vmatpush3.bf16.msra.mxu1 %v22701_v8 }
 0x4ff   :  { %18999 = vmatprep.subr.bf16.mxu0 %v22775_v10  ;;  %19119 = vmatprep.subr.bf16.mxu1 %v22727_v12 }
 0x500   :  { %17101 = vmatprep.mubr.f32.mxu1 %v22965_v61 }
 0x501   :  { %17102 = vmatmul.mubr.f32.gmra.mrb[38].mxu1 %v22971_v62 }
 0x502   :  { %19001 = vmatpush3.bf16.msra.mxu0 %v22775_v10  ;;  %19121 = vmatpush3.bf16.msra.mxu1 %v22727_v12 }
 0x503   :  { %19003 = vmatprep.subr.bf16.mxu0 %v22716_v63  ;;  %19123 = vmatprep.subr.bf16.mxu1 %v22754_v37 }
 0x504   :  { %17120 = vmatprep.mubr.f32.mxu1 %v22936_v49 }
 0x505   :  { %16945 = vmatmul.mubr.f32.vlgmr.msra.gmra.mrb[48].mxu0 %v7542_v2  ;;  %v14037_v2 = vld [vmem:[%s24641_s1 + $0xc8] sm:$0xff] }
 0x506   :  { %19005 = vmatpush3.bf16.msra.mxu0 %v22716_v63  ;;  %19125 = vmatpush3.bf16.msra.mxu1 %v22754_v37 }
 0x507   :  { %19007 = vmatprep.subr.bf16.mxu0 %v22751_v44  ;;  %19127 = vmatprep.subr.bf16.mxu1 %v22778_v6 }
 0x508   :  { %16947 = vmatprep.mubr.f32.mxu0 %v7552_v7  ;;  %v9604_v7 = vand.u32 4294901760, %v14037_v2 }
 0x509   :  { %16948 = vmatmul.mubr.f32.gmra.mrb[50].mxu0 %v7562_v47 }
 0x50a   :  { %19009 = vmatpush3.bf16.msra.mxu0 %v22751_v44  ;;  %19129 = vmatpush3.bf16.msra.mxu1 %v22778_v6  ;;  %v23361_v47 = vpack.c.bf16 %v9604_v7, %v9601_v21 }
 0x50b   :  { %19011 = vmatprep.subr.bf16.mxu0 %v22770_v59  ;;  %19131 = vmatprep.subr.bf16.mxu1 %v22698_v53 }
 0x50c   :  { %16966 = vmatprep.mubr.f32.mxu0 %v23011_v38 }
 0x50d   :  { %17121 = vmatmul.mubr.f32.vlgmr.msra.gmra.mrb[36].mxu1 %v22969_v23  ;;  %v14030_v23 = vld [vmem:[%s24642_s4 + $0x90] sm:$0xff] }
 0x50e   :  { %19013 = vmatpush3.bf16.msra.mxu0 %v22770_v59  ;;  %19133 = vmatpush3.bf16.msra.mxu1 %v22698_v53 }
 0x50f   :  { %19015 = vmatprep.subr.bf16.mxu0 %v22797_v56  ;;  %19135 = vmatprep.subr.bf16.mxu1 %v22719_v9 }
 0x510   :  { %17123 = vmatprep.mubr.f32.mxu1 %v22979_v22 }
 0x511   :  { %17124 = vmatmul.mubr.f32.gmra.mrb[38].mxu1 %v22984_v33  ;;  %v14031_v33 = vld [vmem:[%s24642_s4 + $0x98] sm:$0xff] }
 0x512   :  { %19017 = vmatpush3.bf16.msra.mxu0 %v22797_v56  ;;  %19137 = vmatpush3.bf16.msra.mxu1 %v22719_v9  ;;  %v8819_v43 = vsel %vm4898_vm1, %v14031_v33, 0  ;;  %v23381_v33 = vsub.f32 %v14036_v4, %v9601_v21  ;;  %v14051_v4 = vld [vmem:[%s24641_s1 + $0x138] sm:$0xff] }
 0x513   :  { %19019 = vmatprep.subr.bf16.mxu0 %v22701_v8  ;;  %19139 = vmatprep.subr.bf16.mxu1 %v22744_v60  ;;  %v23244_v13 = vand.u32 4294901760, %v8819_v43  ;;  %v9646_v21 = vand.u32 4294901760, %v14051_v4 }
 0x514   :  { %17142 = vmatprep.mubr.f32.mxu1 %v8213_v40 }
 0x515   :  { %16967 = vmatmul.mubr.f32.vlgmr.msra.gmra.mrb[48].mxu0 %v23048_v3  ;;  %v8925_v32 = vsub.f32 %v8819_v43, %v23244_v13  ;;  %v14042_v43 = vld [vmem:[%s24641_s1 + $0xf0] sm:$0xff] }
 0x516   :  { %19021 = vmatpush3.bf16.msra.mxu0 %v22701_v8  ;;  %19141 = vmatpush3.bf16.msra.mxu1 %v22744_v60 }
 0x517   :  { %19023 = vmatprep.subr.bf16.mxu0 %v22727_v12  ;;  %19143 = vmatprep.subr.bf16.mxu1 %v22775_v10  ;;  %v8926_v54 = vand.u32 4294901760, %v8925_v32 }
 0x518   :  { %16969 = vmatprep.mubr.f32.mxu0 %v23060_v36 }
 0x519   :  { %16970 = vmatmul.mubr.f32.gmra.mrb[50].mxu0 %v23065_v42  ;;  %v8927_v31 = vsub.f32 %v8925_v32, %v8926_v54 }
 0x51a   :  { %19025 = vmatpush3.bf16.msra.mxu0 %v22727_v12  ;;  %19145 = vmatpush3.bf16.msra.mxu1 %v22775_v10 }
 0x51b   :  { %19027 = vmatprep.subr.bf16.mxu0 %v22754_v37  ;;  %19147 = vmatprep.subr.bf16.mxu1 %v22709_v57  ;;  %v8928_v25 = vand.u32 4294901760, %v8927_v31 }
 0x51c   :  { %16988 = vmatprep.mubr.f32.mxu0 %v23025_v27 }
 0x51d   :  { %17143 = vmatmul.mubr.f32.vlgmr.msra.gmra.mrb[36].mxu1 %v8223_v46  ;;  %v8816_v46 = vsel %vm4898_vm1, %v14030_v23, 0  ;;  %v14040_v23 = vld [vmem:[%s24641_s1 + $0xe0] sm:$0xff] }
 0x51e   :  { %19029 = vmatpush3.bf16.msra.mxu0 %v22754_v37  ;;  %19149 = vmatpush3.bf16.msra.mxu1 %v22709_v57 }
 0x51f   :  { %19031 = vmatprep.subr.bf16.mxu0 %v22778_v6  ;;  %19151 = vmatprep.subr.bf16.mxu1 %v22737_v20 }
 0x520   :  { %17145 = vmatprep.mubr.f32.mxu1 %v8233_v30 }
 0x521   :  { %17146 = vmatmul.mubr.f32.gmra.mrb[38].mxu1 %v8243_v26 }
 0x522   :  { %19033 = vmatpush3.bf16.msra.mxu0 %v22778_v6  ;;  %19153 = vmatpush3.bf16.msra.mxu1 %v22737_v20 }
 0x523   :  { %19035 = vmatprep.subr.bf16.mxu0 %v22698_v53  ;;  %19155 = vmatprep.subr.bf16.mxu1 %v22762_v24 }
 0x524   :  { %17164 = vmatprep.mubr.f32.mxu1 %v22924_v5 }
 0x525   :  { %16989 = vmatmul.mubr.f32.vlgmr.msra.gmra.mrb[48].mxu0 %v23063_v39 }
 0x526   :  { %19037 = vmatpush3.bf16.msra.mxu0 %v22698_v53  ;;  %19157 = vmatpush3.bf16.msra.mxu1 %v22762_v24 }
 0x527   :  { %19039 = vmatprep.subr.bf16.mxu0 %v22719_v9  ;;  %19159 = vmatprep.subr.bf16.mxu1 %v22786_v17 }
 0x528   :  { %16991 = vmatprep.mubr.f32.mxu0 %v23072_v48  ;;  %v14035_v48 = vld [vmem:[%s24641_s1 + $0xb8] sm:$0xff] }
 0x529   :  { %16992 = vmatmul.mubr.f32.gmra.mrb[50].mxu0 %v23076_v50  ;;  %v9598_v50 = vand.u32 4294901760, %v14035_v48 }
 0x52a   :  { %19041 = vmatpush3.bf16.msra.mxu0 %v22719_v9  ;;  %19161 = vmatpush3.bf16.msra.mxu1 %v22786_v17 }
 0x52b   :  { %19043 = vmatprep.subr.bf16.mxu0 %v22744_v60  ;;  %19163 = vmatprep.subr.bf16.mxu1 %v22698_v53 }
 0x52c   :  { %17010 = vmatprep.mubr.f32.mxu0 %v7530_v18 }
 0x52d   :  { %17165 = vmatmul.mubr.f32.vlgmr.msra.gmra.mrb[36].mxu1 %v22953_v0 }
 0x52e   :  { %19045 = vmatpush3.bf16.msra.mxu0 %v22744_v60  ;;  %19165 = vmatpush3.bf16.msra.mxu1 %v22698_v53 }
 0x52f   :  { %19047 = vmatprep.subr.bf16.mxu0 %v22775_v10  ;;  %19167 = vmatprep.subr.bf16.mxu1 %v22719_v9 }
 0x530   :  { %17167 = vmatprep.mubr.f32.mxu1 %v22965_v61 }
 0x531   :  { %17168 = vmatmul.mubr.f32.gmra.mrb[38].mxu1 %v22971_v62 }
 0x532   :  { %19049 = vmatpush3.bf16.msra.mxu0 %v22775_v10  ;;  %19169 = vmatpush3.bf16.msra.mxu1 %v22719_v9 }
 0x533   :  { %19051 = vmatprep.subr.bf16.mxu0 %v22709_v57  ;;  %19171 = vmatprep.subr.bf16.mxu1 %v22744_v60 }
 0x534   :  { %17186 = vmatprep.mubr.f32.mxu1 %v22924_v5  ;;  %v14028_v5 = vld [vmem:[%s24642_s4 + $0x80] sm:$0xff] }
 0x535   :  { %17011 = vmatmul.mubr.f32.vlgmr.msra.gmra.mrb[48].mxu0 %v7540_v19  ;;  %v8810_v49 = vsel %vm4898_vm1, %v14028_v5, 0  ;;  %v9595_v19 = vand.u32 4294901760, %v14034_v15  ;;  %v14038_v5 = vld [vmem:[%s24641_s1 + $0xd0] sm:$0xff] }
 0x536   :  { %19053 = vmatpush3.bf16.msra.mxu0 %v22709_v57  ;;  %19173 = vmatpush3.bf16.msra.mxu1 %v22744_v60  ;;  %v23208_v40 = vand.u32 4294901760, %v8810_v49 }
 0x537   :  { %19055 = vmatprep.subr.bf16.mxu0 %v22737_v20  ;;  %19175 = vmatprep.subr.bf16.mxu1 %v22775_v10  ;;  %v23349_v35 = vsub.f32 %v14034_v15, %v9595_v19 }
 0x538   :  { %17013 = vmatprep.mubr.f32.mxu0 %v7550_v16  ;;  %v23347_v16 = vpack.c.bf16 %v9598_v50, %v9595_v19 }
 0x539   :  { %17014 = vmatmul.mubr.f32.gmra.mrb[50].mxu0 %v7560_v41  ;;  %v23351_v41 = vsub.f32 %v14035_v48, %v9598_v50  ;;  %v14050_v50 = vld [vmem:[%s24641_s1 + $0x130] sm:$0xff] }
 0x53a   :  { %19057 = vmatpush3.bf16.msra.mxu0 %v22737_v20  ;;  %19177 = vmatpush3.bf16.msra.mxu1 %v22775_v10 }
 0x53b   :  { %19059 = vmatprep.subr.bf16.mxu0 %v22762_v24  ;;  %17032 = vmatprep.mubr.f32.mxu0 %v23011_v38 }
 0x53c   :  { %19274 = vmatprep.subr.bf16.mxu1 %v24985_v29 }
 0x53d   :  { %17187 = vmatmul.mubr.f32.vlgmr.msra.gmra.mrb[36].mxu1 %v22953_v0  ;;  %v23215_v0 = vsub.f32 %v8810_v49, %v23208_v40  ;;  %v14039_v49 = vld [vmem:[%s24641_s1 + $0xd8] sm:$0xff] }
 0x53e   :  { %19061 = vmatpush3.bf16.msra.mxu0 %v22762_v24  ;;  %17189 = vmatprep.mubr.f32.mxu1 %v22965_v61  ;;  %v14029_v61 = vld [vmem:[%s24642_s4 + $0x88] sm:$0xff] }
 0x53f   :  { %19063 = vmatprep.subr.bf16.mxu0 %v22786_v17  ;;  %v8813_v22 = vsel %vm4898_vm1, %v14029_v61, 0 }
 0x540   :  { %v23232_v30 = vand.u32 4294901760, %v8813_v22 }
 0x541   :  { %17190 = vmatmul.mubr.f32.gmra.mrb[38].mxu1 %v22971_v62  ;;  %v8896_v62 = vand.u32 4294901760, %v23215_v0 }
 0x542   :  { %19065 = vmatpush3.bf16.msra.mxu0 %v22786_v17  ;;  %v8905_v55 = vsub.f32 %v8813_v22, %v23232_v30  ;;  %v9613_v22 = vand.u32 4294901760, %v14040_v23 }
 0x543   :  { %19067 = vmatprep.subr.bf16.mxu0 %v22698_v53  ;;  %v8897_v26 = vsub.f32 %v23215_v0, %v8896_v62 }
 0x544   :  { %v8906_v1 = vand.u32 4294901760, %v8905_v55 }
 0x545   :  { %17033 = vmatmul.mubr.f32.vlgmr.msra.gmra.mrb[48].mxu0 %v23048_v3  ;;  %v8898_v27 = vand.u32 4294901760, %v8897_v26 }
 0x546   :  { %19069 = vmatpush3.bf16.msra.mxu0 %v22698_v53  ;;  %17035 = vmatprep.mubr.f32.mxu0 %v23060_v36  ;;  %v8907_v51 = vsub.f32 %v8905_v55, %v8906_v1 }
 0x547   :  { %19071 = vmatprep.subr.bf16.mxu0 %v22719_v9 }
 0x548   :  { %v8908_v11 = vand.u32 4294901760, %v8907_v51 }
 0x549   :  { %17036 = vmatmul.mubr.f32.gmra.mrb[50].mxu0 %v23065_v42 }
 0x54a   :  { %19073 = vmatpush3.bf16.msra.mxu0 %v22719_v9  ;;  %17054 = vmatprep.mubr.f32.mxu0 %v23011_v38  ;;  %v23238_v38 = vand.u32 4294901760, %v8816_v46 }
 0x54b   :  { %19075 = vmatprep.subr.bf16.mxu0 %v22744_v60 }
 0x54c   :  { %v8915_v14 = vsub.f32 %v8816_v46, %v23238_v38 }
 0x54e   :  { %19077 = vmatpush3.bf16.msra.mxu0 %v22744_v60  ;;  %v8916_v28 = vand.u32 4294901760, %v8915_v14 }
 0x54f   :  { %19079 = vmatprep.subr.bf16.mxu0 %v22775_v10 }
 0x550   :  { %v8917_v18 = vsub.f32 %v8915_v14, %v8916_v28 }
 0x552   :  { %19081 = vmatpush3.bf16.msra.mxu0 %v22775_v10 }
 0x553   :  { %19179 = vmatprep.subr.bf16.mxu0 %v22698_v53 }
 0x555   :  { %17055 = vmatmul.mubr.f32.vlgmr.msra.gmra.mrb[48].mxu0 %v23048_v3  ;;  %v8918_v3 = vand.u32 4294901760, %v8917_v18 }
 0x556   :  { %19181 = vmatpush3.bf16.msra.mxu0 %v22698_v53  ;;  %17057 = vmatprep.mubr.f32.mxu0 %v23060_v36 }
 0x557   :  { %19183 = vmatprep.subr.bf16.mxu0 %v22719_v9 }
 0x559   :  { %17058 = vmatmul.mubr.f32.gmra.mrb[50].mxu0 %v23065_v42 }
 0x55a   :  { %19185 = vmatpush3.bf16.msra.mxu0 %v22719_v9  ;;  %17208 = vmatprep.mubr.f32.mxu0 %v8898_v27  ;;  %v9619_v27 = vand.u32 4294901760, %v14042_v43 }
 0x55b   :  { %19187 = vmatprep.subr.bf16.mxu0 %v22744_v60 }
 0x55e   :  { %19189 = vmatpush3.bf16.msra.mxu0 %v22744_v60 }
 0x55f   :  { %19191 = vmatprep.subr.bf16.mxu0 %v22775_v10 }
 0x562   :  { %19193 = vmatpush3.bf16.msra.mxu0 %v22775_v10 }
 0x563   :  { %19195 = vmatprep.subr.bf16.mxu0 %v22716_v63 }
 0x565   :  { %17209 = vmatmul.mubr.f32.vlgmr.msra.gmra.mrb[52].mxu0 %v8908_v11  ;;  %v23410_v11 = vsub.f32 %v14042_v43, %v9619_v27 }
 0x566   :  { %19197 = vmatpush3.bf16.msra.mxu0 %v22716_v63  ;;  %17211 = vmatprep.mubr.f32.mxu0 %v8918_v3  ;;  %v14044_v3 = vld [vmem:[%s24641_s1 + $0x100] sm:$0xff] }
 0x567   :  { %19199 = vmatprep.subr.bf16.mxu0 %v22751_v44 }
 0x569   :  { %17212 = vmatmul.mubr.f32.gmra.mrb[54].mxu0 %v8928_v25  ;;  %v14045_v25 = vld [vmem:[%s24641_s1 + $0x108] sm:$0xff] }
 0x56a   :  { %19201 = vmatpush3.bf16.msra.mxu0 %v22751_v44  ;;  %17230 = vmatprep.mubr.f32.mxu0 %v23208_v40  ;;  %v14032_v44 = vld [vmem:[%s24641_s1 + $0xa0] sm:$0xff] }
 0x56b   :  { %19203 = vmatprep.subr.bf16.mxu0 %v22770_v59 }
 0x56e   :  { %19205 = vmatpush3.bf16.msra.mxu0 %v22770_v59 }
 0x56f   :  { %19207 = vmatprep.subr.bf16.mxu0 %v22797_v56 }
 0x572   :  { %19209 = vmatpush3.bf16.msra.mxu0 %v22797_v56 }
 0x573   :  { %19211 = vmatprep.subr.bf16.mxu0 %v22701_v8 }
 0x575   :  { %17231 = vmatmul.mubr.f32.vlgmr.msra.gmra.mrb[52].mxu0 %v23232_v30 }
 0x576   :  { %19213 = vmatpush3.bf16.msra.mxu0 %v22701_v8  ;;  %17233 = vmatprep.mubr.f32.mxu0 %v23238_v38 }
 0x577   :  { %19215 = vmatprep.subr.bf16.mxu0 %v22727_v12 }
 0x579   :  { %17234 = vmatmul.mubr.f32.gmra.mrb[54].mxu0 %v23244_v13 }
 0x57a   :  { %19217 = vmatpush3.bf16.msra.mxu0 %v22727_v12  ;;  %17252 = vmatprep.mubr.f32.mxu0 %v23215_v0  ;;  %v9610_v0 = vand.u32 4294901760, %v14039_v49 }
 0x57b   :  { %19219 = vmatprep.subr.bf16.mxu0 %v22754_v37 }
 0x57e   :  { %19221 = vmatpush3.bf16.msra.mxu0 %v22754_v37  ;;  %v14033_v37 = vld [vmem:[%s24641_s1 + $0xa8] sm:$0xff] }
 0x57f   :  { %19223 = vmatprep.subr.bf16.mxu0 %v22778_v6  ;;  %v9592_v59 = vand.u32 4294901760, %v14033_v37 }
 0x582   :  { %19225 = vmatpush3.bf16.msra.mxu0 %v22778_v6 }
 0x583   :  { %19227 = vmatprep.subr.bf16.mxu0 %v22698_v53 }
 0x585   :  { %17253 = vmatmul.mubr.f32.vlgmr.msra.gmra.mrb[52].mxu0 %v8905_v55  ;;  %v14043_v55 = vld [vmem:[%s24641_s1 + $0xf8] sm:$0xff] }
 0x586   :  { %19229 = vmatpush3.bf16.msra.mxu0 %v22698_v53  ;;  %17255 = vmatprep.mubr.f32.mxu0 %v8915_v14  ;;  %v9622_v14 = vand.u32 4294901760, %v14043_v55 }
 0x587   :  { %19231 = vmatprep.subr.bf16.mxu0 %v22719_v9 }
 0x588   :  { %v23408_v18 = vpack.c.bf16 %v9622_v14, %v9619_v27  ;;  %v23412_v31 = vsub.f32 %v14043_v55, %v9622_v14 }
 0x589   :  { %17256 = vmatmul.mubr.f32.gmra.mrb[54].mxu0 %v8925_v32  ;;  %v23400_v32 = vsub.f32 %v14039_v49, %v9610_v0 }
 0x58a   :  { %19233 = vmatpush3.bf16.msra.mxu0 %v22719_v9  ;;  %17274 = vmatprep.mubr.f32.mxu0 %v8896_v62  ;;  %v14041_v62 = vld [vmem:[%s24641_s1 + $0xe8] sm:$0xff]  ;;  %25008 = vst [vmem:[#allocation23_spill] sm:$0xff] %v23408_v18 }
 0x58b   :  { %19235 = vmatprep.subr.bf16.mxu0 %v22744_v60  ;;  %v9616_v46 = vand.u32 4294901760, %v14041_v62 }
 0x58d   :  { %v23385_v26 = vpack.c.bf16 %v9616_v46, %v9613_v22  ;;  %v23404_v51 = vsub.f32 %v14041_v62, %v9616_v46  ;;  %v24774_v46 = vand.u32 4294901760, %v23351_v41 }
 0x58e   :  { %19237 = vmatpush3.bf16.msra.mxu0 %v22744_v60 }
 0x58f   :  { %19239 = vmatprep.subr.bf16.mxu0 %v22775_v10 }
 0x592   :  { %19241 = vmatpush3.bf16.msra.mxu0 %v22775_v10 }
 0x593   :  { %19243 = vmatprep.subr.bf16.mxu0 %v22709_v57 }
 0x595   :  { %17275 = vmatmul.mubr.f32.vlgmr.msra.gmra.mrb[52].mxu0 %v8906_v1 }
 0x596   :  { %19245 = vmatpush3.bf16.msra.mxu0 %v22709_v57  ;;  %17277 = vmatprep.mubr.f32.mxu0 %v8916_v28  ;;  %v23402_v28 = vsub.f32 %v14040_v23, %v9613_v22  ;;  %v24775_v22 = vand.u32 4294901760, %v23349_v35 }
 0x597   :  { %19247 = vmatprep.subr.bf16.mxu0 %v22737_v20 }
 0x599   :  { %17278 = vmatmul.mubr.f32.gmra.mrb[54].mxu0 %v8926_v54 }
 0x59a   :  { %19249 = vmatpush3.bf16.msra.mxu0 %v22737_v20  ;;  %17296 = vmatprep.mubr.f32.mxu0 %v23208_v40 }
 0x59b   :  { %19251 = vmatprep.subr.bf16.mxu0 %v22762_v24 }
 0x59e   :  { %19253 = vmatpush3.bf16.msra.mxu0 %v22762_v24  ;;  %v9589_v24 = vand.u32 4294901760, %v14032_v44 }
 0x59f   :  { %19255 = vmatprep.subr.bf16.mxu0 %v22786_v17 }
 0x5a0   :  { %v23328_v6 = vsub.f32 %v14032_v44, %v9589_v24 }
 0x5a2   :  { %19257 = vmatpush3.bf16.msra.mxu0 %v22786_v17  ;;  %v23330_v17 = vsub.f32 %v14033_v37, %v9592_v59 }
 0x5a3   :  { %19259 = vmatprep.subr.bf16.mxu0 %v22698_v53 }
 0x5a5   :  { %17297 = vmatmul.mubr.f32.vlgmr.msra.gmra.mrb[52].mxu0 %v23232_v30 }
 0x5a6   :  { %19261 = vmatpush3.bf16.msra.mxu0 %v22698_v53  ;;  %17299 = vmatprep.mubr.f32.mxu0 %v23238_v38 }
 0x5a7   :  { %19263 = vmatprep.subr.bf16.mxu0 %v22719_v9 }
 0x5a9   :  { %17300 = vmatmul.mubr.f32.gmra.mrb[54].mxu0 %v23244_v13 }
 0x5aa   :  { %19265 = vmatpush3.bf16.msra.mxu0 %v22719_v9  ;;  %17318 = vmatprep.mubr.f32.mxu0 %v23208_v40  ;;  %v9607_v40 = vand.u32 4294901760, %v14038_v5 }
 0x5ab   :  { %19267 = vmatprep.subr.bf16.mxu0 %v22744_v60 }
 0x5ac   :  { %v23371_v61 = vpack.c.bf16 %v9610_v0, %v9607_v40  ;;  %v23398_v1 = vsub.f32 %v14038_v5, %v9607_v40  ;;  %v24776_v5 = vand.u32 4294901760, %v23330_v17 }
 0x5ae   :  { %19269 = vmatpush3.bf16.msra.mxu0 %v22744_v60  ;;  %v9744_v0 = vsub.f32 %v23330_v17, %v24776_v5 }
 0x5af   :  { %19271 = vmatprep.subr.bf16.mxu0 %v22775_v10 }
 0x5b0   :  { %v16924_v8 = vpop.f32.mrb[32].mxu1  ;;  %v9745_v62 = vand.u32 4294901760, %v9744_v0  ;;  %v24771_v0 = vand.u32 4294901760, %v23398_v1 }
 0x5b1   :  { %v7416_v57 = vpop.f32.mrb[33].mxu1 }
 0x5b2   :  { %19273 = vmatpush3.bf16.msra.mxu0 %v22775_v10  ;;  %v23326_v10 = vpack.c.bf16 %v9592_v59, %v9589_v24  ;;  %v14046_v24 = vld [vmem:[%s24641_s1 + $0x110] sm:$0xff]  ;;  %v14047_v59 = vld [vmem:[%s24641_s1 + $0x118] sm:$0xff] }
 0x5b4   :  { %v16927_v53 = vpop.f32.mrb[34].mxu1  ;;  %19276 = vmatpush1.bf16.msra.mxu1 %v23326_v10 }
 0x5b5   :  { %v7428_v63 = vpop.f32.mrb[35].mxu1  ;;  %17319 = vmatmul.mubr.f32.vlgmr.msra.gmra.mrb[52].mxu0 %v23232_v30  ;;  %19277 = vmatprep.subr.bf16.mxu1 %v24985_v29  ;;  %v23383_v30 = vsub.f32 %v14037_v2, %v9604_v7  ;;  %v9643_v2 = vand.u32 4294901760, %v14050_v50  ;;  %v24777_v7 = vand.u32 4294901760, %v23328_v6 }
 0x5b6   :  { %17321 = vmatprep.mubr.f32.mxu0 %v23238_v38 }
 0x5b7   :  { %v23460_v49 = vpack.c.bf16 %v9646_v21, %v9643_v2  ;;  %v9737_v40 = vsub.f32 %v23328_v6, %v24777_v7 }
 0x5b8   :  { %v23311_v12 = vpop.f32.mrb[40].mxu0  ;;  %19279 = vmatpush1.bf16.msra.mxu1 %v23347_v16 }
 0x5b9   :  { %v23313_v9 = vpop.f32.mrb[41].mxu0  ;;  %17322 = vmatmul.mubr.f32.gmra.mrb[54].mxu0 %v23244_v13  ;;  %19280 = vmatprep.subr.bf16.mxu1 %v24985_v29  ;;  %25012 = vst [vmem:[#allocation27_spill] sm:$0xff] %v23460_v49  ;;  %v9738_v23 = vand.u32 4294901760, %v9737_v40 }
 0x5bc   :  { %v23316_v20 = vpop.f32.mrb[42].mxu0  ;;  %19282 = vmatpush1.bf16.msra.mxu1 %v23361_v47 }
 0x5bd   :  { %v23318_v60 = vpop.f32.mrb[43].mxu0  ;;  %19283 = vmatprep.subr.bf16.mxu1 %v24985_v29 }
 0x5c0   :  { %19285 = vmatpush1.bf16.msra.mxu1 %v23371_v61 }
 0x5c1   :  { %19286 = vmatprep.subr.bf16.mxu1 %v24985_v29 }
 0x5c4   :  { %19288 = vmatpush1.bf16.msra.mxu1 %v23385_v26 }
 0x5c5   :  { %19289 = vmatprep.subr.bf16.mxu1 %v24985_v29 }
 0x5c8   :  { %v16814_v56 = vpop.f32.mrb[44].mxu0  ;;  %19291 = vmatpush1.bf16.msra.mxu1 %v23408_v18 }
 0x5c9   :  { %v23334_v34 = vadd.f32 %v16924_v8, %v16814_v56  ;;  %v6851_v45 = vpop.f32.mrb[45].mxu0  ;;  %19292 = vmatprep.subr.bf16.mxu1 %v24985_v29  ;;  %v9631_v56 = vand.u32 4294901760, %v14046_v24 }
 0x5ca   :  { %v19891_v52 = vadd.f32 %v7416_v57, %v6851_v45  ;;  %v9625_v57 = vand.u32 4294901760, %v14044_v3  ;;  %v9634_v45 = vand.u32 4294901760, %v14047_v59 }
 0x5cb   :  { %v23471_v43 = vsub.f32 %v14046_v24, %v9631_v56 }
 0x5cc   :  { %9491 = vrot.lane.b32.xlu0 %v19891_v52, %s20374_s8  ;;  %v16817_v36 = vpop.f32.mrb[46].mxu0  ;;  %v23426_v44 = vsub.f32 %v14044_v3, %v9625_v57  ;;  %v23438_v52 = vpack.c.bf16 %v9634_v45, %v9631_v56  ;;  %v23473_v55 = vsub.f32 %v14047_v59, %v9634_v45  ;;  %v23480_v3 = vsub.f32 %v14050_v50, %v9643_v2 }
 0x5cd   :  { %v23337_v58 = vadd.f32 %v16927_v53, %v16817_v36  ;;  %v6871_v39 = vpop.f32.mrb[47].mxu0  ;;  %v9628_v53 = vand.u32 4294901760, %v14045_v25  ;;  %v14048_v36 = vld [vmem:[%s24641_s1 + $0x120] sm:$0xff]  ;;  %v9758_v59 = vsub.f32 %v23351_v41, %v24774_v46  ;;  %v24773_v45 = vand.u32 4294901760, %v23381_v33 }
 0x5ce   :  { %v23339_v42 = vadd.f32 %v7428_v63, %v6871_v39  ;;  %25010 = vst [vmem:[#allocation25_spill] sm:$0xff] %v23438_v52  ;;  %v14049_v39 = vld [vmem:[%s24641_s1 + $0x128] sm:$0xff]  ;;  %v9637_v15 = vand.u32 4294901760, %v14048_v36 }
 0x5cf   :  { %v23424_v63 = vpack.c.bf16 %v9628_v53, %v9625_v57  ;;  %v23428_v37 = vsub.f32 %v14045_v25, %v9628_v53  ;;  %v9640_v48 = vand.u32 4294901760, %v14049_v39  ;;  %v23482_v25 = vsub.f32 %v14051_v4, %v9646_v21 }
 0x5d0   :  { %v23484_v57 = vpack.c.bf16 %v9745_v62, %v9738_v23  ;;  %v9751_v53 = vsub.f32 %v23349_v35, %v24775_v22  ;;  %v24770_v23 = vand.u32 4294901760, %v23400_v32 }
 0x5d1   :  { %25009 = vst [vmem:[#allocation24_spill] sm:$0xff] %v23424_v63  ;;  %19294 = vmatpush1.bf16.msra.mxu1 %v23424_v63  ;;  %v23448_v19 = vpack.c.bf16 %v9640_v48, %v9637_v15  ;;  %v23477_v27 = vsub.f32 %v14049_v39, %v9640_v48  ;;  %v9759_v39 = vand.u32 4294901760, %v9758_v59  ;;  %v9765_v48 = vsub.f32 %v23381_v33, %v24773_v45 }
 0x5d2   :  { %19295 = vmatprep.subr.bf16.mxu1 %v24985_v29  ;;  %v9752_v56 = vand.u32 4294901760, %v9751_v53  ;;  %v24765_v59 = vand.u32 4294901760, %v23404_v51 }
 0x5d3   :  { %25011 = vst [vmem:[#allocation26_spill] sm:$0xff] %v23448_v19  ;;  %v9766_v21 = vand.u32 4294901760, %v9765_v48 }
 0x5d4   :  { %v23504_v2 = vpack.c.bf16 %v9759_v39, %v9752_v56  ;;  %v9800_v48 = vsub.f32 %v23404_v51, %v24765_v59 }
 0x5d5   :  { %19297 = vmatpush1.bf16.msra.mxu1 %v23438_v52 }
 0x5d6   :  { %19298 = vmatprep.subr.bf16.mxu1 %v24985_v29 }
 0x5d9   :  { %19300 = vmatpush1.bf16.msra.mxu1 %v23448_v19 }
 0x5da   :  { %19301 = vmatprep.subr.bf16.mxu1 %v24985_v29 }
 0x5dd   :  { %19303 = vmatpush1.bf16.msra.mxu1 %v23460_v49 }
 0x5de   :  { %19304 = vmatprep.subr.bf16.mxu1 %v24985_v29 }
 0x610   :  { %v23387_v38 = vpop.f32.mrb[36].mxu1 }
 0x611   :  { %v8782_v13 = vpop.f32.mrb[37].mxu1 }
 0x612   :  { %9523 = vrot.lane.b32.xlu0 %v8782_v13, %s20375_s3  ;;  %v23475_v13 = vsub.f32 %v14048_v36, %v9637_v15  ;;  %v24772_v36 = vand.u32 4294901760, %v23383_v30 }
 0x614   :  { %v23406_v54 = vpop.f32.mrb[38].mxu1  ;;  %v9772_v50 = vsub.f32 %v23383_v30, %v24772_v36 }
 0x615   :  { %v23420_v8 = vpop.f32.mrb[39].mxu1 }
 0x616   :  { %v9773_v40 = vand.u32 4294901760, %v9772_v50  ;;  %v24762_v50 = vand.u32 4294901760, %v23410_v11 }
 0x618   :  { %v23510_v62 = vpack.c.bf16 %v9773_v40, %v9766_v21  ;;  %v24758_v21 = vand.u32 4294901760, %v23412_v31 }
 0x628   :  { %v17056_v14 = vpop.f32.mrb[48].mxu0 }
 0x629   :  { %9509 = vrot.lane.b32.xlu0 %v17056_v14, %s20376_s11  ;;  %v8099_v24 = vpop.f32.mrb[49].mxu0  ;;  %v9779_v14 = vsub.f32 %v23398_v1, %v24771_v0 }
 0x62a   :  { %9507 = vrot.lane.b32.xlu1 %v8099_v24, %s20376_s11  ;;  %v24766_v24 = vand.u32 4294901760, %v23402_v28 }
 0x62c   :  { %v17059_v15 = vpop.f32.mrb[50].mxu0  ;;  %v9793_v39 = vsub.f32 %v23402_v28, %v24766_v24 }
 0x62d   :  { %v8111_v4 = vpop.f32.mrb[51].mxu0  ;;  %9495 = vrot.lane.b32.xlu0 %v23339_v42, %s20374_s8  ;;  %v9786_v42 = vsub.f32 %v23400_v32, %v24770_v23 }
 0x62e   :  { %9493 = vrot.lane.b32.xlu1 %v23334_v34, %s20374_s8  ;;  %v9780_v34 = vand.u32 4294901760, %v9779_v14  ;;  %v9807_v14 = vsub.f32 %v23410_v11, %v24762_v50 }
 0x62f   :  { %v9787_v53 = vand.u32 4294901760, %v9786_v42  ;;  %v9814_v42 = vsub.f32 %v23412_v31, %v24758_v21 }
 0x631   :  { %9527 = vrot.lane.b32.xlu0 %v23420_v8, %s20375_s3  ;;  %v23524_v56 = vpack.c.bf16 %v9787_v53, %v9780_v34  ;;  %v9801_v8 = vand.u32 4294901760, %v9800_v48  ;;  %v24760_v34 = vand.u32 4294901760, %v23426_v44  ;;  %v24759_v53 = vand.u32 4294901760, %v23428_v37 }
 0x632   :  { %9525 = vrot.lane.b32.xlu1 %v23387_v38, %s20375_s3  ;;  %v9794_v38 = vand.u32 4294901760, %v9793_v39 }
 0x633   :  { %v9821_v48 = vsub.f32 %v23426_v44, %v24760_v34 }
 0x634   :  { %v23536_v40 = vpack.c.bf16 %v9801_v8, %v9794_v38  ;;  %v9828_v38 = vsub.f32 %v23428_v37, %v24759_v53 }
 0x635   :  { %9513 = vrot.lane.b32.xlu0 %v17059_v15, %s20376_s11  ;;  %v9808_v15 = vand.u32 4294901760, %v9807_v14  ;;  %v24761_v14 = vand.u32 4294901760, %v23471_v43 }
 0x636   :  { %9511 = vrot.lane.b32.xlu1 %v8111_v4, %s20376_s11  ;;  %v9815_v4 = vand.u32 4294901760, %v9814_v42  ;;  %v9829_v8 = vand.u32 4294901760, %v9828_v38  ;;  %v24763_v42 = vand.u32 4294901760, %v23473_v55 }
 0x638   :  { %v23548_v39 = vpack.c.bf16 %v9815_v4, %v9808_v15  ;;  %v9835_v15 = vsub.f32 %v23471_v43, %v24761_v14  ;;  %v9842_v4 = vsub.f32 %v23473_v55, %v24763_v42  ;;  %v24767_v42 = vand.u32 4294901760, %v23480_v3 }
 0x63a   :  { %9497 = vrot.lane.b32.xlu1 %v23337_v58, %s20374_s8  ;;  %v9822_v58 = vand.u32 4294901760, %v9821_v48  ;;  %v9836_v53 = vand.u32 4294901760, %v9835_v15  ;;  %v9843_v34 = vand.u32 4294901760, %v9842_v4  ;;  %v24769_v48 = vand.u32 4294901760, %v23477_v27 }
 0x63b   :  { %v24768_v15 = vand.u32 4294901760, %v23482_v25 }
 0x63c   :  { %v23560_v21 = vpack.c.bf16 %v9829_v8, %v9822_v58  ;;  %v23570_v38 = vpack.c.bf16 %v9843_v34, %v9836_v53  ;;  %v9856_v8 = vsub.f32 %v23477_v27, %v24769_v48  ;;  %v9863_v34 = vsub.f32 %v23480_v3, %v24767_v42 }
 0x63d   :  { %v9870_v53 = vsub.f32 %v23482_v25, %v24768_v15 }
 0x63e   :  { %9529 = vrot.lane.b32.xlu1 %v23406_v54, %s20375_s3  ;;  %v24764_v54 = vand.u32 4294901760, %v23475_v13  ;;  %v9857_v50 = vand.u32 4294901760, %v9856_v8 }
 0x63f   :  { %v9871_v59 = vand.u32 4294901760, %v9870_v53 }
 0x640   :  { %v9849_v58 = vsub.f32 %v23475_v13, %v24764_v54  ;;  %v9864_v54 = vand.u32 4294901760, %v9863_v34 }
 0x642   :  { %v9850_v14 = vand.u32 4294901760, %v9849_v58  ;;  %v23588_v24 = vpack.c.bf16 %v9871_v59, %v9864_v54  ;;  %v9492_v54 = vpop.permute.xlu0 %9491 }
 0x643   :  { %v9535_v34 = vsel %vm4889_vm0, %v23313_v9, %v9492_v54 }
 0x644   :  { %v23580_v4 = vpack.c.bf16 %v9857_v50, %v9850_v14 }
 0x688   :  { %v17320_v48 = vpop.f32.mrb[52].mxu0 }
 0x689   :  { %v9465_v23 = vpop.f32.mrb[53].mxu0  ;;  %v9580_v15 = vsel %vm4889_vm0, %v17320_v48, 0 }
 0x68a   :  { %v9577_v0 = vsel %vm4889_vm0, %v9465_v23, 0  ;;  %v23621_v59 = vand.u32 4294901760, %v9580_v15  ;;  %v9524_v23 = vpop.permute.xlu0 %9523 }
 0x68b   :  { %v23611_v36 = vand.u32 4294901760, %v9577_v0 }
 0x68c   :  { %v17323_v45 = vpop.f32.mrb[54].mxu0 }
 0x68d   :  { %v23614_v46 = vsub.f32 %v9577_v0, %v23611_v36  ;;  %v9477_v22 = vpop.f32.mrb[55].mxu0  ;;  %v23626_v0 = vsub.f32 %v9580_v15, %v23621_v59  ;;  %v9586_v9 = vsel %vm4889_vm0, %v17323_v45, 0 }
 0x68e   :  { %v9583_v42 = vsel %vm4889_vm0, %v9477_v22, 0 }
 0x68f   :  { %v24778_v5 = vand.u32 4294901760, %v23614_v46  ;;  %v23631_v8 = vand.u32 4294901760, %v9583_v42  ;;  %v25013_v49 = vand.u32 4294901760, %v23626_v0 }
 0x691   :  { %v9675_v7 = vsub.f32 %v23614_v46, %v24778_v5  ;;  %v23643_v54 = vsub.f32 %v9583_v42, %v23631_v8  ;;  %v9690_v45 = vsub.f32 %v23626_v0, %v25013_v49 }
 0x693   :  { %v9676_v53 = vand.u32 4294901760, %v9675_v7  ;;  %v9691_v63 = vand.u32 4294901760, %v9690_v45 }
 0x695   :  { %9677 = vmatprep.mubr.f32.mxu1 %v9676_v53 }
 0x69b   :  { %v9510_v50 = vpop.permute.xlu0 %9509 }
 0x69c   :  { %v9508_v14 = vpop.permute.xlu1 %9507 }
 0x69d   :  { %v9539_v5 = vsel %vm4898_vm1, %v9535_v34, %v9508_v14  ;;  %v23646_v34 = vand.u32 4294901760, %v9586_v9 }
 0x69e   :  { %v9543_v7 = vsel %vm4907_vm2, %v9539_v5, %v9524_v23 }
 0x69f   :  { %v23633_v48 = vand.u32 4294901760, %v9543_v7  ;;  %v9496_v14 = vpop.permute.xlu0 %9495  ;;  %v23660_v52 = vsub.f32 %v9586_v9, %v23646_v34 }
 0x6a0   :  { %v9494_v58 = vpop.permute.xlu1 %9493 }
 0x6a1   :  { %v23638_v15 = vsub.f32 %v9543_v7, %v23633_v48  ;;  %v9536_v22 = vsel %vm4889_vm0, %v23311_v12, %v9494_v58  ;;  %v24790_v58 = vand.u32 4294901760, %v23643_v54 }
 0x6a2   :  { %v9540_v23 = vsel %vm4898_vm1, %v9536_v22, %v9510_v50  ;;  %v9537_v50 = vsel %vm4889_vm0, %v23318_v60, %v9496_v14  ;;  %v9719_v14 = vand.u32 4294901760, %v23660_v52 }
 0x6a3   :  { %v24789_v5 = vand.u32 4294901760, %v23638_v15  ;;  %v9528_v18 = vpop.permute.xlu0 %9527  ;;  %v9705_v60 = vsub.f32 %v23643_v54, %v24790_v58 }
 0x6a4   :  { %v9526_v53 = vpop.permute.xlu1 %9525 }
 0x6a5   :  { %v9681_v7 = vsub.f32 %v23638_v15, %v24789_v5  ;;  %v9544_v12 = vsel %vm4907_vm2, %v9540_v23, %v9526_v53 }
 0x6a6   :  { %v23656_v42 = vand.u32 4294901760, %v9544_v12 }
 0x6a7   :  { %v9682_v19 = vand.u32 4294901760, %v9681_v7  ;;  %v9706_v7 = vand.u32 4294901760, %v9705_v60 }
 0x6a8   :  { %v23665_v22 = vsub.f32 %v9544_v12, %v23656_v42  ;;  %v9512_v49 = vpop.permute.xlu1 %9511 }
 0x6a9   :  { %v9541_v5 = vsel %vm4898_vm1, %v9537_v50, %v9512_v49  ;;  %9683 = vmatmul.mubr.f32.vlgmr.msra.gmra.mrb[40].mxu1 %v9682_v19 }
 0x6aa   :  { %v9545_v53 = vsel %vm4907_vm2, %v9541_v5, %v9528_v18  ;;  %19306 = vmatpush1.bf16.msra.mxu1 %v23484_v57  ;;  %9692 = vmatprep.mubr.f32.mxu1 %v9691_v63  ;;  %v9695_v9 = vand.u32 4294901760, %v23665_v22  ;;  %v9514_v5 = vpop.permute.xlu0 %9513 }
 0x6ab   :  { %v23671_v23 = vand.u32 4294901760, %v9545_v53  ;;  %19307 = vmatprep.subr.bf16.mxu1 %v24985_v29 }
 0x6ac   :  { %v9498_v45 = vpop.permute.xlu1 %9497  ;;  %v9696_v18 = vsub.f32 %v23665_v22, %v9695_v9 }
 0x6ad   :  { %v23682_v19 = vsub.f32 %v9545_v53, %v23671_v23  ;;  %v9538_v63 = vsel %vm4889_vm0, %v23316_v20, %v9498_v45  ;;  %v9720_v53 = vsub.f32 %v23660_v52, %v9719_v14 }
 0x6ae   :  { %19309 = vmatpush1.bf16.msra.mxu1 %v23504_v2  ;;  %v9697_v57 = vand.u32 4294901760, %v9696_v18  ;;  %v9542_v49 = vsel %vm4898_vm1, %v9538_v63, %v9514_v5  ;;  %v25022_v5 = vpack.c.bf16 %v23477_v27, %v23475_v13 }
 0x6af   :  { %19310 = vmatprep.subr.bf16.mxu1 %v24985_v29  ;;  %v9710_v12 = vand.u32 4294901760, %v23682_v19  ;;  %v9721_v18 = vand.u32 4294901760, %v9720_v53  ;;  %v25026_v53 = vld [vmem:[#allocation24_spill] sm:$0xff] }
 0x6b0   :  { %v9530_v50 = vpop.permute.xlu1 %9529  ;;  %9698 = vmatmul.mubr.f32.gmra.mrb[42].mxu1 %v9697_v57 }
 0x6b1   :  { %v9546_v58 = vsel %vm4907_vm2, %v9542_v49, %v9530_v50  ;;  %9707 = vmatprep.mubr.f32.mxu1 %v9706_v7  ;;  %v9711_v20 = vsub.f32 %v23682_v19, %v9710_v12  ;;  %v25023_v7 = vpack.c.bf16 %v23482_v25, %v23480_v3  ;;  %v25024_v50 = vand.u32 4294901760, %v23614_v46  ;;  %v25025_v49 = vld [vmem:[#allocation23_spill] sm:$0xff] }
 0x6b2   :  { %v23697_v2 = vand.u32 4294901760, %v9546_v58  ;;  %19312 = vmatpush1.bf16.msra.mxu1 %v23510_v62 }
 0x6b3   :  { %19313 = vmatprep.subr.bf16.mxu1 %v24985_v29  ;;  %v9712_v60 = vand.u32 4294901760, %v9711_v20  ;;  %v25027_v20 = vld [vmem:[#allocation25_spill] sm:$0xff] }
 0x6b4   :  { %v23702_v45 = vsub.f32 %v9546_v58, %v23697_v2  ;;  %v25021_v58 = vpack.c.bf16 %v23473_v55, %v23471_v43 }
 0x6b5   :  { %9713 = vmatmul.mubr.f32.gmra.mrb[44].mxu1 %v9712_v60  ;;  %v25029_v60 = vld [vmem:[#allocation27_spill] sm:$0xff] }
 0x6b6   :  { %19315 = vmatpush1.bf16.msra.mxu1 %v23524_v56  ;;  %9722 = vmatprep.mubr.f32.mxu1 %v9721_v18  ;;  %v9725_v63 = vand.u32 4294901760, %v23702_v45  ;;  %v25014_v56 = vpack.c.bf16 %v23330_v17, %v23328_v6  ;;  %v25030_v18 = vand.u32 4294901760, %v23328_v6  ;;  %v25036_v6 = vand.u32 4294901760, %v23643_v54 }
 0x6b7   :  { %19316 = vmatprep.subr.bf16.mxu1 %v24985_v29 }
 0x6b8   :  { %v9726_v57 = vsub.f32 %v23702_v45, %v9725_v63 }
 0x6ba   :  { %19318 = vmatpush1.bf16.msra.mxu1 %v23536_v40  ;;  %v9727_v62 = vand.u32 4294901760, %v9726_v57  ;;  %v25017_v40 = vpack.c.bf16 %v23400_v32, %v23398_v1  ;;  %v25031_v57 = vand.u32 4294901760, %v23330_v17  ;;  %v25037_v17 = vand.u32 4294901760, %v23381_v33 }
 0x6bb   :  { %19319 = vmatprep.subr.bf16.mxu1 %v24985_v29 }
 0x6bc   :  { %9728 = vmatmul.mubr.f32.gmra.mrb[46].mxu1 %v9727_v62  ;;  %v19395_v62 = vpack.c.bf16 %v25031_v57, %v25030_v18 }
 0x6bd   :  { %9898 = vmatprep.mubr.f32.mxu1 %v23611_v36 }
 0x6be   :  { %19321 = vmatpush1.bf16.msra.mxu1 %v23548_v39  ;;  %v25018_v39 = vpack.c.bf16 %v23404_v51, %v23402_v28 }
 0x6bf   :  { %19322 = vmatprep.subr.bf16.mxu1 %v24985_v29 }
 0x6c2   :  { %19324 = vmatpush1.bf16.msra.mxu1 %v23560_v21  ;;  %v25015_v21 = vpack.c.bf16 %v23351_v41, %v23349_v35 }
 0x6c3   :  { %19325 = vmatprep.subr.bf16.mxu1 %v24985_v29 }
 0x6c6   :  { %19327 = vmatpush1.bf16.msra.mxu1 %v23570_v38  ;;  %v25019_v38 = vpack.c.bf16 %v23412_v31, %v23410_v11 }
 0x6c7   :  { %19328 = vmatprep.subr.bf16.mxu1 %v24985_v29 }
 0x6ca   :  { %19330 = vmatpush1.bf16.msra.mxu1 %v23580_v4  ;;  %v25020_v4 = vpack.c.bf16 %v23428_v37, %v23426_v44 }
 0x6cb   :  { %19331 = vmatprep.subr.bf16.mxu1 %v24985_v29 }
 0x6ce   :  { %19333 = vmatpush1.bf16.msra.mxu1 %v23588_v24  ;;  %v25016_v24 = vpack.c.bf16 %v23383_v30, %v23381_v33  ;;  %v25041_v33 = vand.u32 4294901760, %v23402_v28  ;;  %v25047_v28 = vand.u32 4294901760, %v23471_v43 }
 0x6cf   :  { %19334 = vmatprep.subr.bf16.mxu1 %v24985_v29 }
 0x6d1   :  { %9900 = vmatmul.mubr.f32.vlgmr.msra.gmra.mrb[40].mxu1 %v23633_v48 }
 0x6d2   :  { %9905 = vmatprep.mubr.f32.mxu1 %v23621_v59  ;;  %19336 = vmatpush1.bf16.msra.mxu1 %v25014_v56  ;;  %v25032_v56 = vand.u32 4294901760, %v23638_v15 }
 0x6d3   :  { %19337 = vmatprep.subr.bf16.mxu1 %v24985_v29 }
 0x6d5   :  { %9907 = vmatmul.mubr.f32.gmra.mrb[42].mxu1 %v23656_v42 }
 0x6d6   :  { %9912 = vmatprep.mubr.f32.mxu1 %v23631_v8  ;;  %19339 = vmatpush1.bf16.msra.mxu1 %v25015_v21  ;;  %v25033_v21 = vand.u32 4294901760, %v23626_v0 }
 0x6d7   :  { %19340 = vmatprep.subr.bf16.mxu1 %v24985_v29 }
 0x6d9   :  { %9914 = vmatmul.mubr.f32.gmra.mrb[44].mxu1 %v23671_v23 }
 0x6da   :  { %9919 = vmatprep.mubr.f32.mxu1 %v23646_v34  ;;  %19342 = vmatpush1.bf16.msra.mxu1 %v25016_v24  ;;  %v25034_v24 = vand.u32 4294901760, %v23349_v35  ;;  %v25039_v35 = vand.u32 4294901760, %v23398_v1  ;;  %v25043_v1 = vand.u32 4294901760, %v23410_v11  ;;  %v25049_v11 = vand.u32 4294901760, %v23475_v13  ;;  %v14053_v13 = vld [vmem:[%s24643_s2 + $0x1] ss:$0 sm:$0xff] }
 0x6db   :  { %19343 = vmatprep.subr.bf16.mxu1 %v24985_v29 }
 0x6dd   :  { %9921 = vmatmul.mubr.f32.gmra.mrb[46].mxu1 %v23697_v2 }
 0x6de   :  { %19345 = vmatpush1.bf16.msra.mxu1 %v25017_v40  ;;  %10032 = vmatprep.mubr.f32.mxu1 %v23614_v46  ;;  %v25028_v46 = vld [vmem:[#allocation26_spill] sm:$0xff]  ;;  %v25035_v40 = vand.u32 4294901760, %v23351_v41  ;;  %v25040_v41 = vand.u32 4294901760, %v23400_v32  ;;  %v25044_v32 = vand.u32 4294901760, %v23412_v31  ;;  %v25050_v31 = vand.u32 4294901760, %v23477_v27 }
 0x6df   :  { %19346 = vmatprep.subr.bf16.mxu1 %v24985_v29 }
 0x6e2   :  { %19348 = vmatpush1.bf16.msra.mxu1 %v25018_v39  ;;  %v19398_v39 = vpack.c.bf16 %v25035_v40, %v25034_v24 }
 0x6e3   :  { %19349 = vmatprep.subr.bf16.mxu1 %v24985_v29 }
 0x6e6   :  { %19351 = vmatpush1.bf16.msra.mxu1 %v25019_v38 }
 0x6e7   :  { %19352 = vmatprep.subr.bf16.mxu1 %v24985_v29 }
 0x6ea   :  { %19354 = vmatpush1.bf16.msra.mxu1 %v25020_v4 }
 0x6eb   :  { %19355 = vmatprep.subr.bf16.mxu1 %v24985_v29 }
 0x6ee   :  { %19357 = vmatpush1.bf16.msra.mxu1 %v25021_v58 }
 0x6ef   :  { %19358 = vmatprep.subr.bf16.mxu1 %v24985_v29 }
 0x6f2   :  { %19360 = vmatpush1.bf16.msra.mxu1 %v25022_v5 }
 0x6f3   :  { %19361 = vmatprep.subr.bf16.mxu1 %v24985_v29 }
 0x6f6   :  { %19363 = vmatpush1.bf16.msra.mxu1 %v25023_v7 }
 0x6f7   :  { %19364 = vmatprep.subr.bf16.mxu1 %v24985_v29 }
 0x6f9   :  { %10035 = vmatmul.mubr.f32.vlgmr.msra.gmra.mrb[40].mxu1 %v23638_v15 }
 0x6fa   :  { %10041 = vmatprep.mubr.f32.mxu1 %v23626_v0  ;;  %19366 = vmatpush1.bf16.msra.mxu1 %v23326_v10  ;;  %v25038_v0 = vand.u32 4294901760, %v23383_v30  ;;  %v25042_v30 = vand.u32 4294901760, %v23404_v51  ;;  %v25048_v51 = vand.u32 4294901760, %v23473_v55 }
 0x6fb   :  { %19367 = vmatprep.subr.bf16.mxu1 %v24985_v29 }
 0x6fc   :  { %v19401_v15 = vpack.c.bf16 %v25038_v0, %v25037_v17 }
 0x6fd   :  { %10044 = vmatmul.mubr.f32.gmra.mrb[42].mxu1 %v23665_v22  ;;  %v19410_v22 = vpack.c.bf16 %v25044_v32, %v25043_v1 }
 0x6fe   :  { %10050 = vmatprep.mubr.f32.mxu1 %v23643_v54  ;;  %19369 = vmatpush1.bf16.msra.mxu1 %v23347_v16  ;;  %v19404_v54 = vpack.c.bf16 %v25040_v41, %v25039_v35 }
 0x6ff   :  { %19370 = vmatprep.subr.bf16.mxu1 %v24985_v29 }
 0x701   :  { %10053 = vmatmul.mubr.f32.gmra.mrb[44].mxu1 %v23682_v19 }
 0x702   :  { %10059 = vmatprep.mubr.f32.mxu1 %v23660_v52  ;;  %19372 = vmatpush1.bf16.msra.mxu1 %v23361_v47  ;;  %v19407_v52 = vpack.c.bf16 %v25042_v30, %v25041_v33 }
 0x703   :  { %19373 = vmatprep.subr.bf16.mxu1 %v24985_v29 }
 0x705   :  { %10062 = vmatmul.mubr.f32.gmra.mrb[46].mxu1 %v23702_v45  ;;  %v19419_v45 = vpack.c.bf16 %v25050_v31, %v25049_v11 }
 0x706   :  { %19375 = vmatpush1.bf16.msra.mxu1 %v23371_v61  ;;  %10154 = vmatprep.mubr.f32.mxu1 %v25024_v50 }
 0x707   :  { %19376 = vmatprep.subr.bf16.mxu1 %v24985_v29 }
 0x70a   :  { %19378 = vmatpush1.bf16.msra.mxu1 %v23385_v26 }
 0x70b   :  { %19379 = vmatprep.subr.bf16.mxu1 %v24985_v29 }
 0x70e   :  { %19381 = vmatpush1.bf16.msra.mxu1 %v25025_v49 }
 0x70f   :  { %19382 = vmatprep.subr.bf16.mxu1 %v24985_v29 }
 0x712   :  { %19384 = vmatpush1.bf16.msra.mxu1 %v25026_v53 }
 0x713   :  { %19385 = vmatprep.subr.bf16.mxu1 %v24985_v29 }
 0x716   :  { %19387 = vmatpush1.bf16.msra.mxu1 %v25027_v20 }
 0x717   :  { %19388 = vmatprep.subr.bf16.mxu1 %v24985_v29 }
 0x71a   :  { %19390 = vmatpush1.bf16.msra.mxu1 %v25028_v46 }
 0x71b   :  { %19391 = vmatprep.subr.bf16.mxu1 %v24985_v29 }
 0x71e   :  { %19393 = vmatpush1.bf16.msra.mxu1 %v25029_v60 }
 0x71f   :  { %19394 = vmatprep.subr.bf16.mxu1 %v24985_v29 }
 0x721   :  { %10158 = vmatmul.mubr.f32.vlgmr.msra.gmra.mrb[40].mxu1 %v25032_v56 }
 0x722   :  { %10165 = vmatprep.mubr.f32.mxu1 %v25033_v21  ;;  %19396 = vmatpush1.bf16.msra.mxu1 %v19395_v62 }
 0x723   :  { %19397 = vmatprep.subr.bf16.mxu1 %v24985_v29 }
 0x725   :  { %10169 = vmatmul.mubr.f32.gmra.mrb[42].mxu1 %v9695_v9  ;;  %v25045_v9 = vand.u32 4294901760, %v23426_v44  ;;  %v25051_v44 = vand.u32 4294901760, %v23480_v3  ;;  %v10467_v3 = vld [vmem:[%s24644_s5 + $0x8] sm:$0xff] }
 0x726   :  { %10176 = vmatprep.mubr.f32.mxu1 %v25036_v6  ;;  %19399 = vmatpush1.bf16.msra.mxu1 %v19398_v39 }
 0x727   :  { %19400 = vmatprep.subr.bf16.mxu1 %v24985_v29 }
 0x729   :  { %10180 = vmatmul.mubr.f32.gmra.mrb[44].mxu1 %v9710_v12  ;;  %v19416_v12 = vpack.c.bf16 %v25048_v51, %v25047_v28 }
 0x72a   :  { %10187 = vmatprep.mubr.f32.mxu1 %v9719_v14  ;;  %19402 = vmatpush1.bf16.msra.mxu1 %v19401_v15  ;;  %v25046_v14 = vand.u32 4294901760, %v23428_v37  ;;  %v25052_v37 = vand.u32 4294901760, %v23482_v25 }
 0x72b   :  { %19403 = vmatprep.subr.bf16.mxu1 %v24985_v29 }
 0x72c   :  { %v19413_v19 = vpack.c.bf16 %v25046_v14, %v25045_v9 }
 0x72d   :  { %10191 = vmatmul.mubr.f32.gmra.mrb[46].mxu1 %v9725_v63  ;;  %v19422_v63 = vpack.c.bf16 %v25052_v37, %v25051_v44 }
 0x72e   :  { %19405 = vmatpush1.bf16.msra.mxu1 %v19404_v54  ;;  %10321 = vmatprep.mubr.f32.mxu1 %v23611_v36 }
 0x72f   :  { %19406 = vmatprep.subr.bf16.mxu1 %v24985_v29 }
 0x732   :  { %19408 = vmatpush1.bf16.msra.mxu1 %v19407_v52 }
 0x733   :  { %19409 = vmatprep.subr.bf16.mxu1 %v24985_v29 }
 0x736   :  { %19411 = vmatpush1.bf16.msra.mxu1 %v19410_v22 }
 0x737   :  { %19412 = vmatprep.subr.bf16.mxu1 %v24985_v29 }
 0x73a   :  { %19414 = vmatpush1.bf16.msra.mxu1 %v19413_v19 }
 0x73b   :  { %19415 = vmatprep.subr.bf16.mxu1 %v24985_v29 }
 0x73e   :  { %19417 = vmatpush1.bf16.msra.mxu1 %v19416_v12 }
 0x73f   :  { %19418 = vmatprep.subr.bf16.mxu1 %v24985_v29 }
 0x742   :  { %19420 = vmatpush1.bf16.msra.mxu1 %v19419_v45  ;;  %v14054_v45 = vld [vmem:[%s24644_s5 + $0x10] sm:$0xff] }
 0x743   :  { %19421 = vmatprep.subr.bf16.mxu1 %v24985_v29  ;;  %v11006_v44 = vsel %vm4889_vm0, %v14054_v45, 0 }
 0x744   :  { %v23964_v37 = vand.u32 4294901760, %v11006_v44 }
 0x746   :  { %19423 = vmatpush1.bf16.msra.mxu1 %v19422_v63  ;;  %v14055_v63 = vld [vmem:[%s24644_s5 + $0x18] sm:$0xff] }
 0x747   :  { %19424 = vmatprep.subr.bf16.mxu1 %v24985_v29 }
 0x749   :  { %10323 = vmatmul.mubr.f32.vlgmr.msra.gmra.mrb[40].mxu1 %v23633_v48 }
 0x74a   :  { %10328 = vmatprep.mubr.f32.mxu1 %v23621_v59  ;;  %19426 = vmatpush1.bf16.msra.mxu1 %v23326_v10  ;;  %v10466_v10 = vld [vmem:[%s24644_s5] sm:$0xff] }
 0x74b   :  { %19427 = vmatprep.subr.bf16.mxu1 %v24985_v29 }
 0x74d   :  { %10330 = vmatmul.mubr.f32.gmra.mrb[42].mxu1 %v23656_v42 }
 0x74e   :  { %10335 = vmatprep.mubr.f32.mxu1 %v23631_v8  ;;  %19429 = vmatpush1.bf16.msra.mxu1 %v23347_v16  ;;  %v10469_v16 = vsel %vm4889_vm0, %v10466_v10, 0  ;;  %v11081_v10 = vsub.f32 %v11006_v44, %v23964_v37 }
 0x74f   :  { %19430 = vmatprep.subr.bf16.mxu1 %v24985_v29 }
 0x751   :  { %10337 = vmatmul.mubr.f32.gmra.mrb[44].mxu1 %v23671_v23 }
 0x752   :  { %10342 = vmatprep.mubr.f32.mxu1 %v23646_v34  ;;  %19432 = vmatpush1.bf16.msra.mxu1 %v23361_v47  ;;  %v23904_v47 = vand.u32 4294901760, %v10469_v16 }
 0x753   :  { %19433 = vmatprep.subr.bf16.mxu1 %v24985_v29 }
 0x755   :  { %10344 = vmatmul.mubr.f32.gmra.mrb[46].mxu1 %v23697_v2 }
 0x756   :  { %19435 = vmatpush1.bf16.msra.mxu1 %v23371_v61  ;;  %10434 = vmatprep.mubr.f32.mxu1 %v23611_v36  ;;  %v23907_v61 = vsub.f32 %v10469_v16, %v23904_v47  ;;  %v11009_v16 = vsel %vm4889_vm0, %v14055_v63, 0 }
 0x757   :  { %19436 = vmatprep.subr.bf16.mxu1 %v24985_v29 }
 0x75a   :  { %19438 = vmatpush1.bf16.msra.mxu1 %v23385_v26  ;;  %v10545_v26 = vand.u32 4294901760, %v23907_v61 }
 0x75b   :  { %19439 = vmatprep.subr.bf16.mxu1 %v24985_v29 }
 0x75c   :  { %v10546_v43 = vsub.f32 %v23907_v61, %v10545_v26 }
 0x75e   :  { %19441 = vmatpush1.bf16.msra.mxu1 %v25025_v49  ;;  %v10547_v55 = vand.u32 4294901760, %v10546_v43 }
 0x75f   :  { %19442 = vmatprep.subr.bf16.mxu1 %v24985_v29 }
 0x760   :  { %17332 = vmatprep.mubr.f32.mxu0 %v10547_v55 }
 0x762   :  { %19444 = vmatpush1.bf16.msra.mxu1 %v25026_v53 }
 0x763   :  { %19445 = vmatprep.subr.bf16.mxu1 %v24985_v29 }
 0x766   :  { %19447 = vmatpush1.bf16.msra.mxu1 %v25027_v20 }
 0x767   :  { %19448 = vmatprep.subr.bf16.mxu1 %v24985_v29 }
 0x76a   :  { %19450 = vmatpush1.bf16.msra.mxu1 %v25028_v46 }
 0x76b   :  { %19451 = vmatprep.subr.bf16.mxu1 %v24985_v29 }
 0x76e   :  { %19453 = vmatpush1.bf16.msra.mxu1 %v25029_v60 }
 0x76f   :  { %19694 = vmatprep.subr.bf16.mxu1 %v24985_v29 }
 0x771   :  { %10436 = vmatmul.mubr.f32.vlgmr.msra.gmra.mrb[40].mxu1 %v23633_v48 }
 0x772   :  { %10441 = vmatprep.mubr.f32.mxu1 %v23621_v59  ;;  %v10472_v59 = vsel %vm4889_vm0, %v10467_v3, 0 }
 0x775   :  { %10443 = vmatmul.mubr.f32.gmra.mrb[42].mxu1 %v23656_v42 }
 0x776   :  { %10448 = vmatprep.mubr.f32.mxu1 %v23631_v8 }
 0x779   :  { %10450 = vmatmul.mubr.f32.gmra.mrb[44].mxu1 %v23671_v23 }
 0x77a   :  { %10455 = vmatprep.mubr.f32.mxu1 %v23646_v34 }
 0x77d   :  { %10457 = vmatmul.mubr.f32.gmra.mrb[46].mxu1 %v23697_v2  ;;  %v23920_v2 = vand.u32 4294901760, %v10472_v59 }
 0x77f   :  { %v10554_v53 = vsub.f32 %v10472_v59, %v23920_v2  ;;  %v14057_v59 = vld [vmem:[%s24644_s5 + $0x28] sm:$0xff] }
 0x781   :  { %v10555_v39 = vand.u32 4294901760, %v10554_v53 }
 0x783   :  { %v10556_v30 = vsub.f32 %v10554_v53, %v10555_v39 }
 0x785   :  { %v10557_v19 = vand.u32 4294901760, %v10556_v30 }
 0x844   :  { %v10437_v27 = vpop.f32.mrb[40].mxu1 }
 0x845   :  { %v19894_v25 = vadd.f32 %v14053_v13, %v10437_v27  ;;  %v10439_v36 = vpop.f32.mrb[41].mxu1 }
 0x847   :  { %v10462_v8 = vmax.f32 %v19894_v25, 0.0 }
 0x848   :  { %v10444_v48 = vpop.f32.mrb[42].mxu1 }
 0x849   :  { %v10475_v34 = vand.u32 4294901760, %v10462_v8  ;;  %v19895_v42 = vadd.f32 %v14053_v13, %v10444_v48  ;;  %v10446_v23 = vpop.f32.mrb[43].mxu1 }
 0x84b   :  { %v10565_v38 = vsub.f32 %v10462_v8, %v10475_v34  ;;  %v10463_v4 = vmax.f32 %v19895_v42, 0.0 }
 0x84c   :  { %v10451_v58 = vpop.f32.mrb[44].mxu1 }
 0x84d   :  { %v10566_v5 = vand.u32 4294901760, %v10565_v38  ;;  %v10478_v7 = vand.u32 4294901760, %v10463_v4  ;;  %v19896_v50 = vadd.f32 %v14053_v13, %v10451_v58  ;;  %v10453_v49 = vpop.f32.mrb[45].mxu1 }
 0x84f   :  { %v23923_v20 = vpack.c.bf16 %v10478_v7, %v10475_v34  ;;  %v10572_v46 = vsub.f32 %v10463_v4, %v10478_v7  ;;  %v10464_v60 = vmax.f32 %v19896_v50, 0.0  ;;  %v10567_v57 = vsub.f32 %v10565_v38, %v10566_v5  ;;  %v14058_v50 = vld [vmem:[%s24644_s5 + $0x30] sm:$0xff] }
 0x850   :  { %v10458_v18 = vpop.f32.mrb[46].mxu1  ;;  %v11546_v34 = vsel %vm4889_vm0, %v14057_v59, 0  ;;  %v12080_v49 = vsel %vm4889_vm0, %v14058_v50, 0  ;;  %v14072_v59 = vld [vmem:[%s24641_s1 + $0x190] sm:$0xff] }
 0x851   :  { %v10573_v62 = vand.u32 4294901760, %v10572_v46  ;;  %v23925_v56 = vpack.c.bf16 %v10572_v46, %v10565_v38  ;;  %v10481_v21 = vand.u32 4294901760, %v10464_v60  ;;  %v10460_v24 = vpop.f32.mrb[47].mxu1  ;;  %19455 = vmatprep.subr.bf16.mxu0 %v23923_v20  ;;  %v19897_v40 = vadd.f32 %v14053_v13, %v10458_v18 }
 0x852   :  { %19457 = vmatpush3.bf16.msra.mxu0 %v23923_v20  ;;  %v10568_v35 = vand.u32 4294901760, %v10567_v57  ;;  %v24019_v42 = vand.u32 4294901760, %v11546_v34  ;;  %v13246_v50 = vand.u32 4294901760, %v14072_v59 }
 0x853   :  { %v10574_v6 = vsub.f32 %v10572_v46, %v10573_v62  ;;  %v23929_v17 = vpack.c.bf16 %v10573_v62, %v10566_v5  ;;  %v10579_v0 = vsub.f32 %v10464_v60, %v10481_v21  ;;  %v10465_v15 = vmax.f32 %v19897_v40, 0.0  ;;  %v14059_v46 = vld [vmem:[%s24644_s5 + $0x38] sm:$0xff] }
 0x854   :  { %v12083_v18 = vsel %vm4889_vm0, %v14059_v46, 0 }
 0x855   :  { %v10575_v41 = vand.u32 4294901760, %v10574_v6  ;;  %v10580_v54 = vand.u32 4294901760, %v10579_v0  ;;  %v10484_v33 = vand.u32 4294901760, %v10465_v15  ;;  %v24063_v57 = vand.u32 4294901760, %v12083_v18 }
 0x857   :  { %v23931_v52 = vpack.c.bf16 %v10575_v41, %v10568_v35  ;;  %v23933_v1 = vpack.c.bf16 %v10484_v33, %v10481_v21  ;;  %v10586_v32 = vsub.f32 %v10465_v15, %v10484_v33  ;;  %v10581_v22 = vsub.f32 %v10579_v0, %v10580_v54  ;;  %v14060_v15 = vld [vmem:[%s24644_s5 + $0x40] sm:$0xff] }
 0x858   :  { %v12165_v21 = vsub.f32 %v12083_v18, %v24063_v57  ;;  %v12617_v35 = vsel %vm4889_vm0, %v14060_v15, 0 }
 0x859   :  { %v10587_v9 = vand.u32 4294901760, %v10586_v32  ;;  %v23935_v14 = vpack.c.bf16 %v10586_v32, %v10579_v0  ;;  %19459 = vmatprep.subr.bf16.mxu0 %v23933_v1  ;;  %v10582_v12 = vand.u32 4294901760, %v10581_v22  ;;  %v12691_v41 = vand.u32 4294901760, %v12617_v35 }
 0x85a   :  { %19461 = vmatpush3.bf16.msra.mxu0 %v23933_v1  ;;  %v12166_v40 = vand.u32 4294901760, %v12165_v21 }
 0x85b   :  { %v10588_v28 = vsub.f32 %v10586_v32, %v10587_v9  ;;  %v23939_v51 = vpack.c.bf16 %v10587_v9, %v10580_v54  ;;  %19463 = vmatprep.subr.bf16.mxu0 %v23931_v52  ;;  %v14061_v54 = vld [vmem:[%s24644_s5 + $0x48] sm:$0xff]  ;;  %v12692_v33 = vsub.f32 %v12617_v35, %v12691_v41 }
 0x85c   :  { %v12167_v6 = vsub.f32 %v12165_v21, %v12166_v40  ;;  %v12620_v30 = vsel %vm4889_vm0, %v14061_v54, 0 }
 0x85d   :  { %v10589_v11 = vand.u32 4294901760, %v10588_v28  ;;  %17333 = vmatmul.mubr.f32.vlgmr.msra.gmra.mrb[56].mxu0 %v10557_v19  ;;  %v12701_v32 = vand.u32 4294901760, %v12620_v30  ;;  %v12693_v22 = vand.u32 4294901760, %v12692_v33 }
 0x85e   :  { %19465 = vmatpush3.bf16.msra.mxu0 %v23931_v52  ;;  %17343 = vmatprep.mubr.f32.mxu0 %v23904_v47  ;;  %v12168_v0 = vand.u32 4294901760, %v12167_v6 }
 0x85f   :  { %v23944_v31 = vpack.c.bf16 %v10589_v11, %v10582_v12  ;;  %v12702_v9 = vsub.f32 %v12620_v30, %v12701_v32  ;;  %v12694_v19 = vsub.f32 %v12692_v33, %v12693_v22 }
 0x861   :  { %19467 = vmatprep.subr.bf16.mxu0 %v23944_v31  ;;  %v12703_v28 = vand.u32 4294901760, %v12702_v9  ;;  %v12695_v12 = vand.u32 4294901760, %v12694_v19 }
 0x862   :  { %19469 = vmatpush3.bf16.msra.mxu0 %v23944_v31 }
 0x863   :  { %19471 = vmatprep.subr.bf16.mxu0 %v23925_v56  ;;  %v12704_v11 = vsub.f32 %v12702_v9, %v12703_v28 }
 0x865   :  { %17344 = vmatmul.mubr.f32.vlgmr.msra.gmra.mrb[56].mxu0 %v23920_v2  ;;  %v12705_v45 = vand.u32 4294901760, %v12704_v11 }
 0x866   :  { %19473 = vmatpush3.bf16.msra.mxu0 %v23925_v56  ;;  %17354 = vmatprep.mubr.f32.mxu0 %v23907_v61  ;;  %v23975_v61 = vand.u32 4294901760, %v11009_v16 }
 0x867   :  { %19475 = vmatprep.subr.bf16.mxu0 %v23935_v14 }
 0x868   :  { %v11091_v43 = vsub.f32 %v11009_v16, %v23975_v61  ;;  %v14067_v16 = vld [vmem:[%s24641_s1 + $0x168] sm:$0xff] }
 0x86a   :  { %19477 = vmatpush3.bf16.msra.mxu0 %v23935_v14  ;;  %v11092_v13 = vand.u32 4294901760, %v11091_v43 }
 0x86b   :  { %19479 = vmatprep.subr.bf16.mxu0 %v23923_v20 }
 0x86c   :  { %v11093_v3 = vsub.f32 %v11091_v43, %v11092_v13 }
 0x86d   :  { %17355 = vmatmul.mubr.f32.vlgmr.msra.gmra.mrb[56].mxu0 %v10554_v53  ;;  %v24052_v53 = vand.u32 4294901760, %v12080_v49 }
 0x86e   :  { %19481 = vmatpush3.bf16.msra.mxu0 %v23923_v20  ;;  %17365 = vmatprep.mubr.f32.mxu0 %v10545_v26  ;;  %v11082_v26 = vand.u32 4294901760, %v11081_v10  ;;  %v11094_v25 = vand.u32 4294901760, %v11093_v3 }
 0x86f   :  { %19483 = vmatprep.subr.bf16.mxu0 %v23933_v1  ;;  %v12155_v60 = vsub.f32 %v12080_v49, %v24052_v53 }
 0x870   :  { %v11083_v55 = vsub.f32 %v11081_v10, %v11082_v26 }
 0x871   :  { %v12156_v62 = vand.u32 4294901760, %v12155_v60 }
 0x872   :  { %19485 = vmatpush3.bf16.msra.mxu0 %v23933_v1  ;;  %v11084_v27 = vand.u32 4294901760, %v11083_v55  ;;  %v14068_v55 = vld [vmem:[%s24641_s1 + $0x170] sm:$0xff] }
 0x873   :  { %19487 = vmatprep.subr.bf16.mxu0 %v23929_v17  ;;  %v12157_v24 = vsub.f32 %v12155_v60, %v12156_v62 }
 0x875   :  { %17366 = vmatmul.mubr.f32.vlgmr.msra.gmra.mrb[56].mxu0 %v10555_v39  ;;  %v12158_v39 = vand.u32 4294901760, %v12157_v24 }
 0x876   :  { %19489 = vmatpush3.bf16.msra.mxu0 %v23929_v17  ;;  %17376 = vmatprep.mubr.f32.mxu0 %v23904_v47 }
 0x877   :  { %19491 = vmatprep.subr.bf16.mxu0 %v23939_v51 }
 0x87a   :  { %19493 = vmatpush3.bf16.msra.mxu0 %v23939_v51 }
 0x87b   :  { %19495 = vmatprep.subr.bf16.mxu0 %v23923_v20 }
 0x87d   :  { %17377 = vmatmul.mubr.f32.vlgmr.msra.gmra.mrb[56].mxu0 %v23920_v2 }
 0x87e   :  { %19497 = vmatpush3.bf16.msra.mxu0 %v23923_v20  ;;  %17387 = vmatprep.mubr.f32.mxu0 %v23904_v47  ;;  %v14056_v47 = vld [vmem:[%s24644_s5 + $0x20] sm:$0xff] }
 0x87f   :  { %19499 = vmatprep.subr.bf16.mxu0 %v23933_v1  ;;  %v11543_v36 = vsel %vm4889_vm0, %v14056_v47, 0 }
 0x880   :  { %v24008_v8 = vand.u32 4294901760, %v11543_v36 }
 0x882   :  { %19501 = vmatpush3.bf16.msra.mxu0 %v23933_v1  ;;  %v11618_v48 = vsub.f32 %v11543_v36, %v24008_v8 }
 0x883   :  { %19503 = vmatprep.subr.bf16.mxu0 %v23923_v20 }
 0x884   :  { %v11619_v23 = vand.u32 4294901760, %v11618_v48 }
 0x885   :  { %17388 = vmatmul.mubr.f32.vlgmr.msra.gmra.mrb[56].mxu0 %v23920_v2  ;;  %v11628_v2 = vsub.f32 %v11546_v34, %v24019_v42 }
 0x886   :  { %19505 = vmatpush3.bf16.msra.mxu0 %v23923_v20  ;;  %17398 = vmatprep.mubr.f32.mxu0 %v11084_v27  ;;  %v11620_v38 = vsub.f32 %v11618_v48, %v11619_v23  ;;  %v14070_v27 = vld [vmem:[%s24641_s1 + $0x180] sm:$0xff] }
 0x887   :  { %19507 = vmatprep.subr.bf16.mxu0 %v23933_v1  ;;  %v11629_v4 = vand.u32 4294901760, %v11628_v2 }
 0x888   :  { %v11621_v58 = vand.u32 4294901760, %v11620_v38 }
 0x889   :  { %v11630_v5 = vsub.f32 %v11628_v2, %v11629_v4 }
 0x88a   :  { %19509 = vmatpush3.bf16.msra.mxu0 %v23933_v1 }
 0x88b   :  { %19511 = vmatprep.subr.bf16.mxu0 %v23931_v52  ;;  %v11631_v7 = vand.u32 4294901760, %v11630_v5  ;;  %v13240_v5 = vand.u32 4294901760, %v14070_v27 }
 0x88d   :  { %17399 = vmatmul.mubr.f32.vlgmr.msra.gmra.mrb[58].mxu0 %v11094_v25 }
 0x88e   :  { %19513 = vmatpush3.bf16.msra.mxu0 %v23931_v52  ;;  %17409 = vmatprep.mubr.f32.mxu0 %v23964_v37 }
 0x88f   :  { %19515 = vmatprep.subr.bf16.mxu0 %v23944_v31 }
 0x892   :  { %19517 = vmatpush3.bf16.msra.mxu0 %v23944_v31 }
 0x893   :  { %19519 = vmatprep.subr.bf16.mxu0 %v23925_v56 }
 0x895   :  { %17410 = vmatmul.mubr.f32.vlgmr.msra.gmra.mrb[58].mxu0 %v23975_v61 }
 0x896   :  { %19521 = vmatpush3.bf16.msra.mxu0 %v23925_v56  ;;  %17420 = vmatprep.mubr.f32.mxu0 %v11081_v10  ;;  %v14066_v10 = vld [vmem:[%s24641_s1 + $0x160] sm:$0xff] }
 0x897   :  { %19523 = vmatprep.subr.bf16.mxu0 %v23935_v14 }
 0x89a   :  { %19525 = vmatpush3.bf16.msra.mxu0 %v23935_v14 }
 0x89b   :  { %19527 = vmatprep.subr.bf16.mxu0 %v23923_v20 }
 0x89d   :  { %17421 = vmatmul.mubr.f32.vlgmr.msra.gmra.mrb[58].mxu0 %v11091_v43  ;;  %v13231_v43 = vand.u32 4294901760, %v14067_v16 }
 0x89e   :  { %19529 = vmatpush3.bf16.msra.mxu0 %v23923_v20  ;;  %17431 = vmatprep.mubr.f32.mxu0 %v11082_v26  ;;  %v13228_v26 = vand.u32 4294901760, %v14066_v10 }
 0x89f   :  { %19531 = vmatprep.subr.bf16.mxu0 %v23933_v1  ;;  %v24195_v38 = vsub.f32 %v14067_v16, %v13231_v43 }
 0x8a2   :  { %19533 = vmatpush3.bf16.msra.mxu0 %v23933_v1 }
 0x8a3   :  { %19535 = vmatprep.subr.bf16.mxu0 %v23929_v17 }
 0x8a5   :  { %17432 = vmatmul.mubr.f32.vlgmr.msra.gmra.mrb[58].mxu0 %v11092_v13  ;;  %v14069_v13 = vld [vmem:[%s24641_s1 + $0x178] sm:$0xff] }
 0x8a6   :  { %19537 = vmatpush3.bf16.msra.mxu0 %v23929_v17  ;;  %17442 = vmatprep.mubr.f32.mxu0 %v23964_v37 }
 0x8a7   :  { %19539 = vmatprep.subr.bf16.mxu0 %v23939_v51 }
 0x8aa   :  { %19541 = vmatpush3.bf16.msra.mxu0 %v23939_v51 }
 0x8ab   :  { %19543 = vmatprep.subr.bf16.mxu0 %v23923_v20 }
 0x8ad   :  { %17443 = vmatmul.mubr.f32.vlgmr.msra.gmra.mrb[58].mxu0 %v23975_v61 }
 0x8ae   :  { %19545 = vmatpush3.bf16.msra.mxu0 %v23923_v20  ;;  %17453 = vmatprep.mubr.f32.mxu0 %v23964_v37  ;;  %v14065_v37 = vld [vmem:[%s24641_s1 + $0x158] sm:$0xff] }
 0x8af   :  { %19547 = vmatprep.subr.bf16.mxu0 %v23933_v1 }
 0x8b2   :  { %19549 = vmatpush3.bf16.msra.mxu0 %v23933_v1 }
 0x8b3   :  { %19551 = vmatprep.subr.bf16.mxu0 %v23923_v20 }
 0x8b5   :  { %17454 = vmatmul.mubr.f32.vlgmr.msra.gmra.mrb[58].mxu0 %v23975_v61  ;;  %v13225_v61 = vand.u32 4294901760, %v14065_v37 }
 0x8b6   :  { %19553 = vmatpush3.bf16.msra.mxu0 %v23923_v20  ;;  %17464 = vmatprep.mubr.f32.mxu0 %v11621_v58  ;;  %v13237_v58 = vand.u32 4294901760, %v14069_v13 }
 0x8b7   :  { %19555 = vmatprep.subr.bf16.mxu0 %v23933_v1 }
 0x8b8   :  { %v24205_v18 = vsub.f32 %v14069_v13, %v13237_v58 }
 0x8ba   :  { %19557 = vmatpush3.bf16.msra.mxu0 %v23933_v1 }
 0x8bb   :  { %19559 = vmatprep.subr.bf16.mxu0 %v23931_v52 }
 0x8bd   :  { %17465 = vmatmul.mubr.f32.vlgmr.msra.gmra.mrb[60].mxu0 %v11631_v7 }
 0x8be   :  { %19561 = vmatpush3.bf16.msra.mxu0 %v23931_v52  ;;  %17475 = vmatprep.mubr.f32.mxu0 %v24008_v8 }
 0x8bf   :  { %19563 = vmatprep.subr.bf16.mxu0 %v23944_v31 }
 0x8c2   :  { %19565 = vmatpush3.bf16.msra.mxu0 %v23944_v31 }
 0x8c3   :  { %19567 = vmatprep.subr.bf16.mxu0 %v23925_v56 }
 0x8c5   :  { %17476 = vmatmul.mubr.f32.vlgmr.msra.gmra.mrb[60].mxu0 %v24019_v42 }
 0x8c6   :  { %19569 = vmatpush3.bf16.msra.mxu0 %v23925_v56  ;;  %17486 = vmatprep.mubr.f32.mxu0 %v11618_v48  ;;  %v14073_v48 = vld [vmem:[%s24641_s1 + $0x198] sm:$0xff] }
 0x8c7   :  { %19571 = vmatprep.subr.bf16.mxu0 %v23935_v14  ;;  %v13249_v49 = vand.u32 4294901760, %v14073_v48 }
 0x8c9   :  { %v24217_v6 = vsub.f32 %v14073_v48, %v13249_v49 }
 0x8ca   :  { %19573 = vmatpush3.bf16.msra.mxu0 %v23935_v14 }
 0x8cb   :  { %19575 = vmatprep.subr.bf16.mxu0 %v23923_v20 }
 0x8cd   :  { %17487 = vmatmul.mubr.f32.vlgmr.msra.gmra.mrb[60].mxu0 %v11628_v2  ;;  %v14074_v2 = vld [vmem:[%s24641_s1 + $0x1a0] sm:$0xff] }
 0x8ce   :  { %19577 = vmatpush3.bf16.msra.mxu0 %v23923_v20  ;;  %17497 = vmatprep.mubr.f32.mxu0 %v11619_v23  ;;  %v24189_v23 = vsub.f32 %v14066_v10, %v13228_v26 }
 0x8cf   :  { %19579 = vmatprep.subr.bf16.mxu0 %v23933_v1 }
 0x8d2   :  { %19581 = vmatpush3.bf16.msra.mxu0 %v23933_v1 }
 0x8d3   :  { %19583 = vmatprep.subr.bf16.mxu0 %v23929_v17 }
 0x8d5   :  { %17498 = vmatmul.mubr.f32.vlgmr.msra.gmra.mrb[60].mxu0 %v11629_v4  ;;  %v13234_v4 = vand.u32 4294901760, %v14068_v55 }
 0x8d6   :  { %19585 = vmatpush3.bf16.msra.mxu0 %v23929_v17  ;;  %17508 = vmatprep.mubr.f32.mxu0 %v24008_v8 }
 0x8d7   :  { %19587 = vmatprep.subr.bf16.mxu0 %v23939_v51 }
 0x8da   :  { %19589 = vmatpush3.bf16.msra.mxu0 %v23939_v51 }
 0x8db   :  { %19591 = vmatprep.subr.bf16.mxu0 %v23923_v20 }
 0x8dd   :  { %17509 = vmatmul.mubr.f32.vlgmr.msra.gmra.mrb[60].mxu0 %v24019_v42 }
 0x8de   :  { %19593 = vmatpush3.bf16.msra.mxu0 %v23923_v20  ;;  %17519 = vmatprep.mubr.f32.mxu0 %v24008_v8  ;;  %v14071_v8 = vld [vmem:[%s24641_s1 + $0x188] sm:$0xff] }
 0x8df   :  { %19595 = vmatprep.subr.bf16.mxu0 %v23933_v1  ;;  %v13243_v7 = vand.u32 4294901760, %v14071_v8 }
 0x8e1   :  { %v24209_v24 = vsub.f32 %v14071_v8, %v13243_v7  ;;  %v24230_v54 = vpack.c.bf16 %v13243_v7, %v13240_v5 }
 0x8e2   :  { %19597 = vmatpush3.bf16.msra.mxu0 %v23933_v1 }
 0x8e3   :  { %19599 = vmatprep.subr.bf16.mxu0 %v23923_v20 }
 0x8e5   :  { %17520 = vmatmul.mubr.f32.vlgmr.msra.gmra.mrb[60].mxu0 %v24019_v42  ;;  %v24187_v42 = vsub.f32 %v14065_v37, %v13225_v61 }
 0x8e6   :  { %19601 = vmatpush3.bf16.msra.mxu0 %v23923_v20  ;;  %17530 = vmatprep.mubr.f32.mxu0 %v12158_v39  ;;  %v24215_v39 = vpack.c.bf16 %v13231_v43, %v13228_v26 }
 0x8e7   :  { %19603 = vmatprep.subr.bf16.mxu0 %v23933_v1 }
 0x8ea   :  { %19605 = vmatpush3.bf16.msra.mxu0 %v23933_v1 }
 0x8eb   :  { %19607 = vmatprep.subr.bf16.mxu0 %v23931_v52 }
 0x8ed   :  { %17531 = vmatmul.mubr.f32.vlgmr.msra.gmra.mrb[62].mxu0 %v12168_v0 }
 0x8ee   :  { %19609 = vmatpush3.bf16.msra.mxu0 %v23931_v52  ;;  %17541 = vmatprep.mubr.f32.mxu0 %v24052_v53 }
 0x8ef   :  { %19611 = vmatprep.subr.bf16.mxu0 %v23944_v31 }
 0x8f2   :  { %19613 = vmatpush3.bf16.msra.mxu0 %v23944_v31 }
 0x8f3   :  { %19615 = vmatprep.subr.bf16.mxu0 %v23925_v56 }
 0x8f5   :  { %17542 = vmatmul.mubr.f32.vlgmr.msra.gmra.mrb[62].mxu0 %v24063_v57 }
 0x8f6   :  { %19617 = vmatpush3.bf16.msra.mxu0 %v23925_v56  ;;  %17552 = vmatprep.mubr.f32.mxu0 %v12155_v60  ;;  %v24203_v60 = vsub.f32 %v14068_v55, %v13234_v4 }
 0x8f7   :  { %19619 = vmatprep.subr.bf16.mxu0 %v23935_v14 }
 0x8fa   :  { %19621 = vmatpush3.bf16.msra.mxu0 %v23935_v14 }
 0x8fb   :  { %19623 = vmatprep.subr.bf16.mxu0 %v23923_v20 }
 0x8fd   :  { %17553 = vmatmul.mubr.f32.vlgmr.msra.gmra.mrb[62].mxu0 %v12165_v21 }
 0x8fe   :  { %19625 = vmatpush3.bf16.msra.mxu0 %v23923_v20  ;;  %17563 = vmatprep.mubr.f32.mxu0 %v12156_v62  ;;  %v13252_v62 = vand.u32 4294901760, %v14074_v2 }
 0x8ff   :  { %19627 = vmatprep.subr.bf16.mxu0 %v23933_v1 }
 0x900   :  { %v24219_v15 = vsub.f32 %v14074_v2, %v13252_v62 }
 0x902   :  { %19629 = vmatpush3.bf16.msra.mxu0 %v23933_v1 }
 0x903   :  { %19631 = vmatprep.subr.bf16.mxu0 %v23929_v17 }
 0x905   :  { %17564 = vmatmul.mubr.f32.vlgmr.msra.gmra.mrb[62].mxu0 %v12166_v40  ;;  %v24211_v40 = vsub.f32 %v14072_v59, %v13246_v50 }
 0x906   :  { %19633 = vmatpush3.bf16.msra.mxu0 %v23929_v17  ;;  %17574 = vmatprep.mubr.f32.mxu0 %v24052_v53 }
 0x907   :  { %19635 = vmatprep.subr.bf16.mxu0 %v23939_v51 }
 0x90a   :  { %19637 = vmatpush3.bf16.msra.mxu0 %v23939_v51 }
 0x90b   :  { %19639 = vmatprep.subr.bf16.mxu0 %v23923_v20 }
 0x90d   :  { %17575 = vmatmul.mubr.f32.vlgmr.msra.gmra.mrb[62].mxu0 %v24063_v57 }
 0x90e   :  { %19641 = vmatpush3.bf16.msra.mxu0 %v23923_v20  ;;  %17585 = vmatprep.mubr.f32.mxu0 %v24052_v53  ;;  %v14075_v53 = vld [vmem:[%s24641_s1 + $0x1a8] sm:$0xff] }
 0x90f   :  { %19643 = vmatprep.subr.bf16.mxu0 %v23933_v1  ;;  %v13255_v0 = vand.u32 4294901760, %v14075_v53 }
 0x911   :  { %v24222_v35 = vsub.f32 %v14075_v53, %v13255_v0  ;;  %v24238_v30 = vpack.c.bf16 %v13255_v0, %v13252_v62  ;;  %v24806_v62 = vand.u32 4294901760, %v24189_v23 }
 0x912   :  { %19645 = vmatpush3.bf16.msra.mxu0 %v23933_v1 }
 0x913   :  { %19647 = vmatprep.subr.bf16.mxu0 %v23923_v20 }
 0x915   :  { %17586 = vmatmul.mubr.f32.vlgmr.msra.gmra.mrb[62].mxu0 %v24063_v57  ;;  %v24207_v57 = vsub.f32 %v14070_v27, %v13240_v5  ;;  %v24807_v27 = vand.u32 4294901760, %v24187_v42 }
 0x916   :  { %19649 = vmatpush3.bf16.msra.mxu0 %v23923_v20  ;;  %17596 = vmatprep.mubr.f32.mxu0 %v12695_v12 }
 0x917   :  { %19651 = vmatprep.subr.bf16.mxu0 %v23933_v1  ;;  %v13355_v5 = vsub.f32 %v24187_v42, %v24807_v27 }
 0x919   :  { %v13356_v53 = vand.u32 4294901760, %v13355_v5  ;;  %v24797_v5 = vand.u32 4294901760, %v24211_v40 }
 0x91a   :  { %19653 = vmatpush3.bf16.msra.mxu0 %v23933_v1 }
 0x91b   :  { %19655 = vmatprep.subr.bf16.mxu0 %v23931_v52 }
 0x91d   :  { %17597 = vmatmul.mubr.f32.vlgmr.msra.gmra.mrb[64].mxu0 %v12705_v45  ;;  %v14078_v45 = vld [vmem:[%s24641_s1 + $0x1c0] sm:$0xff] }
 0x91e   :  { %19657 = vmatpush3.bf16.msra.mxu0 %v23931_v52  ;;  %17607 = vmatprep.mubr.f32.mxu0 %v12691_v41 }
 0x91f   :  { %19659 = vmatprep.subr.bf16.mxu0 %v23944_v31 }
 0x922   :  { %19661 = vmatpush3.bf16.msra.mxu0 %v23944_v31 }
 0x923   :  { %19663 = vmatprep.subr.bf16.mxu0 %v23925_v56 }
 0x925   :  { %17608 = vmatmul.mubr.f32.vlgmr.msra.gmra.mrb[64].mxu0 %v12701_v32 }
 0x926   :  { %19665 = vmatpush3.bf16.msra.mxu0 %v23925_v56  ;;  %17618 = vmatprep.mubr.f32.mxu0 %v12692_v33  ;;  %v24234_v33 = vpack.c.bf16 %v13249_v49, %v13246_v50 }
 0x927   :  { %19667 = vmatprep.subr.bf16.mxu0 %v23935_v14 }
 0x92a   :  { %19669 = vmatpush3.bf16.msra.mxu0 %v23935_v14 }
 0x92b   :  { %19671 = vmatprep.subr.bf16.mxu0 %v23923_v20 }
 0x92d   :  { %17619 = vmatmul.mubr.f32.vlgmr.msra.gmra.mrb[64].mxu0 %v12702_v9 }
 0x92e   :  { %19673 = vmatpush3.bf16.msra.mxu0 %v23923_v20  ;;  %17629 = vmatprep.mubr.f32.mxu0 %v12693_v22  ;;  %v14077_v22 = vld [vmem:[%s24641_s1 + $0x1b8] sm:$0xff] }
 0x92f   :  { %19675 = vmatprep.subr.bf16.mxu0 %v23933_v1  ;;  %v13261_v19 = vand.u32 4294901760, %v14077_v22 }
 0x931   :  { %v24253_v11 = vsub.f32 %v14077_v22, %v13261_v19 }
 0x932   :  { %19677 = vmatpush3.bf16.msra.mxu0 %v23933_v1 }
 0x933   :  { %19679 = vmatprep.subr.bf16.mxu0 %v23929_v17 }
 0x935   :  { %17630 = vmatmul.mubr.f32.vlgmr.msra.gmra.mrb[64].mxu0 %v12703_v28 }
 0x936   :  { %19681 = vmatpush3.bf16.msra.mxu0 %v23929_v17  ;;  %17640 = vmatprep.mubr.f32.mxu0 %v12691_v41 }
 0x937   :  { %19683 = vmatprep.subr.bf16.mxu0 %v23939_v51 }
 0x93a   :  { %19685 = vmatpush3.bf16.msra.mxu0 %v23939_v51  ;;  %v14062_v51 = vld [vmem:[%s24641_s1 + $0x140] sm:$0xff] }
 0x93b   :  { %19687 = vmatprep.subr.bf16.mxu0 %v23923_v20  ;;  %v13216_v31 = vand.u32 4294901760, %v14062_v51 }
 0x93d   :  { %17641 = vmatmul.mubr.f32.vlgmr.msra.gmra.mrb[64].mxu0 %v12701_v32  ;;  %v24170_v25 = vsub.f32 %v14062_v51, %v13216_v31 }
 0x93e   :  { %19689 = vmatpush3.bf16.msra.mxu0 %v23923_v20  ;;  %17651 = vmatprep.mubr.f32.mxu0 %v12691_v41  ;;  %v14063_v20 = vld [vmem:[%s24641_s1 + $0x148] sm:$0xff]  ;;  %v24226_v41 = vpack.c.bf16 %v13237_v58, %v13234_v4 }
 0x93f   :  { %19691 = vmatprep.subr.bf16.mxu0 %v23933_v1  ;;  %v13219_v44 = vand.u32 4294901760, %v14063_v20 }
 0x941   :  { %v24168_v3 = vpack.c.bf16 %v13219_v44, %v13216_v31  ;;  %v24172_v47 = vsub.f32 %v14063_v20, %v13219_v44  ;;  %v14081_v31 = vld [vmem:[%s24641_s1 + $0x1d8] sm:$0xff] }
 0x942   :  { %19693 = vmatpush3.bf16.msra.mxu0 %v23933_v1  ;;  %v14064_v1 = vld [vmem:[%s24641_s1 + $0x150] sm:$0xff]  ;;  %v13273_v37 = vand.u32 4294901760, %v14081_v31 }
 0x943   :  { %v13222_v63 = vand.u32 4294901760, %v14064_v1  ;;  %19696 = vmatpush1.bf16.msra.mxu1 %v24168_v3  ;;  %v24809_v10 = vand.u32 4294901760, %v24172_v47 }
 0x944   :  { %19697 = vmatprep.subr.bf16.mxu1 %v24985_v29  ;;  %v24293_v2 = vsub.f32 %v14081_v31, %v13273_v37 }
 0x945   :  { %17652 = vmatmul.mubr.f32.vlgmr.msra.gmra.mrb[64].mxu0 %v12701_v32  ;;  %v24174_v36 = vsub.f32 %v14064_v1, %v13222_v63  ;;  %v24185_v34 = vpack.c.bf16 %v13225_v61, %v13222_v63  ;;  %v14076_v32 = vld [vmem:[%s24641_s1 + $0x1b0] sm:$0xff]  ;;  %v24810_v63 = vand.u32 4294901760, %v24170_v25  ;;  %v13341_v26 = vsub.f32 %v24172_v47, %v24809_v10 }
 0x946   :  { %v13258_v9 = vand.u32 4294901760, %v14076_v32  ;;  %v14080_v1 = vld [vmem:[%s24641_s1 + $0x1d0] sm:$0xff] }
 0x947   :  { %19699 = vmatpush1.bf16.msra.mxu1 %v24185_v34  ;;  %v13270_v44 = vand.u32 4294901760, %v14080_v1  ;;  %v13334_v61 = vsub.f32 %v24170_v25, %v24810_v63  ;;  %v13342_v55 = vand.u32 4294901760, %v13341_v26  ;;  %v24808_v13 = vand.u32 4294901760, %v24174_v36 }
 0x948   :  { %19700 = vmatprep.subr.bf16.mxu1 %v24985_v29  ;;  %v24249_v28 = vpack.c.bf16 %v13261_v19, %v13258_v9  ;;  %v24251_v12 = vsub.f32 %v14076_v32, %v13258_v9  ;;  %v13362_v32 = vsub.f32 %v24189_v23, %v24806_v62 }
 0x949   :  { %v24275_v16 = vpack.c.bf16 %v13273_v37, %v13270_v44  ;;  %v13335_v43 = vand.u32 4294901760, %v13334_v61  ;;  %v24291_v48 = vsub.f32 %v14080_v1, %v13270_v44  ;;  %v13348_v58 = vsub.f32 %v24174_v36, %v24808_v13 }
 0x94a   :  { %v13363_v9 = vand.u32 4294901760, %v13362_v32  ;;  %v24802_v37 = vand.u32 4294901760, %v24207_v57  ;;  %v24801_v61 = vand.u32 4294901760, %v24209_v24 }
 0x94b   :  { %19702 = vmatpush1.bf16.msra.mxu1 %v24215_v39  ;;  %v24295_v4 = vpack.c.bf16 %v13342_v55, %v13335_v43  ;;  %v13349_v49 = vand.u32 4294901760, %v13348_v58 }
 0x94c   :  { %19703 = vmatprep.subr.bf16.mxu1 %v24985_v29  ;;  %v13397_v43 = vsub.f32 %v24209_v24, %v24801_v61 }
 0x94d   :  { %v24307_v0 = vpack.c.bf16 %v13356_v53, %v13349_v49  ;;  %v13404_v49 = vsub.f32 %v24211_v40, %v24797_v5 }
 0x94e   :  { %v13398_v58 = vand.u32 4294901760, %v13397_v43  ;;  %v24792_v43 = vand.u32 4294901760, %v24251_v12 }
 0x94f   :  { %19705 = vmatpush1.bf16.msra.mxu1 %v24226_v41  ;;  %v13405_v32 = vand.u32 4294901760, %v13404_v49 }
 0x950   :  { %19706 = vmatprep.subr.bf16.mxu1 %v24985_v29  ;;  %v13432_v49 = vsub.f32 %v24251_v12, %v24792_v43 }
 0x953   :  { %19708 = vmatpush1.bf16.msra.mxu1 %v24230_v54 }
 0x954   :  { %19709 = vmatprep.subr.bf16.mxu1 %v24985_v29 }
 0x957   :  { %19711 = vmatpush1.bf16.msra.mxu1 %v24234_v33 }
 0x958   :  { %v24136_v56 = vpop.f32.mrb[56].mxu0  ;;  %19712 = vmatprep.subr.bf16.mxu1 %v24985_v29 }
 0x959   :  { %v24138_v52 = vpop.f32.mrb[57].mxu0 }
 0x95b   :  { %19714 = vmatpush1.bf16.msra.mxu1 %v24238_v30 }
 0x95c   :  { %19715 = vmatprep.subr.bf16.mxu1 %v24985_v29 }
 0x95f   :  { %19717 = vmatpush1.bf16.msra.mxu1 %v24249_v28 }
 0x960   :  { %19718 = vmatprep.subr.bf16.mxu1 %v24985_v29 }
 0x988   :  { %v17455_v17 = vpop.f32.mrb[58].mxu0 }
 0x989   :  { %v11529_v14 = vpop.f32.mrb[59].mxu0 }
 0x98a   :  { %13152 = vrot.lane.b32.xlu0 %v11529_v14, %s20374_s8  ;;  %v13264_v14 = vand.u32 4294901760, %v14078_v45 }
 0x98c   :  { %v24287_v8 = vsub.f32 %v14078_v45, %v13264_v14  ;;  %v24804_v45 = vand.u32 4294901760, %v24203_v60 }
 0x9b8   :  { %v24201_v46 = vpop.f32.mrb[60].mxu0 }
 0x9b9   :  { %v12066_v21 = vpop.f32.mrb[61].mxu0 }
 0x9ba   :  { %13160 = vrot.lane.b32.xlu1 %v12066_v21, %s20376_s11  ;;  %v24805_v21 = vand.u32 4294901760, %v24195_v38 }
 0x9bc   :  { %v13369_v22 = vsub.f32 %v24195_v38, %v24805_v21 }
 0x9be   :  { %13154 = vrot.lane.b32.xlu1 %v17455_v17, %s20374_s8  ;;  %v14079_v17 = vld [vmem:[%s24641_s1 + $0x1c8] sm:$0xff]  ;;  %v13370_v19 = vand.u32 4294901760, %v13369_v22 }
 0x9bf   :  { %v13267_v51 = vand.u32 4294901760, %v14079_v17 }
 0x9c1   :  { %v24263_v20 = vpack.c.bf16 %v13267_v51, %v13264_v14  ;;  %v24289_v59 = vsub.f32 %v14079_v17, %v13267_v51  ;;  %v24803_v17 = vand.u32 4294901760, %v24205_v18  ;;  %v24319_v14 = vpack.c.bf16 %v13370_v19, %v13363_v9 }
 0x9c2   :  { %v13376_v51 = vsub.f32 %v24203_v60, %v24804_v45  ;;  %v24793_v9 = vand.u32 4294901760, %v24219_v15  ;;  %v24791_v19 = vand.u32 4294901760, %v24222_v35 }
 0x9c3   :  { %19720 = vmatpush1.bf16.msra.mxu1 %v24263_v20  ;;  %v13383_v1 = vsub.f32 %v24205_v18, %v24803_v17 }
 0x9c4   :  { %19721 = vmatprep.subr.bf16.mxu1 %v24985_v29  ;;  %v13377_v31 = vand.u32 4294901760, %v13376_v51 }
 0x9c5   :  { %v13384_v44 = vand.u32 4294901760, %v13383_v1  ;;  %v13418_v1 = vsub.f32 %v24219_v15, %v24793_v9 }
 0x9c7   :  { %19723 = vmatpush1.bf16.msra.mxu1 %v24275_v16  ;;  %v24329_v26 = vpack.c.bf16 %v13384_v44, %v13377_v31  ;;  %v13425_v31 = vsub.f32 %v24222_v35, %v24791_v19  ;;  %v13419_v44 = vand.u32 4294901760, %v13418_v1  ;;  %v24798_v1 = vand.u32 4294901760, %v24289_v59 }
 0x9c8   :  { %19724 = vmatprep.subr.bf16.mxu1 %v24985_v29 }
 0x9e8   :  { %v17587_v7 = vpop.f32.mrb[62].mxu0 }
 0x9e9   :  { %13170 = vrot.lane.b32.xlu1 %v17587_v7, %s20375_s3  ;;  %v12603_v50 = vpop.f32.mrb[63].mxu0  ;;  %v24795_v7 = vand.u32 4294901760, %v24217_v6 }
 0x9ea   :  { %13168 = vrot.lane.b32.xlu0 %v12603_v50, %s20375_s3 }
 0x9eb   :  { %v13411_v53 = vsub.f32 %v24217_v6, %v24795_v7 }
 0x9ed   :  { %v13412_v22 = vand.u32 4294901760, %v13411_v53 }
 0x9ee   :  { %13162 = vrot.lane.b32.xlu0 %v24201_v46, %s20376_s11  ;;  %v13390_v46 = vsub.f32 %v24207_v57, %v24802_v37 }
 0x9ef   :  { %v24349_v51 = vpack.c.bf16 %v13412_v22, %v13405_v32  ;;  %v13433_v32 = vand.u32 4294901760, %v13432_v49  ;;  %v24796_v22 = vand.u32 4294901760, %v24287_v8  ;;  %v24800_v49 = vand.u32 4294901760, %v24293_v2 }
 0x9f0   :  { %v13391_v55 = vand.u32 4294901760, %v13390_v46  ;;  %v13426_v46 = vand.u32 4294901760, %v13425_v31 }
 0x9f1   :  { %v13446_v19 = vsub.f32 %v24287_v8, %v24796_v22  ;;  %v13467_v22 = vsub.f32 %v24293_v2, %v24800_v49  ;;  %v19764_v49 = vpack.c.bf16 %v24205_v18, %v24203_v60 }
 0x9f2   :  { %v24339_v50 = vpack.c.bf16 %v13398_v58, %v13391_v55  ;;  %v24794_v55 = vand.u32 4294901760, %v24253_v11  ;;  %v24359_v58 = vpack.c.bf16 %v13426_v46, %v13419_v44  ;;  %v13453_v44 = vsub.f32 %v24289_v59, %v24798_v1 }
 0x9f3   :  { %v13447_v43 = vand.u32 4294901760, %v13446_v19  ;;  %v13468_v1 = vand.u32 4294901760, %v13467_v22  ;;  %v19755_v19 = vpack.c.bf16 %v24172_v47, %v24170_v25 }
 0x9f4   :  { %v13439_v53 = vsub.f32 %v24253_v11, %v24794_v55  ;;  %v13454_v9 = vand.u32 4294901760, %v13453_v44  ;;  %v24799_v55 = vand.u32 4294901760, %v24291_v48 }
 0x9f6   :  { %v13440_v31 = vand.u32 4294901760, %v13439_v53  ;;  %v24379_v7 = vpack.c.bf16 %v13454_v9, %v13447_v43  ;;  %v13460_v53 = vsub.f32 %v24291_v48, %v24799_v55  ;;  %v19761_v9 = vpack.c.bf16 %v24195_v38, %v24189_v23 }
 0x9f8   :  { %v24375_v46 = vpack.c.bf16 %v13440_v31, %v13433_v32  ;;  %v13461_v5 = vand.u32 4294901760, %v13460_v53  ;;  %v19758_v31 = vpack.c.bf16 %v24187_v42, %v24174_v36 }
 0x9fa   :  { %v24387_v32 = vpack.c.bf16 %v13468_v1, %v13461_v5 }
 0x9fc   :  { %v13153_v10 = vpop.permute.xlu0 %13152 }
 0xa18   :  { %v17653_v43 = vpop.f32.mrb[64].mxu0 }
 0xa19   :  { %v13140_v44 = vpop.f32.mrb[65].mxu0  ;;  %v13213_v62 = vsel %vm4889_vm0, %v17653_v43, 0 }
 0xa1a   :  { %v13210_v55 = vsel %vm4889_vm0, %v13140_v44, 0  ;;  %v24420_v13 = vand.u32 4294901760, %v13213_v62 }
 0xa1b   :  { %v24398_v53 = vand.u32 4294901760, %v13210_v55 }
 0xa1d   :  { %v24401_v5 = vsub.f32 %v13210_v55, %v24398_v53 }
 0xa1f   :  { %v24811_v1 = vand.u32 4294901760, %v24401_v5 }
 0xa21   :  { %v13302_v61 = vsub.f32 %v24401_v5, %v24811_v1 }
 0xa23   :  { %v13303_v37 = vand.u32 4294901760, %v13302_v61  ;;  %v24425_v61 = vsub.f32 %v13213_v62, %v24420_v13 }
 0xa25   :  { %13304 = vmatprep.mubr.f32.mxu1 %v13303_v37  ;;  %v13174_v37 = vsel %vm4889_vm0, %v24138_v52, %v13153_v10  ;;  %v13316_v43 = vand.u32 4294901760, %v24425_v61 }
 0xa2c   :  { %v13161_v27 = vpop.permute.xlu1 %13160 }
 0xa2d   :  { %v13176_v63 = vsel %vm4898_vm1, %v13174_v37, %v13161_v27 }
 0xa30   :  { %v13155_v55 = vpop.permute.xlu1 %13154 }
 0xa31   :  { %v13175_v21 = vsel %vm4889_vm0, %v24136_v56, %v13155_v55 }
 0xa5b   :  { %v13171_v10 = vpop.permute.xlu1 %13170 }
 0xa5c   :  { %v13169_v1 = vpop.permute.xlu0 %13168 }
 0xa5d   :  { %v13178_v45 = vsel %vm4907_vm2, %v13176_v63, %v13169_v1  ;;  %v13317_v63 = vsub.f32 %v24425_v61, %v13316_v43 }
 0xa5e   :  { %v24429_v17 = vand.u32 4294901760, %v13178_v45 }
 0xa5f   :  { %v13318_v55 = vand.u32 4294901760, %v13317_v63 }
 0xa60   :  { %v24435_v44 = vsub.f32 %v13178_v45, %v24429_v17  ;;  %v13163_v52 = vpop.permute.xlu0 %13162 }
 0xa61   :  { %v13177_v62 = vsel %vm4898_vm1, %v13175_v21, %v13163_v52 }
 0xa62   :  { %v13307_v27 = vand.u32 4294901760, %v24435_v44  ;;  %v13179_v37 = vsel %vm4907_vm2, %v13177_v62, %v13171_v10 }
 0xa63   :  { %v24440_v22 = vand.u32 4294901760, %v13179_v37 }
 0xa64   :  { %v13308_v56 = vsub.f32 %v24435_v44, %v13307_v27 }
 0xa65   :  { %v24449_v45 = vsub.f32 %v13179_v37, %v24440_v22 }
 0xa66   :  { %v13309_v1 = vand.u32 4294901760, %v13308_v56 }
 0xa67   :  { %v13322_v21 = vand.u32 4294901760, %v24449_v45 }
 0xa68   :  { %13310 = vmatmul.mubr.f32.vlgmr.msra.gmra.mrb[48].mxu1 %v13309_v1 }
 0xa69   :  { %19726 = vmatpush1.bf16.msra.mxu1 %v24295_v4  ;;  %13319 = vmatprep.mubr.f32.mxu1 %v13318_v55  ;;  %v13323_v52 = vsub.f32 %v24449_v45, %v13322_v21  ;;  %v25053_v4 = vpack.c.bf16 %v24209_v24, %v24207_v57 }
 0xa6a   :  { %19727 = vmatprep.subr.bf16.mxu1 %v24985_v29 }
 0xa6b   :  { %v13324_v10 = vand.u32 4294901760, %v13323_v52 }
 0xa6d   :  { %19729 = vmatpush1.bf16.msra.mxu1 %v24307_v0  ;;  %v25054_v0 = vpack.c.bf16 %v24217_v6, %v24211_v40 }
 0xa6e   :  { %13325 = vmatmul.mubr.f32.gmra.mrb[50].mxu1 %v13324_v10  ;;  %19730 = vmatprep.subr.bf16.mxu1 %v24985_v29 }
 0xa6f   :  { %13495 = vmatprep.mubr.f32.mxu1 %v24398_v53 }
 0xa71   :  { %19732 = vmatpush1.bf16.msra.mxu1 %v24319_v14  ;;  %v25055_v14 = vpack.c.bf16 %v24222_v35, %v24219_v15 }
 0xa72   :  { %19733 = vmatprep.subr.bf16.mxu1 %v24985_v29 }
 0xa75   :  { %19735 = vmatpush1.bf16.msra.mxu1 %v24329_v26  ;;  %v25056_v26 = vpack.c.bf16 %v24253_v11, %v24251_v12 }
 0xa76   :  { %19736 = vmatprep.subr.bf16.mxu1 %v24985_v29 }
 0xa79   :  { %19738 = vmatpush1.bf16.msra.mxu1 %v24339_v50  ;;  %v25058_v50 = vpack.c.bf16 %v24293_v2, %v24291_v48 }
 0xa7a   :  { %19739 = vmatprep.subr.bf16.mxu1 %v24985_v29 }
 0xa7d   :  { %19741 = vmatpush1.bf16.msra.mxu1 %v24349_v51  ;;  %v25059_v51 = vand.u32 4294901760, %v24401_v5 }
 0xa7e   :  { %19742 = vmatprep.subr.bf16.mxu1 %v24985_v29 }
 0xa81   :  { %19744 = vmatpush1.bf16.msra.mxu1 %v24359_v58  ;;  %v25060_v58 = vand.u32 4294901760, %v24170_v25  ;;  %v25064_v25 = vand.u32 4294901760, %v24189_v23  ;;  %v25070_v23 = vand.u32 4294901760, %v24211_v40  ;;  %v25076_v40 = vand.u32 4294901760, %v24287_v8 }
 0xa82   :  { %19745 = vmatprep.subr.bf16.mxu1 %v24985_v29 }
 0xa85   :  { %19747 = vmatpush1.bf16.msra.mxu1 %v24375_v46  ;;  %v25061_v46 = vand.u32 4294901760, %v24172_v47  ;;  %v25065_v47 = vand.u32 4294901760, %v24195_v38  ;;  %v25071_v38 = vand.u32 4294901760, %v24217_v6  ;;  %v25077_v6 = vand.u32 4294901760, %v24289_v59 }
 0xa86   :  { %19748 = vmatprep.subr.bf16.mxu1 %v24985_v29 }
 0xa87   :  { %v19830_v62 = vpack.c.bf16 %v25071_v38, %v25070_v23  ;;  %v19839_v63 = vpack.c.bf16 %v25077_v6, %v25076_v40 }
 0xa89   :  { %19750 = vmatpush1.bf16.msra.mxu1 %v24379_v7  ;;  %v25057_v7 = vpack.c.bf16 %v24289_v59, %v24287_v8 }
 0xa8a   :  { %19751 = vmatprep.subr.bf16.mxu1 %v24985_v29 }
 0xa8d   :  { %19753 = vmatpush1.bf16.msra.mxu1 %v24387_v32  ;;  %v25062_v32 = vand.u32 4294901760, %v24174_v36  ;;  %v25066_v36 = vand.u32 4294901760, %v24203_v60  ;;  %v25072_v60 = vand.u32 4294901760, %v24219_v15  ;;  %v25078_v15 = vand.u32 4294901760, %v24291_v48 }
 0xa8e   :  { %19754 = vmatprep.subr.bf16.mxu1 %v24985_v29 }
 0xa90   :  { %13497 = vmatmul.mubr.f32.vlgmr.msra.gmra.mrb[48].mxu1 %v24429_v17 }
 0xa91   :  { %13502 = vmatprep.mubr.f32.mxu1 %v24420_v13  ;;  %19756 = vmatpush1.bf16.msra.mxu1 %v19755_v19  ;;  %v25063_v19 = vand.u32 4294901760, %v24187_v42  ;;  %v25067_v42 = vand.u32 4294901760, %v24205_v18  ;;  %v25073_v18 = vand.u32 4294901760, %v24222_v35  ;;  %v25079_v35 = vand.u32 4294901760, %v24293_v2 }
 0xa92   :  { %19757 = vmatprep.subr.bf16.mxu1 %v24985_v29 }
 0xa93   :  { %v19842_v56 = vpack.c.bf16 %v25079_v35, %v25078_v15 }
 0xa94   :  { %13504 = vmatmul.mubr.f32.gmra.mrb[50].mxu1 %v24440_v22 }
 0xa95   :  { %19759 = vmatpush1.bf16.msra.mxu1 %v19758_v31  ;;  %13615 = vmatprep.mubr.f32.mxu1 %v24401_v5  ;;  %v19818_v31 = vpack.c.bf16 %v25063_v19, %v25062_v32  ;;  %v19824_v5 = vpack.c.bf16 %v25067_v42, %v25066_v36 }
 0xa96   :  { %19760 = vmatprep.subr.bf16.mxu1 %v24985_v29 }
 0xa99   :  { %19762 = vmatpush1.bf16.msra.mxu1 %v19761_v9  ;;  %v19821_v9 = vpack.c.bf16 %v25065_v47, %v25064_v25 }
 0xa9a   :  { %19763 = vmatprep.subr.bf16.mxu1 %v24985_v29 }
 0xa9d   :  { %19765 = vmatpush1.bf16.msra.mxu1 %v19764_v49  ;;  %v19815_v49 = vpack.c.bf16 %v25061_v46, %v25060_v58 }
 0xa9e   :  { %19766 = vmatprep.subr.bf16.mxu1 %v24985_v29 }
 0xaa1   :  { %19768 = vmatpush1.bf16.msra.mxu1 %v25053_v4 }
 0xaa2   :  { %19769 = vmatprep.subr.bf16.mxu1 %v24985_v29 }
 0xaa5   :  { %19771 = vmatpush1.bf16.msra.mxu1 %v25054_v0 }
 0xaa6   :  { %19772 = vmatprep.subr.bf16.mxu1 %v24985_v29 }
 0xaa9   :  { %19774 = vmatpush1.bf16.msra.mxu1 %v25055_v14 }
 0xaaa   :  { %19775 = vmatprep.subr.bf16.mxu1 %v24985_v29 }
 0xaad   :  { %19777 = vmatpush1.bf16.msra.mxu1 %v25056_v26 }
 0xaae   :  { %19778 = vmatprep.subr.bf16.mxu1 %v24985_v29 }
 0xab1   :  { %19780 = vmatpush1.bf16.msra.mxu1 %v25057_v7 }
 0xab2   :  { %19781 = vmatprep.subr.bf16.mxu1 %v24985_v29 }
 0xab5   :  { %19783 = vmatpush1.bf16.msra.mxu1 %v25058_v50 }
 0xab6   :  { %19784 = vmatprep.subr.bf16.mxu1 %v24985_v29 }
 0xab8   :  { %13618 = vmatmul.mubr.f32.vlgmr.msra.gmra.mrb[48].mxu1 %v24435_v44  ;;  %v25068_v44 = vand.u32 4294901760, %v24207_v57  ;;  %v25074_v57 = vand.u32 4294901760, %v24251_v12 }
 0xab9   :  { %13624 = vmatprep.mubr.f32.mxu1 %v24425_v61  ;;  %19786 = vmatpush1.bf16.msra.mxu1 %v24168_v3  ;;  %v25069_v61 = vand.u32 4294901760, %v24209_v24  ;;  %v25075_v24 = vand.u32 4294901760, %v24253_v11 }
 0xaba   :  { %19787 = vmatprep.subr.bf16.mxu1 %v24985_v29 }
 0xabb   :  { %v19836_v37 = vpack.c.bf16 %v25075_v24, %v25074_v57 }
 0xabc   :  { %13627 = vmatmul.mubr.f32.gmra.mrb[50].mxu1 %v24449_v45 }
 0xabd   :  { %19789 = vmatpush1.bf16.msra.mxu1 %v24185_v34  ;;  %13719 = vmatprep.mubr.f32.mxu1 %v25059_v51 }
 0xabe   :  { %19790 = vmatprep.subr.bf16.mxu1 %v24985_v29 }
 0xac1   :  { %19792 = vmatpush1.bf16.msra.mxu1 %v24215_v39 }
 0xac2   :  { %19793 = vmatprep.subr.bf16.mxu1 %v24985_v29 }
 0xac5   :  { %19795 = vmatpush1.bf16.msra.mxu1 %v24226_v41 }
 0xac6   :  { %19796 = vmatprep.subr.bf16.mxu1 %v24985_v29 }
 0xac9   :  { %19798 = vmatpush1.bf16.msra.mxu1 %v24230_v54 }
 0xaca   :  { %19799 = vmatprep.subr.bf16.mxu1 %v24985_v29 }
 0xacd   :  { %19801 = vmatpush1.bf16.msra.mxu1 %v24234_v33 }
 0xace   :  { %19802 = vmatprep.subr.bf16.mxu1 %v24985_v29 }
 0xad1   :  { %19804 = vmatpush1.bf16.msra.mxu1 %v24238_v30 }
 0xad2   :  { %19805 = vmatprep.subr.bf16.mxu1 %v24985_v29 }
 0xad5   :  { %19807 = vmatpush1.bf16.msra.mxu1 %v24249_v28 }
 0xad6   :  { %19808 = vmatprep.subr.bf16.mxu1 %v24985_v29 }
 0xad9   :  { %19810 = vmatpush1.bf16.msra.mxu1 %v24263_v20 }
 0xada   :  { %19811 = vmatprep.subr.bf16.mxu1 %v24985_v29 }
 0xadd   :  { %19813 = vmatpush1.bf16.msra.mxu1 %v24275_v16 }
 0xade   :  { %19814 = vmatprep.subr.bf16.mxu1 %v24985_v29 }
 0xae0   :  { %13723 = vmatmul.mubr.f32.vlgmr.msra.gmra.mrb[48].mxu1 %v13307_v27  ;;  %v19833_v27 = vpack.c.bf16 %v25073_v18, %v25072_v60 }
 0xae1   :  { %13730 = vmatprep.mubr.f32.mxu1 %v13316_v43  ;;  %19816 = vmatpush1.bf16.msra.mxu1 %v19815_v49  ;;  %v19827_v43 = vpack.c.bf16 %v25069_v61, %v25068_v44 }
 0xae2   :  { %19817 = vmatprep.subr.bf16.mxu1 %v24985_v29 }
 0xae4   :  { %13734 = vmatmul.mubr.f32.gmra.mrb[50].mxu1 %v13322_v21 }
 0xae5   :  { %19819 = vmatpush1.bf16.msra.mxu1 %v19818_v31  ;;  %13864 = vmatprep.mubr.f32.mxu1 %v24398_v53 }
 0xae6   :  { %19820 = vmatprep.subr.bf16.mxu1 %v24985_v29 }
 0xae9   :  { %19822 = vmatpush1.bf16.msra.mxu1 %v19821_v9 }
 0xaea   :  { %19823 = vmatprep.subr.bf16.mxu1 %v24985_v29 }
 0xaed   :  { %19825 = vmatpush1.bf16.msra.mxu1 %v19824_v5 }
 0xaee   :  { %19826 = vmatprep.subr.bf16.mxu1 %v24985_v29 }
 0xaf1   :  { %19828 = vmatpush1.bf16.msra.mxu1 %v19827_v43 }
 0xaf2   :  { %19829 = vmatprep.subr.bf16.mxu1 %v24985_v29 }
 0xaf5   :  { %19831 = vmatpush1.bf16.msra.mxu1 %v19830_v62 }
 0xaf6   :  { %19832 = vmatprep.subr.bf16.mxu1 %v24985_v29 }
 0xaf9   :  { %19834 = vmatpush1.bf16.msra.mxu1 %v19833_v27 }
 0xafa   :  { %19835 = vmatprep.subr.bf16.mxu1 %v24985_v29 }
 0xafd   :  { %19837 = vmatpush1.bf16.msra.mxu1 %v19836_v37 }
 0xafe   :  { %19838 = vmatprep.subr.bf16.mxu1 %v24985_v29 }
 0xb01   :  { %19840 = vmatpush1.bf16.msra.mxu1 %v19839_v63 }
 0xb02   :  { %19841 = vmatprep.subr.bf16.mxu1 %v24985_v29 }
 0xb05   :  { %19843 = vmatpush1.bf16.msra.mxu1 %v19842_v56 }
 0xb06   :  { %19844 = vmatprep.subr.bf16.mxu1 %v24985_v29 }
 0xb08   :  { %13866 = vmatmul.mubr.f32.vlgmr.msra.gmra.mrb[48].mxu1 %v24429_v17 }
 0xb09   :  { %13871 = vmatprep.mubr.f32.mxu1 %v24420_v13  ;;  %19846 = vmatpush1.bf16.msra.mxu1 %v24168_v3  ;;  %v14083_v3 = vld [vmem:[%s24643_s2 + $0x2] ss:$0 sm:$0xff] }
 0xb0a   :  { %19847 = vmatprep.subr.bf16.mxu1 %v24985_v29 }
 0xb0c   :  { %13873 = vmatmul.mubr.f32.gmra.mrb[50].mxu1 %v24440_v22 }
 0xb0d   :  { %19849 = vmatpush1.bf16.msra.mxu1 %v24185_v34  ;;  %13963 = vmatprep.mubr.f32.mxu1 %v24398_v53 }
 0xb0e   :  { %19850 = vmatprep.subr.bf16.mxu1 %v24985_v29 }
 0xb11   :  { %19852 = vmatpush1.bf16.msra.mxu1 %v24215_v39 }
 0xb12   :  { %19853 = vmatprep.subr.bf16.mxu1 %v24985_v29 }
 0xb15   :  { %19855 = vmatpush1.bf16.msra.mxu1 %v24226_v41 }
 0xb16   :  { %19856 = vmatprep.subr.bf16.mxu1 %v24985_v29 }
 0xb19   :  { %19858 = vmatpush1.bf16.msra.mxu1 %v24230_v54 }
 0xb1a   :  { %19859 = vmatprep.subr.bf16.mxu1 %v24985_v29 }
 0xb1d   :  { %19861 = vmatpush1.bf16.msra.mxu1 %v24234_v33 }
 0xb1e   :  { %19862 = vmatprep.subr.bf16.mxu1 %v24985_v29 }
 0xb21   :  { %19864 = vmatpush1.bf16.msra.mxu1 %v24238_v30 }
 0xb22   :  { %19865 = vmatprep.subr.bf16.mxu1 %v24985_v29 }
 0xb25   :  { %19867 = vmatpush1.bf16.msra.mxu1 %v24249_v28 }
 0xb26   :  { %19868 = vmatprep.subr.bf16.mxu1 %v24985_v29 }
 0xb29   :  { %19870 = vmatpush1.bf16.msra.mxu1 %v24263_v20 }
 0xb2a   :  { %19871 = vmatprep.subr.bf16.mxu1 %v24985_v29 }
 0xb2d   :  { %19873 = vmatpush1.bf16.msra.mxu1 %v24275_v16 }
 0xb30   :  { %13965 = vmatmul.mubr.f32.vlgmr.msra.gmra.mrb[48].mxu1 %v24429_v17 }
 0xb31   :  { %13970 = vmatprep.mubr.f32.mxu1 %v24420_v13 }
 0xb34   :  { %13972 = vmatmul.mubr.f32.gmra.mrb[50].mxu1 %v24440_v22 }
 0xc03   :  { %v13966_v34 = vpop.f32.mrb[48].mxu1 }
 0xc04   :  { %v19898_v39 = vadd.f32 %v14083_v3, %v13966_v34  ;;  %v13968_v41 = vpop.f32.mrb[49].mxu1 }
 0xc06   :  { %13977 = vst.msk [vmem:[%s24645_s6] sm:$0xff] %vm4889_vm0, %v19898_v39 }
 0xc07   :  { %v13973_v29 = vpop.f32.mrb[50].mxu1 }
 0xc08   :  { %v19899_v54 = vadd.f32 %v14083_v3, %v13973_v29  ;;  %v13975_v33 = vpop.f32.mrb[51].mxu1 }
 0xc0a   :  { %13978 = vst.msk [vmem:[%s24645_s6 + $0x8] sm:$0xff] %vm4889_vm0, %v19899_v54 }

</bundles_post_ra>
